<compile_context>
chip_gen: v7x
topology: tpu7x:2x2x1
jax: 0.10.0
libtpu: 0.0.40
codegen_flags: <defaults>
</compile_context>

<pallas_src>
import jax
import jax.numpy as jnp
from jax.experimental import pallas as pl
from jax.experimental.pallas import tpu as pltpu


# ----------------------------- configuration (small) -----------------------------
B = 2            # batch
T = 2            # video frames (already time-compressed latents)
C_IN = 4         # latent channels (in_channels)
H_LAT = 16       # latent height
W_LAT = 16       # latent width
PATCH = 2        # patch size
HIDDEN = 32      # hidden_size of the control adapter / main model
TEXT_HIDDEN = 16 # text_hidden_size for ImagePatchEmbeddingMixin.text_proj
TEXT_LEN = 8     # context sequence length
NUM_LAYERS = 2   # number of adapter layers (== num control layers)
TIME_EMBED_DIM = HIDDEN
DTYPE = jnp.float32

N_H = H_LAT // PATCH
N_W = W_LAT // PATCH
N_PATCH = T * N_H * N_W               # patch tokens per batch element = 128
SEQ = TEXT_LEN + N_PATCH              # tokens per batch element       = 136
ROWS = B * SEQ                        # total rows                     = 272
K_PATCH = C_IN * PATCH * PATCH        # patch-embed contraction dim    = 16
K_COMB = K_PATCH + TEXT_HIDDEN + 2    # block-diag features + 2 bias-indicator cols = 34


# ----------------------------- Pallas kernel -----------------------------
def _control_diff_warp_kernel(act_ref, temb_ref, cw_ref, mw_ref, sp_ref,
                              w1_ref, w2_ref, zw_ref, tew_ref, teb_ref,
                              ctrl_ref, hid_ref, emb_ref):
    """Entire ControlDiffWarp implementable forward in one kernel.

    act_ref : (ROWS, K_COMB) pre-interleaved block-diagonal activation (token order).
    ctrl_ref: (NUM_LAYERS, ROWS, HIDDEN) stacked zero_linear outputs.
    hid_ref : (ROWS, HIDDEN) main-model word embedding (text + patch, token order).
    emb_ref : (B, TIME_EMBED_DIM) main-model time embedding.
    """
    act = act_ref[...]

    # --- main model: ImagePatchEmbeddingMixin.word_embedding_forward as one matmul ---
    hid_ref[...] = jnp.dot(act, mw_ref[...],
                           preferred_element_type=jnp.float32).astype(hid_ref.dtype)

    # --- main model: time_embed = Sequential(linear, SiLU, linear) ---
    h = jnp.dot(temb_ref[...], tew_ref[0],
                preferred_element_type=jnp.float32) + teb_ref[0:1, :]
    h = h * jax.nn.sigmoid(h)
    emb = jnp.dot(h, tew_ref[1], preferred_element_type=jnp.float32) + teb_ref[1:2, :]
    emb_ref[...] = emb.astype(emb_ref.dtype)

    # --- ControlMLPAdapter: embed, then per layer LayerNorm -> Linear -> SiLU -> Linear
    #     -> residual, then zero_linear; layer loop unrolled, all weights VMEM resident ---
    hidden = jnp.dot(act, cw_ref[...], preferred_element_type=jnp.float32)   # (ROWS, H)
    inv_h = 1.0 / HIDDEN
    for l in range(NUM_LAYERS):
        x = hidden
        sp = sp_ref[l]                               # (4, 2H) slab: ln_g, ln_b, b1, b2
        ln_g = sp[0:1, :HIDDEN]
        ln_b = sp[1:2, :HIDDEN]
        b1 = sp[2:3, :]
        b2 = sp[3:4, :HIDDEN]
        # LayerNorm with independent sum / sum-of-squares (concurrent XLU reductions)
        mu = jnp.sum(x, axis=-1, keepdims=True) * inv_h
        ex2 = jnp.sum(x * x, axis=-1, keepdims=True) * inv_h
        var = ex2 - mu * mu
        xn = (x - mu) * jax.lax.rsqrt(var + 1e-5) * ln_g + ln_b   # torch eps default 1e-5
        h1 = jnp.dot(xn, w1_ref[l], preferred_element_type=jnp.float32) + b1
        h1 = h1 * jax.nn.sigmoid(h1)                 # SiLU
        y = jnp.dot(h1, w2_ref[l], preferred_element_type=jnp.float32) + b2
        hidden = y + x                               # hidden = adapter(hidden) + hidden
        ctrl_ref[l] = jnp.dot(hidden, zw_ref[l],
                              preferred_element_type=jnp.float32).astype(ctrl_ref.dtype)
    # NOTE(scaling): before growing HIDDEN to production size -> bf16 matmul operands,
    # a "parallel" row-tile grid axis (v7x has 2 TCs), and K-tiled weight streaming
    # (P3 accumulator) so stacked weights don't exceed v7x's 64 MiB VMEM.


# ----------------------------- wrappers / glue -----------------------------
def _full_spec(shape):
    """Single full-extent block for grid=(1,)."""
    zeros = (0,) * len(shape)
    return pl.BlockSpec(shape, lambda i, _z=zeros: _z)


def _patchify(images):
    """(B, T, C, H, W) -> (B, T*nH*nW, C*p*p), row order (t, nH, nW), feature (C, ph, pw)
    — matches Conv2d(kernel=stride=patch) + flatten(3).transpose(2,3) + 'b t n d -> b (t n) d'."""
    bx, tx, cx, hx, wx = images.shape
    p = PATCH
    xp = images.reshape(bx, tx, cx, hx // p, p, wx // p, p)
    xp = jnp.transpose(xp, (0, 1, 3, 5, 2, 4, 6))
    return xp.reshape(bx, tx * (hx // p) * (wx // p), cx * p * p)


def _build_combined_activation(x, context):
    """Pre-interleaved block-diagonal activation (ROWS, K_COMB), token order
    [text tokens ; patch tokens] per batch. Columns: [patch feats | text feats | 1_patch | 1_text]."""
    xp = _patchify(x).astype(DTYPE)                        # (B, N_PATCH, K_PATCH)
    ctx = context.astype(DTYPE)                            # (B, TEXT_LEN, TEXT_HIDDEN)
    text_rows = jnp.concatenate([
        jnp.zeros((B, TEXT_LEN, K_PATCH), DTYPE), ctx,
        jnp.zeros((B, TEXT_LEN, 1), DTYPE), jnp.ones((B, TEXT_LEN, 1), DTYPE)], axis=-1)
    patch_rows = jnp.concatenate([
        xp, jnp.zeros((B, N_PATCH, TEXT_HIDDEN), DTYPE),
        jnp.ones((B, N_PATCH, 1), DTYPE), jnp.zeros((B, N_PATCH, 1), DTYPE)], axis=-1)
    return jnp.concatenate([text_rows, patch_rows], axis=1).reshape(ROWS, K_COMB)


def timestep_embedding(timesteps, dim, max_period=10000.0):
    # tiny (B, dim) sinusoid; XLA glue fused under jit, feeds the fused kernel
    half = dim // 2
    freqs = jnp.exp(-jnp.log(max_period) * jnp.arange(half, dtype=jnp.float32) / half)
    args = timesteps.astype(jnp.float32)[:, None] * freqs[None, :]
    return jnp.concatenate([jnp.cos(args), jnp.sin(args)], axis=-1).astype(DTYPE)


def control_diff_warp_forward(main_params, control_params, x, timesteps, context):
    """ControlDiffWarp.forward: control_model(...) + main_model prefix — ONE pallas_call.

    Returns the main-model word embedding / time embedding and the stacked per-layer
    control outputs (what the SAT backbone would consume per layer).
    """
    # TODO(synk): semantic_conditioner (external VQ/EVA encoder via instantiate_from_config)
    # only populates the inference registry cache and never feeds the adapter hidden path; skipped.
    act = _build_combined_activation(x, context)
    t_emb = timestep_embedding(timesteps, HIDDEN)

    ctrl, hidden, emb = pl.pallas_call(
        _control_diff_warp_kernel,
        out_shape=(jax.ShapeDtypeStruct((NUM_LAYERS, ROWS, HIDDEN), DTYPE),
                   jax.ShapeDtypeStruct((ROWS, HIDDEN), DTYPE),
                   jax.ShapeDtypeStruct((B, TIME_EMBED_DIM), DTYPE)),
        grid=(1,),
        in_specs=[
            _full_spec((ROWS, K_COMB)),                     # act
            _full_spec((B, HIDDEN)),                        # t_emb
            _full_spec((K_COMB, HIDDEN)),                   # control embed_w (block-diag)
            _full_spec((K_COMB, HIDDEN)),                   # main embed_w (block-diag)
            _full_spec((NUM_LAYERS, 4, 2 * HIDDEN)),        # packed ln_g/ln_b/b1/b2
            _full_spec((NUM_LAYERS, HIDDEN, 2 * HIDDEN)),   # w1
            _full_spec((NUM_LAYERS, 2 * HIDDEN, HIDDEN)),   # w2
            _full_spec((NUM_LAYERS, HIDDEN, HIDDEN)),       # zero_w
            _full_spec((2, HIDDEN, TIME_EMBED_DIM)),        # te_w (stacked)
            _full_spec((2, TIME_EMBED_DIM)),                # te_b (stacked)
        ],
        out_specs=(_full_spec((NUM_LAYERS, ROWS, HIDDEN)),
                   _full_spec((ROWS, HIDDEN)),
                   _full_spec((B, TIME_EMBED_DIM))),
        compiler_params=pltpu.CompilerParams(dimension_semantics=("arbitrary",)),
    )(act, t_emb,
      control_params["embed_w"], main_params["embed_w"],
      control_params["adapter_small"], control_params["w1"], control_params["w2"],
      control_params["zero_w"], main_params["te_w"], main_params["te_b"])

    # TODO(synk): the SAT BaseModel transformer backbone (pos-embed/adaln mixins consuming
    # `emb`, per-layer addition of the control outputs) and the final unpatchify layer are
    # external sat-library modules not defined in this file; not reproduced here.
    return {"hidden": hidden.reshape(B, SEQ, HIDDEN),
            "emb": emb,
            "control_layers_output": ctrl.reshape(NUM_LAYERS, B, SEQ, HIDDEN)}


control_diff_warp_forward_jit = jax.jit(control_diff_warp_forward)


# ----------------------------- deterministic parameter init -----------------------------
def init_params(key):
    keys = iter(jax.random.split(key, 24))

    def nrm(shape, scale=0.02):
        return (scale * jax.random.normal(next(keys), shape, dtype=jnp.float32)).astype(DTYPE)

    def embed_weight():
        # Conv2d(C_IN, HIDDEN, kernel=stride=PATCH) weight -> matmul layout once at init.
        conv_w = nrm((HIDDEN, C_IN, PATCH, PATCH))
        proj_w = conv_w.reshape(HIDDEN, K_PATCH).T           # (K_PATCH, H)
        proj_b = jnp.zeros((1, HIDDEN), DTYPE)               # reinit(): conv bias = 0
        text_w = nrm((TEXT_HIDDEN, HIDDEN))                  # nn.Linear(text_hidden, hidden)
        text_b = nrm((1, HIDDEN))
        # block-diagonal fused layout: [proj_w ; text_w ; proj_b ; text_b]
        return jnp.concatenate([proj_w, text_w, proj_b, text_b], axis=0)   # (K_COMB, H)

    def pad_last(a, width):
        return jnp.pad(a, ((0, 0), (0, width - a.shape[-1])))

    # ---- control model (ControlMLPAdapter) ----
    ln_g = jnp.ones((NUM_LAYERS, HIDDEN), DTYPE)              # nn.LayerNorm affine defaults
    ln_b = jnp.zeros((NUM_LAYERS, HIDDEN), DTYPE)
    b1 = jnp.stack([nrm((2 * HIDDEN,)) for _ in range(NUM_LAYERS)])
    b2 = jnp.stack([nrm((HIDDEN,)) for _ in range(NUM_LAYERS)])
    adapter_small = jnp.stack(
        [pad_last(ln_g, 2 * HIDDEN), pad_last(ln_b, 2 * HIDDEN), b1, pad_last(b2, 2 * HIDDEN)],
        axis=1)                                               # (L, 4, 2H)
    control = {
        "embed_w": embed_weight(),
        "adapter_small": adapter_small,
        "w1": jnp.stack([nrm((HIDDEN, 2 * HIDDEN)) for _ in range(NUM_LAYERS)]),
        "w2": jnp.stack([nrm((2 * HIDDEN, HIDDEN)) for _ in range(NUM_LAYERS)]),
        # zero_module() zero-inits these in the real model; non-zero here so the
        # correctness check actually exercises the matmul path (forward semantics identical).
        "zero_w": jnp.stack([nrm((HIDDEN, HIDDEN)) for _ in range(NUM_LAYERS)]),
    }

    # ---- main model (DiffusionTransformer implementable prefix) ----
    main = {
        "embed_w": embed_weight(),
        "te_w": jnp.stack([nrm((HIDDEN, TIME_EMBED_DIM)),
                           nrm((TIME_EMBED_DIM, TIME_EMBED_DIM))]),
        "te_b": jnp.stack([nrm((TIME_EMBED_DIM,)), nrm((TIME_EMBED_DIM,))]),
    }
    return main, control


# ----------------------------- pure-JAX reference (sanity) -----------------------------
def reference_forward(main_params, control_params, x, timesteps, context):
    hp = jax.lax.Precision.HIGHEST
    xp = _patchify(x).reshape(B * N_PATCH, K_PATCH)
    ctx2 = context.reshape(B * TEXT_LEN, TEXT_HIDDEN)

    def embed(embed_w):
        proj_w = embed_w[:K_PATCH]
        text_w = embed_w[K_PATCH:K_PATCH + TEXT_HIDDEN]
        proj_b = embed_w[K_PATCH + TEXT_HIDDEN]
        text_b = embed_w[K_PATCH + TEXT_HIDDEN + 1]
        pe = (jnp.dot(xp, proj_w, precision=hp) + proj_b).reshape(B, N_PATCH, HIDDEN)
        te = (jnp.dot(ctx2, text_w, precision=hp) + text_b).reshape(B, TEXT_LEN, HIDDEN)
        return jnp.concatenate([te, pe], axis=1).reshape(B * SEQ, HIDDEN)

    h = embed(control_params["embed_w"])
    ctrl = []
    for l in range(NUM_LAYERS):
        sp = control_params["adapter_small"][l]
        ln_g, ln_b = sp[0, :HIDDEN], sp[1, :HIDDEN]
        b1, b2 = sp[2], sp[3, :HIDDEN]
        mu = jnp.mean(h, axis=-1, keepdims=True)
        var = jnp.mean(jnp.square(h - mu), axis=-1, keepdims=True)
        xn = (h - mu) * jax.lax.rsqrt(var + 1e-5) * ln_g + ln_b
        a = jnp.dot(xn, control_params["w1"][l], precision=hp) + b1
        a = a * jax.nn.sigmoid(a)
        h = jnp.dot(a, control_params["w2"][l], precision=hp) + b2 + h
        ctrl.append(jnp.dot(h, control_params["zero_w"][l],
                            precision=hp).reshape(B, SEQ, HIDDEN))

    t_emb = timestep_embedding(timesteps, HIDDEN)
    z = jnp.dot(t_emb, main_params["te_w"][0], precision=hp) + main_params["te_b"][0]
    z = z * jax.nn.sigmoid(z)
    emb = jnp.dot(z, main_params["te_w"][1], precision=hp) + main_params["te_b"][1]
    return {"hidden": embed(main_params["embed_w"]).reshape(B, SEQ, HIDDEN),
            "emb": emb,
            "control_layers_output": jnp.stack(ctrl)}


# ----------------------------- main -----------------------------
if __name__ == "__main__":
    key = jax.random.PRNGKey(0)
    k_x, k_ctx, k_p = jax.random.split(key, 3)

    x = jax.random.normal(k_x, (B, T, C_IN, H_LAT, W_LAT), dtype=DTYPE)   # (b, t, d, h, w)
    context = jax.random.normal(k_ctx, (B, TEXT_LEN, TEXT_HIDDEN), dtype=DTYPE)
    timesteps = jnp.array([10.0, 500.0], dtype=jnp.float32)

    main_params, control_params = init_params(k_p)

    out = control_diff_warp_forward_jit(main_params, control_params, x, timesteps, context)
    jax.block_until_ready(out)

    # shape sanity
    assert out["hidden"].shape == (B, SEQ, HIDDEN)
    assert out["emb"].shape == (B, TIME_EMBED_DIM)
    assert out["control_layers_output"].shape == (NUM_LAYERS, B, SEQ, HIDDEN)

    # numerical sanity vs. pure-JAX reference (zero_w is non-zero -> real check)
    ref = reference_forward(main_params, control_params, x, timesteps, context)
    assert jnp.allclose(out["hidden"], ref["hidden"], atol=2e-3, rtol=2e-3)
    assert jnp.allclose(out["emb"], ref["emb"], atol=2e-3, rtol=2e-3)
    assert jnp.allclose(out["control_layers_output"], ref["control_layers_output"],
                        atol=2e-3, rtol=2e-3)

    print("KERNEL_OK")
</pallas_src>

<mosaic_0001>
module attributes {stable_mosaic.version = 11 : i64} {
  func.func @_control_diff_warp_kernel(%arg0: i32, %arg1: memref<272x34xf32, #tpu.memory_space<vmem>>, %arg2: memref<2x32xf32, #tpu.memory_space<vmem>>, %arg3: memref<34x32xf32, #tpu.memory_space<vmem>>, %arg4: memref<34x32xf32, #tpu.memory_space<vmem>>, %arg5: memref<2x4x64xf32, #tpu.memory_space<vmem>>, %arg6: memref<2x32x64xf32, #tpu.memory_space<vmem>>, %arg7: memref<2x64x32xf32, #tpu.memory_space<vmem>>, %arg8: memref<2x32x32xf32, #tpu.memory_space<vmem>>, %arg9: memref<2x32x32xf32, #tpu.memory_space<vmem>>, %arg10: memref<2x32xf32, #tpu.memory_space<vmem>>, %arg11: memref<2x272x32xf32, #tpu.memory_space<vmem>>, %arg12: memref<272x32xf32, #tpu.memory_space<vmem>>, %arg13: memref<2x32xf32, #tpu.memory_space<vmem>>) attributes {dimension_semantics = [#tpu.dimension_semantics<arbitrary>], iteration_bounds = array<i64: 1>, scalar_prefetch = 0 : i64, scratch_operands = 0 : i64, tpu.core_type = #tpu.core_type<tc>, window_params = [{pipeline_mode = #tpu.pipeline_mode<synchronous>, transform_indices = @transform_0, window_bounds = array<i64: 272, 34>}, {pipeline_mode = #tpu.pipeline_mode<synchronous>, transform_indices = @transform_1, window_bounds = array<i64: 2, 32>}, {pipeline_mode = #tpu.pipeline_mode<synchronous>, transform_indices = @transform_2, window_bounds = array<i64: 34, 32>}, {pipeline_mode = #tpu.pipeline_mode<synchronous>, transform_indices = @transform_3, window_bounds = array<i64: 34, 32>}, {pipeline_mode = #tpu.pipeline_mode<synchronous>, transform_indices = @transform_4, window_bounds = array<i64: 2, 4, 64>}, {pipeline_mode = #tpu.pipeline_mode<synchronous>, transform_indices = @transform_5, window_bounds = array<i64: 2, 32, 64>}, {pipeline_mode = #tpu.pipeline_mode<synchronous>, transform_indices = @transform_6, window_bounds = array<i64: 2, 64, 32>}, {pipeline_mode = #tpu.pipeline_mode<synchronous>, transform_indices = @transform_7, window_bounds = array<i64: 2, 32, 32>}, {pipeline_mode = #tpu.pipeline_mode<synchronous>, transform_indices = @transform_8, window_bounds = array<i64: 2, 32, 32>}, {pipeline_mode = #tpu.pipeline_mode<synchronous>, transform_indices = @transform_9, window_bounds = array<i64: 2, 32>}, {pipeline_mode = #tpu.pipeline_mode<synchronous>, transform_indices = @transform_10, window_bounds = array<i64: 2, 272, 32>}, {pipeline_mode = #tpu.pipeline_mode<synchronous>, transform_indices = @transform_11, window_bounds = array<i64: 272, 32>}, {pipeline_mode = #tpu.pipeline_mode<synchronous>, transform_indices = @transform_12, window_bounds = array<i64: 2, 32>}]} {
    %c0 = arith.constant 0 : index
    %c0_0 = arith.constant 0 : index
    %0 = vector.load %arg1[%c0, %c0_0] : memref<272x34xf32, #tpu.memory_space<vmem>>, vector<272x34xf32>
    %c0_1 = arith.constant 0 : index
    %c0_2 = arith.constant 0 : index
    %1 = vector.load %arg4[%c0_1, %c0_2] : memref<34x32xf32, #tpu.memory_space<vmem>>, vector<34x32xf32>
    %cst = arith.constant dense<0.000000e+00> : vector<272x32xf32>
    %2 = tpu.matmul %0, %1, %cst {dimension_numbers = #tpu.dot_dimension_numbers<[1], [0], [0], [1], [0, 0, 1, 1], [], []>} : vector<272x34xf32>, vector<34x32xf32>, vector<272x32xf32> -> vector<272x32xf32>
    %c0_3 = arith.constant 0 : index
    %c0_4 = arith.constant 0 : index
    %3 = vector.load %arg12[%c0_3, %c0_4] : memref<272x32xf32, #tpu.memory_space<vmem>>, vector<272x32xf32>
    tpu.vector_store %arg12[%c0_3, %c0_4], %2 {strides = array<i32>} : memref<272x32xf32, #tpu.memory_space<vmem>>, vector<272x32xf32>,
    %c0_5 = arith.constant 0 : index
    %c0_6 = arith.constant 0 : index
    %4 = vector.load %arg2[%c0_5, %c0_6] : memref<2x32xf32, #tpu.memory_space<vmem>>, vector<2x32xf32>
    %c0_7 = arith.constant 0 : index
    %c0_8 = arith.constant 0 : index
    %c0_9 = arith.constant 0 : index
    %5 = vector.load %arg9[%c0_7, %c0_8, %c0_9] : memref<2x32x32xf32, #tpu.memory_space<vmem>>, vector<1x32x32xf32>
    %6 = vector.shape_cast %5 : vector<1x32x32xf32> to vector<32x32xf32>
    %cst_10 = arith.constant dense<0.000000e+00> : vector<2x32xf32>
    %7 = tpu.matmul %4, %6, %cst_10 {dimension_numbers = #tpu.dot_dimension_numbers<[1], [0], [0], [1], [0, 0, 1, 1], [], []>} : vector<2x32xf32>, vector<32x32xf32>, vector<2x32xf32> -> vector<2x32xf32>
    %c0_11 = arith.constant 0 : index
    %c0_12 = arith.constant 0 : index
    %8 = vector.load %arg10[%c0_11, %c0_12] : memref<2x32xf32, #tpu.memory_space<vmem>>, vector<1x32xf32>
    %9 = vector.broadcast %8 : vector<1x32xf32> to vector<2x32xf32>
    %10 = arith.addf %7, %9 : vector<2x32xf32>
    %11 = arith.negf %10 : vector<2x32xf32>
    %12 = math.exp %11 : vector<2x32xf32>
    %cst_13 = arith.constant 1.000000e+00 : f32
    %13 = vector.broadcast %cst_13 : f32 to vector<2x32xf32>
    %14 = arith.addf %13, %12 : vector<2x32xf32>
    %15 = arith.divf %13, %14 : vector<2x32xf32>
    %16 = arith.mulf %10, %15 : vector<2x32xf32>
    %c1 = arith.constant 1 : index
    %c0_14 = arith.constant 0 : index
    %c0_15 = arith.constant 0 : index
    %17 = vector.load %arg9[%c1, %c0_14, %c0_15] : memref<2x32x32xf32, #tpu.memory_space<vmem>>, vector<1x32x32xf32>
    %18 = vector.shape_cast %17 : vector<1x32x32xf32> to vector<32x32xf32>
    %cst_16 = arith.constant dense<0.000000e+00> : vector<2x32xf32>
    %19 = tpu.matmul %16, %18, %cst_16 {dimension_numbers = #tpu.dot_dimension_numbers<[1], [0], [0], [1], [0, 0, 1, 1], [], []>} : vector<2x32xf32>, vector<32x32xf32>, vector<2x32xf32> -> vector<2x32xf32>
    %c1_17 = arith.constant 1 : index
    %c0_18 = arith.constant 0 : index
    %20 = vector.load %arg10[%c1_17, %c0_18] : memref<2x32xf32, #tpu.memory_space<vmem>>, vector<1x32xf32>
    %21 = vector.broadcast %20 : vector<1x32xf32> to vector<2x32xf32>
    %22 = arith.addf %19, %21 : vector<2x32xf32>
    %c0_19 = arith.constant 0 : index
    %c0_20 = arith.constant 0 : index
    %23 = vector.load %arg13[%c0_19, %c0_20] : memref<2x32xf32, #tpu.memory_space<vmem>>, vector<2x32xf32>
    tpu.vector_store %arg13[%c0_19, %c0_20], %22 {strides = array<i32>} : memref<2x32xf32, #tpu.memory_space<vmem>>, vector<2x32xf32>,
    %c0_21 = arith.constant 0 : index
    %c0_22 = arith.constant 0 : index
    %24 = vector.load %arg3[%c0_21, %c0_22] : memref<34x32xf32, #tpu.memory_space<vmem>>, vector<34x32xf32>
    %cst_23 = arith.constant dense<0.000000e+00> : vector<272x32xf32>
    %25 = tpu.matmul %0, %24, %cst_23 {dimension_numbers = #tpu.dot_dimension_numbers<[1], [0], [0], [1], [0, 0, 1, 1], [], []>} : vector<272x34xf32>, vector<34x32xf32>, vector<272x32xf32> -> vector<272x32xf32>
    %c0_24 = arith.constant 0 : index
    %c0_25 = arith.constant 0 : index
    %c0_26 = arith.constant 0 : index
    %26 = vector.load %arg5[%c0_24, %c0_25, %c0_26] : memref<2x4x64xf32, #tpu.memory_space<vmem>>, vector<1x4x64xf32>
    %27 = vector.shape_cast %26 : vector<1x4x64xf32> to vector<4x64xf32>
    %28 = vector.extract_strided_slice %27 {offsets = [0, 0], sizes = [1, 32], strides = [1, 1]} : vector<4x64xf32> to vector<1x32xf32>
    %29 = vector.extract_strided_slice %27 {offsets = [1, 0], sizes = [1, 32], strides = [1, 1]} : vector<4x64xf32> to vector<1x32xf32>
    %30 = vector.extract_strided_slice %27 {offsets = [2, 0], sizes = [1, 64], strides = [1, 1]} : vector<4x64xf32> to vector<1x64xf32>
    %31 = vector.extract_strided_slice %27 {offsets = [3, 0], sizes = [1, 32], strides = [1, 1]} : vector<4x64xf32> to vector<1x32xf32>
    %cst_27 = arith.constant dense<0.000000e+00> : vector<272xf32>
    %32 = vector.multi_reduction <add>, %25, %cst_27 [1] : vector<272x32xf32> to vector<272xf32>
    %33 = vector.shape_cast %32 : vector<272xf32> to vector<272x1xf32>
    %cst_28 = arith.constant 3.125000e-02 : f32
    %34 = vector.broadcast %cst_28 : f32 to vector<272x1xf32>
    %35 = arith.mulf %33, %34 : vector<272x1xf32>
    %36 = arith.mulf %25, %25 : vector<272x32xf32>
    %cst_29 = arith.constant dense<0.000000e+00> : vector<272xf32>
    %37 = vector.multi_reduction <add>, %36, %cst_29 [1] : vector<272x32xf32> to vector<272xf32>
    %38 = vector.shape_cast %37 : vector<272xf32> to vector<272x1xf32>
    %cst_30 = arith.constant 3.125000e-02 : f32
    %39 = vector.broadcast %cst_30 : f32 to vector<272x1xf32>
    %40 = arith.mulf %38, %39 : vector<272x1xf32>
    %41 = arith.mulf %35, %35 : vector<272x1xf32>
    %42 = arith.subf %40, %41 : vector<272x1xf32>
    %43 = vector.broadcast %35 : vector<272x1xf32> to vector<272x32xf32>
    %44 = arith.subf %25, %43 : vector<272x32xf32>
    %cst_31 = arith.constant 9.99999974E-6 : f32
    %45 = vector.broadcast %cst_31 : f32 to vector<272x1xf32>
    %46 = arith.addf %42, %45 : vector<272x1xf32>
    %47 = math.rsqrt %46 : vector<272x1xf32>
    %48 = vector.broadcast %47 : vector<272x1xf32> to vector<272x32xf32>
    %49 = arith.mulf %44, %48 : vector<272x32xf32>
    %50 = vector.broadcast %28 : vector<1x32xf32> to vector<272x32xf32>
    %51 = arith.mulf %49, %50 : vector<272x32xf32>
    %52 = vector.broadcast %29 : vector<1x32xf32> to vector<272x32xf32>
    %53 = arith.addf %51, %52 : vector<272x32xf32>
    %c0_32 = arith.constant 0 : index
    %c0_33 = arith.constant 0 : index
    %c0_34 = arith.constant 0 : index
    %54 = vector.load %arg6[%c0_32, %c0_33, %c0_34] : memref<2x32x64xf32, #tpu.memory_space<vmem>>, vector<1x32x64xf32>
    %55 = vector.shape_cast %54 : vector<1x32x64xf32> to vector<32x64xf32>
    %cst_35 = arith.constant dense<0.000000e+00> : vector<272x64xf32>
    %56 = tpu.matmul %53, %55, %cst_35 {dimension_numbers = #tpu.dot_dimension_numbers<[1], [0], [0], [1], [0, 0, 1, 1], [], []>} : vector<272x32xf32>, vector<32x64xf32>, vector<272x64xf32> -> vector<272x64xf32>
    %57 = vector.broadcast %30 : vector<1x64xf32> to vector<272x64xf32>
    %58 = arith.addf %56, %57 : vector<272x64xf32>
    %59 = arith.negf %58 : vector<272x64xf32>
    %60 = math.exp %59 : vector<272x64xf32>
    %cst_36 = arith.constant 1.000000e+00 : f32
    %61 = vector.broadcast %cst_36 : f32 to vector<272x64xf32>
    %62 = arith.addf %61, %60 : vector<272x64xf32>
    %63 = arith.divf %61, %62 : vector<272x64xf32>
    %64 = arith.mulf %58, %63 : vector<272x64xf32>
    %c0_37 = arith.constant 0 : index
    %c0_38 = arith.constant 0 : index
    %c0_39 = arith.constant 0 : index
    %65 = vector.load %arg7[%c0_37, %c0_38, %c0_39] : memref<2x64x32xf32, #tpu.memory_space<vmem>>, vector<1x64x32xf32>
    %66 = vector.shape_cast %65 : vector<1x64x32xf32> to vector<64x32xf32>
    %cst_40 = arith.constant dense<0.000000e+00> : vector<272x32xf32>
    %67 = tpu.matmul %64, %66, %cst_40 {dimension_numbers = #tpu.dot_dimension_numbers<[1], [0], [0], [1], [0, 0, 1, 1], [], []>} : vector<272x64xf32>, vector<64x32xf32>, vector<272x32xf32> -> vector<272x32xf32>
    %68 = vector.broadcast %31 : vector<1x32xf32> to vector<272x32xf32>
    %69 = arith.addf %67, %68 : vector<272x32xf32>
    %70 = arith.addf %69, %25 : vector<272x32xf32>
    %c0_41 = arith.constant 0 : index
    %c0_42 = arith.constant 0 : index
    %c0_43 = arith.constant 0 : index
    %71 = vector.load %arg8[%c0_41, %c0_42, %c0_43] : memref<2x32x32xf32, #tpu.memory_space<vmem>>, vector<1x32x32xf32>
    %72 = vector.shape_cast %71 : vector<1x32x32xf32> to vector<32x32xf32>
    %cst_44 = arith.constant dense<0.000000e+00> : vector<272x32xf32>
    %73 = tpu.matmul %70, %72, %cst_44 {dimension_numbers = #tpu.dot_dimension_numbers<[1], [0], [0], [1], [0, 0, 1, 1], [], []>} : vector<272x32xf32>, vector<32x32xf32>, vector<272x32xf32> -> vector<272x32xf32>
    %c0_45 = arith.constant 0 : index
    %c0_46 = arith.constant 0 : index
    %c0_47 = arith.constant 0 : index
    %74 = vector.load %arg11[%c0_45, %c0_46, %c0_47] : memref<2x272x32xf32, #tpu.memory_space<vmem>>, vector<1x272x32xf32>
    %75 = vector.shape_cast %74 : vector<1x272x32xf32> to vector<272x32xf32>
    %76 = vector.shape_cast %73 : vector<272x32xf32> to vector<1x272x32xf32>
    tpu.vector_store %arg11[%c0_45, %c0_46, %c0_47], %76 {strides = array<i32>} : memref<2x272x32xf32, #tpu.memory_space<vmem>>, vector<1x272x32xf32>,
    %c1_48 = arith.constant 1 : index
    %c0_49 = arith.constant 0 : index
    %c0_50 = arith.constant 0 : index
    %77 = vector.load %arg5[%c1_48, %c0_49, %c0_50] : memref<2x4x64xf32, #tpu.memory_space<vmem>>, vector<1x4x64xf32>
    %78 = vector.shape_cast %77 : vector<1x4x64xf32> to vector<4x64xf32>
    %79 = vector.extract_strided_slice %78 {offsets = [0, 0], sizes = [1, 32], strides = [1, 1]} : vector<4x64xf32> to vector<1x32xf32>
    %80 = vector.extract_strided_slice %78 {offsets = [1, 0], sizes = [1, 32], strides = [1, 1]} : vector<4x64xf32> to vector<1x32xf32>
    %81 = vector.extract_strided_slice %78 {offsets = [2, 0], sizes = [1, 64], strides = [1, 1]} : vector<4x64xf32> to vector<1x64xf32>
    %82 = vector.extract_strided_slice %78 {offsets = [3, 0], sizes = [1, 32], strides = [1, 1]} : vector<4x64xf32> to vector<1x32xf32>
    %cst_51 = arith.constant dense<0.000000e+00> : vector<272xf32>
    %83 = vector.multi_reduction <add>, %70, %cst_51 [1] : vector<272x32xf32> to vector<272xf32>
    %84 = vector.shape_cast %83 : vector<272xf32> to vector<272x1xf32>
    %cst_52 = arith.constant 3.125000e-02 : f32
    %85 = vector.broadcast %cst_52 : f32 to vector<272x1xf32>
    %86 = arith.mulf %84, %85 : vector<272x1xf32>
    %87 = arith.mulf %70, %70 : vector<272x32xf32>
    %cst_53 = arith.constant dense<0.000000e+00> : vector<272xf32>
    %88 = vector.multi_reduction <add>, %87, %cst_53 [1] : vector<272x32xf32> to vector<272xf32>
    %89 = vector.shape_cast %88 : vector<272xf32> to vector<272x1xf32>
    %cst_54 = arith.constant 3.125000e-02 : f32
    %90 = vector.broadcast %cst_54 : f32 to vector<272x1xf32>
    %91 = arith.mulf %89, %90 : vector<272x1xf32>
    %92 = arith.mulf %86, %86 : vector<272x1xf32>
    %93 = arith.subf %91, %92 : vector<272x1xf32>
    %94 = vector.broadcast %86 : vector<272x1xf32> to vector<272x32xf32>
    %95 = arith.subf %70, %94 : vector<272x32xf32>
    %cst_55 = arith.constant 9.99999974E-6 : f32
    %96 = vector.broadcast %cst_55 : f32 to vector<272x1xf32>
    %97 = arith.addf %93, %96 : vector<272x1xf32>
    %98 = math.rsqrt %97 : vector<272x1xf32>
    %99 = vector.broadcast %98 : vector<272x1xf32> to vector<272x32xf32>
    %100 = arith.mulf %95, %99 : vector<272x32xf32>
    %101 = vector.broadcast %79 : vector<1x32xf32> to vector<272x32xf32>
    %102 = arith.mulf %100, %101 : vector<272x32xf32>
    %103 = vector.broadcast %80 : vector<1x32xf32> to vector<272x32xf32>
    %104 = arith.addf %102, %103 : vector<272x32xf32>
    %c1_56 = arith.constant 1 : index
    %c0_57 = arith.constant 0 : index
    %c0_58 = arith.constant 0 : index
    %105 = vector.load %arg6[%c1_56, %c0_57, %c0_58] : memref<2x32x64xf32, #tpu.memory_space<vmem>>, vector<1x32x64xf32>
    %106 = vector.shape_cast %105 : vector<1x32x64xf32> to vector<32x64xf32>
    %cst_59 = arith.constant dense<0.000000e+00> : vector<272x64xf32>
    %107 = tpu.matmul %104, %106, %cst_59 {dimension_numbers = #tpu.dot_dimension_numbers<[1], [0], [0], [1], [0, 0, 1, 1], [], []>} : vector<272x32xf32>, vector<32x64xf32>, vector<272x64xf32> -> vector<272x64xf32>
    %108 = vector.broadcast %81 : vector<1x64xf32> to vector<272x64xf32>
    %109 = arith.addf %107, %108 : vector<272x64xf32>
    %110 = arith.negf %109 : vector<272x64xf32>
    %111 = math.exp %110 : vector<272x64xf32>
    %cst_60 = arith.constant 1.000000e+00 : f32
    %112 = vector.broadcast %cst_60 : f32 to vector<272x64xf32>
    %113 = arith.addf %112, %111 : vector<272x64xf32>
    %114 = arith.divf %112, %113 : vector<272x64xf32>
    %115 = arith.mulf %109, %114 : vector<272x64xf32>
    %c1_61 = arith.constant 1 : index
    %c0_62 = arith.constant 0 : index
    %c0_63 = arith.constant 0 : index
    %116 = vector.load %arg7[%c1_61, %c0_62, %c0_63] : memref<2x64x32xf32, #tpu.memory_space<vmem>>, vector<1x64x32xf32>
    %117 = vector.shape_cast %116 : vector<1x64x32xf32> to vector<64x32xf32>
    %cst_64 = arith.constant dense<0.000000e+00> : vector<272x32xf32>
    %118 = tpu.matmul %115, %117, %cst_64 {dimension_numbers = #tpu.dot_dimension_numbers<[1], [0], [0], [1], [0, 0, 1, 1], [], []>} : vector<272x64xf32>, vector<64x32xf32>, vector<272x32xf32> -> vector<272x32xf32>
    %119 = vector.broadcast %82 : vector<1x32xf32> to vector<272x32xf32>
    %120 = arith.addf %118, %119 : vector<272x32xf32>
    %121 = arith.addf %120, %70 : vector<272x32xf32>
    %c1_65 = arith.constant 1 : index
    %c0_66 = arith.constant 0 : index
    %c0_67 = arith.constant 0 : index
    %122 = vector.load %arg8[%c1_65, %c0_66, %c0_67] : memref<2x32x32xf32, #tpu.memory_space<vmem>>, vector<1x32x32xf32>
    %123 = vector.shape_cast %122 : vector<1x32x32xf32> to vector<32x32xf32>
    %cst_68 = arith.constant dense<0.000000e+00> : vector<272x32xf32>
    %124 = tpu.matmul %121, %123, %cst_68 {dimension_numbers = #tpu.dot_dimension_numbers<[1], [0], [0], [1], [0, 0, 1, 1], [], []>} : vector<272x32xf32>, vector<32x32xf32>, vector<272x32xf32> -> vector<272x32xf32>
    %c1_69 = arith.constant 1 : index
    %c0_70 = arith.constant 0 : index
    %c0_71 = arith.constant 0 : index
    %125 = vector.load %arg11[%c1_69, %c0_70, %c0_71] : memref<2x272x32xf32, #tpu.memory_space<vmem>>, vector<1x272x32xf32>
    %126 = vector.shape_cast %125 : vector<1x272x32xf32> to vector<272x32xf32>
    %127 = vector.shape_cast %124 : vector<272x32xf32> to vector<1x272x32xf32>
    tpu.vector_store %arg11[%c1_69, %c0_70, %c0_71], %127 {strides = array<i32>} : memref<2x272x32xf32, #tpu.memory_space<vmem>>, vector<1x272x32xf32>,
    return
  }
  func.func @transform_0(%arg0: i32) -> (i32, i32) {
    %c0_i32 = arith.constant 0 : i32
    %c0_i32_0 = arith.constant 0 : i32
    %c0_i32_1 = arith.constant 0 : i32
    return %c0_i32, %c0_i32_0 : i32, i32
  }
  func.func @transform_1(%arg0: i32) -> (i32, i32) {
    %c0_i32 = arith.constant 0 : i32
    %c0_i32_0 = arith.constant 0 : i32
    %c0_i32_1 = arith.constant 0 : i32
    return %c0_i32, %c0_i32_0 : i32, i32
  }
  func.func @transform_2(%arg0: i32) -> (i32, i32) {
    %c0_i32 = arith.constant 0 : i32
    %c0_i32_0 = arith.constant 0 : i32
    %c0_i32_1 = arith.constant 0 : i32
    return %c0_i32, %c0_i32_0 : i32, i32
  }
  func.func @transform_3(%arg0: i32) -> (i32, i32) {
    %c0_i32 = arith.constant 0 : i32
    %c0_i32_0 = arith.constant 0 : i32
    %c0_i32_1 = arith.constant 0 : i32
    return %c0_i32, %c0_i32_0 : i32, i32
  }
  func.func @transform_4(%arg0: i32) -> (i32, i32, i32) {
    %c0_i32 = arith.constant 0 : i32
    %c0_i32_0 = arith.constant 0 : i32
    %c0_i32_1 = arith.constant 0 : i32
    %c0_i32_2 = arith.constant 0 : i32
    return %c0_i32, %c0_i32_0, %c0_i32_1 : i32, i32, i32
  }
  func.func @transform_5(%arg0: i32) -> (i32, i32, i32) {
    %c0_i32 = arith.constant 0 : i32
    %c0_i32_0 = arith.constant 0 : i32
    %c0_i32_1 = arith.constant 0 : i32
    %c0_i32_2 = arith.constant 0 : i32
    return %c0_i32, %c0_i32_0, %c0_i32_1 : i32, i32, i32
  }
  func.func @transform_6(%arg0: i32) -> (i32, i32, i32) {
    %c0_i32 = arith.constant 0 : i32
    %c0_i32_0 = arith.constant 0 : i32
    %c0_i32_1 = arith.constant 0 : i32
    %c0_i32_2 = arith.constant 0 : i32
    return %c0_i32, %c0_i32_0, %c0_i32_1 : i32, i32, i32
  }
  func.func @transform_7(%arg0: i32) -> (i32, i32, i32) {
    %c0_i32 = arith.constant 0 : i32
    %c0_i32_0 = arith.constant 0 : i32
    %c0_i32_1 = arith.constant 0 : i32
    %c0_i32_2 = arith.constant 0 : i32
    return %c0_i32, %c0_i32_0, %c0_i32_1 : i32, i32, i32
  }
  func.func @transform_8(%arg0: i32) -> (i32, i32, i32) {
    %c0_i32 = arith.constant 0 : i32
    %c0_i32_0 = arith.constant 0 : i32
    %c0_i32_1 = arith.constant 0 : i32
    %c0_i32_2 = arith.constant 0 : i32
    return %c0_i32, %c0_i32_0, %c0_i32_1 : i32, i32, i32
  }
  func.func @transform_9(%arg0: i32) -> (i32, i32) {
    %c0_i32 = arith.constant 0 : i32
    %c0_i32_0 = arith.constant 0 : i32
    %c0_i32_1 = arith.constant 0 : i32
    return %c0_i32, %c0_i32_0 : i32, i32
  }
  func.func @transform_10(%arg0: i32) -> (i32, i32, i32) {
    %c0_i32 = arith.constant 0 : i32
    %c0_i32_0 = arith.constant 0 : i32
    %c0_i32_1 = arith.constant 0 : i32
    %c0_i32_2 = arith.constant 0 : i32
    return %c0_i32, %c0_i32_0, %c0_i32_1 : i32, i32, i32
  }
  func.func @transform_11(%arg0: i32) -> (i32, i32) {
    %c0_i32 = arith.constant 0 : i32
    %c0_i32_0 = arith.constant 0 : i32
    %c0_i32_1 = arith.constant 0 : i32
    return %c0_i32, %c0_i32_0 : i32, i32
  }
  func.func @transform_12(%arg0: i32) -> (i32, i32) {
    %c0_i32 = arith.constant 0 : i32
    %c0_i32_0 = arith.constant 0 : i32
    %c0_i32_1 = arith.constant 0 : i32
    return %c0_i32, %c0_i32_0 : i32, i32
  }
}

</mosaic_0001>

<bundles_post_ra>
// kernel: control_diff_warp_forward.1
= control target key start
LH: loop header
LB: loop body
LE: loop exit
PB: predicated region body
PF: predicated region fallthrough
CT: control target
= control target key end

     0   :  { %vm78_vm0 = vcmask 277504   ;;  %v6531_v6 = vmov 0.0|0.0   ;;  %vm6532_vm1 = vmmov 0   ;;  %v6533_v8 = vmov 0.0   ;;  %s9210_s0 = inlined_call_operand.vmem [shape: f32[272,34], index: 0, kind: input, shape index: {}]   ;;  %s9211_s1 = inlined_call_operand.vmem [shape: f32[2,32], index: 1, kind: input, shape index: {}]   ;;  %s9212_s2 = inlined_call_operand.vmem [shape: f32[34,32], index: 2, kind: input, shape index: {}]   ;;  %s9213_s3 = inlined_call_operand.vmem [shape: f32[34,32], index: 3, kind: input, shape index: {}]   ;;  %s9214_s4 = inlined_call_operand.vmem [shape: f32[2,4,64], index: 4, kind: input, shape index: {}]   ;;  %s9215_s5 = inlined_call_operand.vmem [shape: f32[2,32,64], index: 5, kind: input, shape index: {}]   ;;  %s9216_s6 = inlined_call_operand.vmem [shape: f32[2,64,32], index: 6, kind: input, shape index: {}]   ;;  %s9217_s7 = inlined_call_operand.vmem [shape: f32[2,32,32], index: 7, kind: input, shape index: {}]   ;;  %s9218_s8 = inlined_call_operand.vmem [shape: f32[2,32,32], index: 8, kind: input, shape index: {}]   ;;  %s9219_s9 = inlined_call_operand.vmem [shape: f32[2,32], index: 9, kind: input, shape index: {}]   ;;  %s9220_s10 = inlined_call_operand.vmem [shape: f32[2,272,32], index: 10, kind: output, shape index: {0}]   ;;  %s9221_s11 = inlined_call_operand.vmem [shape: f32[272,32], index: 11, kind: output, shape index: {1}]   ;;  %s9222_s12 = inlined_call_operand.hbm [shape: f32[2,32], index: 12, kind: output, shape index: {2}]  }
   0x1   :  { %v73_v0 = vld [vmem:[%s9213_s3] sm:$0xff]  ;;  %v74_v1 = vld [vmem:[%s9213_s3 + $0x8] sm:$0xff]  ;;  %v75_v2 = vld [vmem:[%s9213_s3 + $0x10] sm:$0xff]  ;;  %6011 = vmatprep.subr.bf16.mxu1 %v6531_v6  ;;  %5563 = vmatprep.mubr.msk.f32.mxu1 %vm6532_vm1, %v6533_v8  ;;  %vm181_vm2 = vcmask 1041408  }
   0x2   :  { %v5997_v3 = vpack.c.bf16 %v74_v1, %v73_v0  ;;  %v76_v4 = vld [vmem:[%s9213_s3 + $0x18] sm:$0xff]  ;;  %v6615_v5 = vld [vmem:[%s9210_s0] sm:$0xff]  ;;  %v457_v11 = vld [vmem:[%s9218_s8 + $0x8] sm:$0xff] }
   0x3   :  { %v6001_v7 = vpack.c.bf16 %v76_v4, %v75_v2  ;;  %5493 = vmatprep.mubr.msk.f32.mxu0 %vm78_vm0, %v6615_v5  ;;  %v77_v9 = vld [vmem:[%s9213_s3 + $0x20] sm:$0x3]  ;;  %v6635_v12 = vld [vmem:[%s9210_s0 + $0x8] sm:$0xff]  ;;  %v6640_v14 = vld [vmem:[%s9210_s0 + $0x10] sm:$0xff] }
   0x4   :  { %5998 = vmatprep.subr.bf16.mxu0 %v5997_v3  ;;  %v456_v10 = vld [vmem:[%s9218_s8] sm:$0xff]  ;;  %v458_v15 = vld [vmem:[%s9218_s8 + $0x10] sm:$0xff]  ;;  %v459_v16 = vld [vmem:[%s9218_s8 + $0x18] sm:$0xff] }
   0x5   :  { %6000 = vmatpush3.bf16.msra.mxu0 %v5997_v3  ;;  %v6006_v13 = vpack.c.bf16 %v457_v11, %v456_v10  ;;  %v6657_v17 = vld [vmem:[%s9210_s0 + $0x18] sm:$0xff]  ;;  %v6009_v18 = vpack.c.bf16 %v459_v16, %v458_v15 }
   0x6   :  { %6002 = vmatprep.subr.bf16.mxu0 %v6001_v7 }
   0x9   :  { %6004 = vmatpush3.bf16.msra.mxu0 %v6001_v7 }
   0xa   :  { %5491 = vmatprep.subr.msk.mxu0 %vm181_vm2, %v77_v9 }
   0xd   :  { %5492 = vmatpush3.msk.msra.mxu0 %vm181_vm2, %v77_v9 }
   0xe   :  { %5494 = vmatmul.mubr.msk.f32.vlgmr.msra.gmra.mrb[0].mxu0 %vm78_vm0, %v6635_v12  ;;  %6005 = vmatprep.subr.bf16.mxu0 %v6531_v6 }
   0xf   :  { %6007 = vmatpush3.bf16.msra.mxu0 %v6006_v13  ;;  %5496 = vmatprep.mubr.msk.f32.mxu0 %vm78_vm0, %v6640_v14 }
  0x10   :  { %18 = vsyncpa [#allocation3], 0  ;;  %v6662_v19 = vld [vmem:[%s9210_s0 + $0x20] sm:$0xff]  ;;  %6008 = vmatprep.subr.bf16.mxu0 %v6531_v6  ;;  %v6672_v20 = vld [vmem:[%s9210_s0 + $0x28] sm:$0xff]  ;;  %vm420_vm3 = vcmask 261120   ;;  %vm628_vm4 = vcmask 254976  }
  0x11   :  { %v6677_v21 = vld [vmem:[%s9210_s0 + $0x30] sm:$0xff]  ;;  %v6686_v22 = vld [vmem:[%s9210_s0 + $0x38] sm:$0xff]  ;;  %v6691_v23 = vld [vmem:[%s9210_s0 + $0x40] sm:$0xff]  ;;  %vm2055_vm5 = vcmask 523264   ;;  %s6534_s21 = smov [#allocation2]  }
  0x12   :  { %5497 = vmatmul.mubr.msk.f32.gmra.mrb[2].mxu0 %vm78_vm0, %v6657_v17  ;;  %v6700_v24 = vld [vmem:[%s9210_s0 + $0x48] sm:$0xff]  ;;  %v6705_v25 = vld [vmem:[%s9210_s0 + $0x50] sm:$0xff]  ;;  %v6714_v26 = vld [vmem:[%s9210_s0 + $0x58] sm:$0xff]  ;;  %s4745_s3 = sshll.u32 %s6534_s21, 4  ;;  %s4746_s3 = int_to_ptr.vmem [resolvable:$true] %s4745_s3 }
  0x13   :  { %5499 = vmatprep.mubr.msk.f32.mxu0 %vm78_vm0, %v6662_v19  ;;  %6010 = vmatpush3.bf16.msra.mxu0 %v6009_v18  ;;  %v6719_v27 = vld [vmem:[%s9210_s0 + $0x60] sm:$0xff]  ;;  %v6728_v28 = vld [vmem:[%s9210_s0 + $0x68] sm:$0xff]  ;;  %v6733_v29 = vld [vmem:[%s9210_s0 + $0x70] sm:$0xff]  ;;  %s6507_s24 = scalar_lea.vmem %s4746_s3, 32  ;;  %p6512_p1 = scmp.lt.s32.totalorder %s4746_s3, %s4746_s3 }
  0x14   :  { %v6742_v30 = vld [vmem:[%s9210_s0 + $0x78] sm:$0xff]  ;;  %v6747_v31 = vld [vmem:[%s9210_s0 + $0x80] sm:$0xff]  ;;  %v6756_v32 = vld [vmem:[%s9210_s0 + $0x88] sm:$0xff]  ;;  %p6508_p0 = scmp.ne.s32.totalorder %s4746_s3, %s6507_s24  ;;  %p6513_p2 = scmp.lt.s32.totalorder %s6507_s24, %s6507_s24 }
  0x15   :  { %v6761_v33 = vld [vmem:[%s9210_s0 + $0x90] sm:$0xff]  ;;  %v6770_v34 = vld [vmem:[%s9210_s0 + $0x98] sm:$0xff]  ;;  %v6775_v35 = vld [vmem:[%s9210_s0 + $0xa0] sm:$0xff] }
  0x16   :  { %5500 = vmatmul.mubr.msk.f32.gmra.mrb[4].mxu0 %vm78_vm0, %v6672_v20  ;;  %v6784_v36 = vld [vmem:[%s9210_s0 + $0xa8] sm:$0xff]  ;;  %v6789_v37 = vld [vmem:[%s9210_s0 + $0xb0] sm:$0xff]  ;;  %v6798_v38 = vld [vmem:[%s9210_s0 + $0xb8] sm:$0xff]  ;;  %p6514_p3 = por %p6513_p2, %p6512_p1 }
  0x17   :  { %5502 = vmatprep.mubr.msk.f32.mxu0 %vm78_vm0, %v6677_v21  ;;  %v6803_v39 = vld [vmem:[%s9210_s0 + $0xc0] sm:$0xff]  ;;  %v6812_v40 = vld [vmem:[%s9210_s0 + $0xc8] sm:$0xff]  ;;  %v6817_v41 = vld [vmem:[%s9210_s0 + $0xd0] sm:$0xff] }
  0x18   :  { %v6826_v42 = vld [vmem:[%s9210_s0 + $0xd8] sm:$0xff]  ;;  %v6831_v43 = vld [vmem:[%s9210_s0 + $0xe0] sm:$0xff]  ;;  %v6840_v44 = vld [vmem:[%s9210_s0 + $0xe8] sm:$0xff]  ;;  %p6515_p4 = pnand %p6514_p3, %p6508_p0 }
  0x19   :  { %v6845_v45 = vld [vmem:[%s9210_s0 + $0xf0] sm:$0xff]  ;;  %v6854_v46 = vld [vmem:[%s9210_s0 + $0xf8] sm:$0xff]  ;;  %v6859_v47 = vld [vmem:[%s9210_s0 + $0x100] sm:$0xff] }
  0x1a   :  { %5503 = vmatmul.mubr.msk.f32.gmra.mrb[6].mxu0 %vm78_vm0, %v6686_v22  ;;  %v6868_v48 = vld [vmem:[%s9210_s0 + $0x108] sm:$0xff]  ;;  %v455_v49 = vld [vmem:[%s9211_s1] sm:$0x3]  ;;  %v4797_v53 = vld [vmem:[%s9218_s8 + $0x30] sm:$0xff] }
  0x1b   :  { %5505 = vmatprep.mubr.msk.f32.mxu0 %vm78_vm0, %v6691_v23  ;;  %v4795_v50 = vld [vmem:[%s9218_s8 + $0x20] sm:$0xff]  ;;  %v4796_v51 = vld [vmem:[%s9218_s8 + $0x28] sm:$0xff]  ;;  %v4798_v54 = vld [vmem:[%s9218_s8 + $0x38] sm:$0xff] }
  0x1c   :  { %v6012_v52 = vpack.c.bf16 %v4796_v51, %v4795_v50  ;;  %v6015_v55 = vpack.c.bf16 %v4798_v54, %v4797_v53  ;;  %v630_v56 = vld [vmem:[%s9212_s2] sm:$0xff]  ;;  %v631_v57 = vld [vmem:[%s9212_s2 + $0x8] sm:$0xff] }
  0x1d   :  { %v6897_v58 = vpack.c.bf16 %v631_v57, %v630_v56 }
  0x1e   :  { %5506 = vmatmul.mubr.msk.f32.gmra.mrb[8].mxu0 %vm78_vm0, %v6700_v24  ;;  %6013 = vmatpush3.bf16.msra.mxu1 %v6012_v52 }
  0x1f   :  { %5508 = vmatprep.mubr.msk.f32.mxu0 %vm78_vm0, %v6705_v25  ;;  %6014 = vmatprep.subr.bf16.mxu1 %v6531_v6 }
  0x22   :  { %5509 = vmatmul.mubr.msk.f32.gmra.mrb[10].mxu0 %vm78_vm0, %v6714_v26  ;;  %6016 = vmatpush3.bf16.msra.mxu1 %v6015_v55 }
  0x23   :  { %5511 = vmatprep.mubr.msk.f32.mxu0 %vm78_vm0, %v6719_v27  ;;  %6018 = vmatprep.subr.bf16.mxu1 %v6897_v58 }
  0x26   :  { %5512 = vmatmul.mubr.msk.f32.gmra.mrb[12].mxu0 %vm78_vm0, %v6728_v28 }
  0x27   :  { %5514 = vmatprep.mubr.msk.f32.mxu0 %vm78_vm0, %v6733_v29 }
  0x2a   :  { %5515 = vmatmul.mubr.msk.f32.gmra.mrb[14].mxu0 %vm78_vm0, %v6742_v30 }
  0x2b   :  { %5517 = vmatprep.mubr.msk.f32.mxu0 %vm78_vm0, %v6747_v31 }
  0x2e   :  { %5518 = vmatmul.mubr.msk.f32.gmra.mrb[16].mxu0 %vm78_vm0, %v6756_v32 }
  0x2f   :  { %5520 = vmatprep.mubr.msk.f32.mxu0 %vm78_vm0, %v6761_v33 }
  0x32   :  { %5521 = vmatmul.mubr.msk.f32.gmra.mrb[18].mxu0 %vm78_vm0, %v6770_v34 }
  0x33   :  { %5523 = vmatprep.mubr.msk.f32.mxu0 %vm78_vm0, %v6775_v35 }
  0x36   :  { %5524 = vmatmul.mubr.msk.f32.gmra.mrb[20].mxu0 %vm78_vm0, %v6784_v36 }
  0x37   :  { %5526 = vmatprep.mubr.msk.f32.mxu0 %vm78_vm0, %v6789_v37 }
  0x3a   :  { %5527 = vmatmul.mubr.msk.f32.gmra.mrb[22].mxu0 %vm78_vm0, %v6798_v38 }
  0x3b   :  { %5529 = vmatprep.mubr.msk.f32.mxu0 %vm78_vm0, %v6803_v39 }
  0x3e   :  { %5530 = vmatmul.mubr.msk.f32.gmra.mrb[24].mxu0 %vm78_vm0, %v6812_v40 }
  0x3f   :  { %5532 = vmatprep.mubr.msk.f32.mxu0 %vm78_vm0, %v6817_v41 }
  0x42   :  { %5533 = vmatmul.mubr.msk.f32.gmra.mrb[26].mxu0 %vm78_vm0, %v6826_v42 }
  0x43   :  { %5535 = vmatprep.mubr.msk.f32.mxu0 %vm78_vm0, %v6831_v43 }
  0x46   :  { %5536 = vmatmul.mubr.msk.f32.gmra.mrb[28].mxu0 %vm78_vm0, %v6840_v44 }
  0x47   :  { %5538 = vmatprep.mubr.msk.f32.mxu0 %vm78_vm0, %v6845_v45 }
  0x4a   :  { %5539 = vmatmul.mubr.msk.f32.gmra.mrb[30].mxu0 %vm78_vm0, %v6854_v46 }
  0x4b   :  { %5541 = vmatprep.mubr.msk.f32.mxu0 %vm78_vm0, %v6859_v47 }
  0x4e   :  { %5542 = vmatmul.mubr.msk.f32.gmra.mrb[32].mxu0 %vm78_vm0, %v6868_v48 }
  0x4f   :  { %5552 = vmatprep.mubr.msk.f32.mxu0 %vm6532_vm1, %v6533_v8 }
  0x52   :  { %5553 = vmatmul.mubr.msk.f32.vlgmr.msra.gmra.mrb[34].mxu0 %vm420_vm3, %v455_v49 }
  0xe1   :  { %v5495_v59 = vpop.f32.mrb[0].mxu0 }
  0xe2   :  { %422 = vst.msk [vmem:[%s9221_s11 + $0x8] sm:$0xff] %vm420_vm3, %v5495_v59  ;;  %v251_v60 = vpop.f32.mrb[1].mxu0 }
  0xe3   :  { %421 = vst.msk [vmem:[%s9221_s11] sm:$0xff] %vm420_vm3, %v251_v60 }
  0xe5   :  { %v5498_v61 = vpop.f32.mrb[2].mxu0 }
  0xe6   :  { %424 = vst.msk [vmem:[%s9221_s11 + $0x18] sm:$0xff] %vm420_vm3, %v5498_v61  ;;  %v261_v62 = vpop.f32.mrb[3].mxu0 }
  0xe7   :  { %423 = vst.msk [vmem:[%s9221_s11 + $0x10] sm:$0xff] %vm420_vm3, %v261_v62 }
  0xe9   :  { %v5501_v63 = vpop.f32.mrb[4].mxu0 }
  0xea   :  { %426 = vst.msk [vmem:[%s9221_s11 + $0x28] sm:$0xff] %vm420_vm3, %v5501_v63  ;;  %v271_v0 = vpop.f32.mrb[5].mxu0 }
  0xeb   :  { %425 = vst.msk [vmem:[%s9221_s11 + $0x20] sm:$0xff] %vm420_vm3, %v271_v0  ;;  %v4792_v0 = vld [vmem:[%s9219_s9] ss:$0 sm:$0xff] }
  0xed   :  { %v5504_v1 = vpop.f32.mrb[6].mxu0 }
  0xee   :  { %428 = vst.msk [vmem:[%s9221_s11 + $0x38] sm:$0xff] %vm420_vm3, %v5504_v1  ;;  %v281_v2 = vpop.f32.mrb[7].mxu0 }
  0xef   :  { %427 = vst.msk [vmem:[%s9221_s11 + $0x30] sm:$0xff] %vm420_vm3, %v281_v2 }
  0xf1   :  { %v5507_v3 = vpop.f32.mrb[8].mxu0 }
  0xf2   :  { %430 = vst.msk [vmem:[%s9221_s11 + $0x48] sm:$0xff] %vm420_vm3, %v5507_v3  ;;  %v291_v4 = vpop.f32.mrb[9].mxu0 }
  0xf3   :  { %429 = vst.msk [vmem:[%s9221_s11 + $0x40] sm:$0xff] %vm420_vm3, %v291_v4 }
  0xf5   :  { %v5510_v6 = vpop.f32.mrb[10].mxu0 }
  0xf6   :  { %432 = vst.msk [vmem:[%s9221_s11 + $0x58] sm:$0xff] %vm420_vm3, %v5510_v6  ;;  %v301_v7 = vpop.f32.mrb[11].mxu0 }
  0xf7   :  { %431 = vst.msk [vmem:[%s9221_s11 + $0x50] sm:$0xff] %vm420_vm3, %v301_v7 }
  0xf9   :  { %v5513_v8 = vpop.f32.mrb[12].mxu0 }
  0xfa   :  { %434 = vst.msk [vmem:[%s9221_s11 + $0x68] sm:$0xff] %vm420_vm3, %v5513_v8  ;;  %v311_v9 = vpop.f32.mrb[13].mxu0  ;;  %v632_v8 = vld [vmem:[%s9212_s2 + $0x10] sm:$0xff] }
  0xfb   :  { %433 = vst.msk [vmem:[%s9221_s11 + $0x60] sm:$0xff] %vm420_vm3, %v311_v9  ;;  %v633_v9 = vld [vmem:[%s9212_s2 + $0x18] sm:$0xff] }
  0xfd   :  { %v5516_v10 = vpop.f32.mrb[14].mxu0 }
  0xfe   :  { %436 = vst.msk [vmem:[%s9221_s11 + $0x78] sm:$0xff] %vm420_vm3, %v5516_v10  ;;  %v321_v11 = vpop.f32.mrb[15].mxu0 }
  0xff   :  { %435 = vst.msk [vmem:[%s9221_s11 + $0x70] sm:$0xff] %vm420_vm3, %v321_v11 }
 0x101   :  { %v5519_v13 = vpop.f32.mrb[16].mxu0 }
 0x102   :  { %438 = vst.msk [vmem:[%s9221_s11 + $0x88] sm:$0xff] %vm420_vm3, %v5519_v13  ;;  %v331_v15 = vpop.f32.mrb[17].mxu0  ;;  %v6021_v13 = vpack.c.bf16 %v633_v9, %v632_v8 }
 0x103   :  { %437 = vst.msk [vmem:[%s9221_s11 + $0x80] sm:$0xff] %vm420_vm3, %v331_v15  ;;  %v634_v15 = vld [vmem:[%s9212_s2 + $0x20] sm:$0x3] }
 0x105   :  { %v5522_v16 = vpop.f32.mrb[18].mxu0 }
 0x106   :  { %440 = vst.msk [vmem:[%s9221_s11 + $0x98] sm:$0xff] %vm420_vm3, %v5522_v16  ;;  %v341_v18 = vpop.f32.mrb[19].mxu0 }
 0x107   :  { %439 = vst.msk [vmem:[%s9221_s11 + $0x90] sm:$0xff] %vm420_vm3, %v341_v18 }
 0x109   :  { %v5525_v49 = vpop.f32.mrb[20].mxu0 }
 0x10a   :  { %442 = vst.msk [vmem:[%s9221_s11 + $0xa8] sm:$0xff] %vm420_vm3, %v5525_v49  ;;  %v351_v50 = vpop.f32.mrb[21].mxu0 }
 0x10b   :  { %441 = vst.msk [vmem:[%s9221_s11 + $0xa0] sm:$0xff] %vm420_vm3, %v351_v50 }
 0x10d   :  { %v5528_v51 = vpop.f32.mrb[22].mxu0 }
 0x10e   :  { %444 = vst.msk [vmem:[%s9221_s11 + $0xb8] sm:$0xff] %vm420_vm3, %v5528_v51  ;;  %v361_v52 = vpop.f32.mrb[23].mxu0 }
 0x10f   :  { %443 = vst.msk [vmem:[%s9221_s11 + $0xb0] sm:$0xff] %vm420_vm3, %v361_v52 }
 0x111   :  { %v5531_v53 = vpop.f32.mrb[24].mxu0 }
 0x112   :  { %446 = vst.msk [vmem:[%s9221_s11 + $0xc8] sm:$0xff] %vm420_vm3, %v5531_v53  ;;  %v371_v54 = vpop.f32.mrb[25].mxu0 }
 0x113   :  { %445 = vst.msk [vmem:[%s9221_s11 + $0xc0] sm:$0xff] %vm420_vm3, %v371_v54 }
 0x115   :  { %v5534_v55 = vpop.f32.mrb[26].mxu0 }
 0x116   :  { %448 = vst.msk [vmem:[%s9221_s11 + $0xd8] sm:$0xff] %vm420_vm3, %v5534_v55  ;;  %v381_v56 = vpop.f32.mrb[27].mxu0 }
 0x117   :  { %447 = vst.msk [vmem:[%s9221_s11 + $0xd0] sm:$0xff] %vm420_vm3, %v381_v56 }
 0x119   :  { %v5537_v57 = vpop.f32.mrb[28].mxu0 }
 0x11a   :  { %450 = vst.msk [vmem:[%s9221_s11 + $0xe8] sm:$0xff] %vm420_vm3, %v5537_v57  ;;  %v391_v59 = vpop.f32.mrb[29].mxu0 }
 0x11b   :  { %449 = vst.msk [vmem:[%s9221_s11 + $0xe0] sm:$0xff] %vm420_vm3, %v391_v59 }
 0x11d   :  { %v5540_v60 = vpop.f32.mrb[30].mxu0 }
 0x11e   :  { %452 = vst.msk [vmem:[%s9221_s11 + $0xf8] sm:$0xff] %vm420_vm3, %v5540_v60  ;;  %v401_v61 = vpop.f32.mrb[31].mxu0 }
 0x11f   :  { %451 = vst.msk [vmem:[%s9221_s11 + $0xf0] sm:$0xff] %vm420_vm3, %v401_v61 }
 0x121   :  { %v5543_v62 = vpop.f32.mrb[32].mxu0 }
 0x122   :  { %454 = vst.msk [vmem:[%s9221_s11 + $0x108] sm:$0xff] %vm420_vm3, %v5543_v62  ;;  %v411_v63 = vpop.f32.mrb[33].mxu0 }
 0x123   :  { %453 = vst.msk [vmem:[%s9221_s11 + $0x100] sm:$0xff] %vm420_vm3, %v411_v63 }
 0x125   :  { %v534_v1 = vpop.f32.mrb[34].mxu0 }
 0x126   :  { %v535_v2 = vadd.f32 %v4792_v0, %v534_v1  ;;  %v5554_v3 = vpop.f32.mrb[35].mxu0  ;;  %v1460_v1 = vld [vmem:[%s9215_s5] sm:$0xff] }
 0x128   :  { %v4794_v4 = vmul.f32 -1.442695, %v535_v2 }
 0x12a   :  { %6093 = vpow2.f32 %v4794_v4 }
 0x134   :  { %v6094_v6 = vpop.eup %6093 }
 0x135   :  { %v541_v7 = vadd.f32 1.0, %v6094_v6 }
 0x137   :  { %6095 = vrcp.f32 %v541_v7 }
 0x141   :  { %v6096_v10 = vpop.eup %6095 }
 0x142   :  { %v544_v11 = vmul.f32 %v6096_v10, %v535_v2  ;;  %v1461_v2 = vld [vmem:[%s9215_s5 + $0x8] sm:$0xff]  ;;  %v1462_v10 = vld [vmem:[%s9215_s5 + $0x10] sm:$0xff] }
 0x143   :  { %v6025_v4 = vpack.c.bf16 %v1461_v2, %v1460_v1 }
 0x144   :  { %5564 = vmatmul.mubr.msk.f32.vlgmr.msra.gmra.mrb[0].mxu1 %vm420_vm3, %v544_v11  ;;  %v1463_v11 = vld [vmem:[%s9215_s5 + $0x18] sm:$0xff] }
 0x145   :  { %6020 = vmatpush3.bf16.msra.mxu1 %v6897_v58  ;;  %5576 = vmatprep.mubr.msk.f32.mxu1 %vm78_vm0, %v6615_v5  ;;  %v4799_v5 = vld [vmem:[%s9219_s9 + $0x1] ss:$0 sm:$0xff] }
 0x146   :  { %6022 = vmatprep.subr.bf16.mxu1 %v6021_v13  ;;  %6026 = vmatprep.subr.bf16.mxu0 %v6025_v4 }
 0x147   :  { %6028 = vmatpush3.bf16.msra.mxu0 %v6025_v4 }
 0x149   :  { %6024 = vmatpush3.bf16.msra.mxu1 %v6021_v13 }
 0x14a   :  { %5574 = vmatprep.subr.msk.mxu1 %vm181_vm2, %v634_v15 }
 0x14d   :  { %5575 = vmatpush3.msk.msra.mxu1 %vm181_vm2, %v634_v15 }
 0x14e   :  { %5577 = vmatmul.mubr.msk.f32.vlgmr.msra.gmra.mrb[2].mxu1 %vm78_vm0, %v6635_v12 }
 0x14f   :  { %5579 = vmatprep.mubr.msk.f32.mxu1 %vm78_vm0, %v6640_v14 }
 0x152   :  { %5580 = vmatmul.mubr.msk.f32.gmra.mrb[4].mxu1 %vm78_vm0, %v6657_v17 }
 0x153   :  { %5582 = vmatprep.mubr.msk.f32.mxu1 %vm78_vm0, %v6662_v19 }
 0x156   :  { %5583 = vmatmul.mubr.msk.f32.gmra.mrb[6].mxu1 %vm78_vm0, %v6672_v20 }
 0x157   :  { %5585 = vmatprep.mubr.msk.f32.mxu1 %vm78_vm0, %v6677_v21 }
 0x15a   :  { %5586 = vmatmul.mubr.msk.f32.gmra.mrb[8].mxu1 %vm78_vm0, %v6686_v22 }
 0x15b   :  { %5588 = vmatprep.mubr.msk.f32.mxu1 %vm78_vm0, %v6691_v23 }
 0x15e   :  { %5589 = vmatmul.mubr.msk.f32.gmra.mrb[10].mxu1 %vm78_vm0, %v6700_v24 }
 0x15f   :  { %5591 = vmatprep.mubr.msk.f32.mxu1 %vm78_vm0, %v6705_v25 }
 0x162   :  { %5592 = vmatmul.mubr.msk.f32.gmra.mrb[12].mxu1 %vm78_vm0, %v6714_v26 }
 0x163   :  { %5594 = vmatprep.mubr.msk.f32.mxu1 %vm78_vm0, %v6719_v27 }
 0x166   :  { %5595 = vmatmul.mubr.msk.f32.gmra.mrb[14].mxu1 %vm78_vm0, %v6728_v28 }
 0x167   :  { %5597 = vmatprep.mubr.msk.f32.mxu1 %vm78_vm0, %v6733_v29 }
 0x16a   :  { %5598 = vmatmul.mubr.msk.f32.gmra.mrb[16].mxu1 %vm78_vm0, %v6742_v30 }
 0x16b   :  { %5600 = vmatprep.mubr.msk.f32.mxu1 %vm78_vm0, %v6747_v31 }
 0x16e   :  { %5601 = vmatmul.mubr.msk.f32.gmra.mrb[18].mxu1 %vm78_vm0, %v6756_v32 }
 0x16f   :  { %5603 = vmatprep.mubr.msk.f32.mxu1 %vm78_vm0, %v6761_v33 }
 0x172   :  { %5604 = vmatmul.mubr.msk.f32.gmra.mrb[20].mxu1 %vm78_vm0, %v6770_v34 }
 0x173   :  { %5606 = vmatprep.mubr.msk.f32.mxu1 %vm78_vm0, %v6775_v35 }
 0x176   :  { %5607 = vmatmul.mubr.msk.f32.gmra.mrb[22].mxu1 %vm78_vm0, %v6784_v36 }
 0x177   :  { %5609 = vmatprep.mubr.msk.f32.mxu1 %vm78_vm0, %v6789_v37 }
 0x17a   :  { %5610 = vmatmul.mubr.msk.f32.gmra.mrb[24].mxu1 %vm78_vm0, %v6798_v38 }
 0x17b   :  { %5612 = vmatprep.mubr.msk.f32.mxu1 %vm78_vm0, %v6803_v39 }
 0x17e   :  { %5613 = vmatmul.mubr.msk.f32.gmra.mrb[26].mxu1 %vm78_vm0, %v6812_v40 }
 0x17f   :  { %5615 = vmatprep.mubr.msk.f32.mxu1 %vm78_vm0, %v6817_v41 }
 0x182   :  { %5616 = vmatmul.mubr.msk.f32.gmra.mrb[28].mxu1 %vm78_vm0, %v6826_v42 }
 0x183   :  { %5618 = vmatprep.mubr.msk.f32.mxu1 %vm78_vm0, %v6831_v43 }
 0x186   :  { %5619 = vmatmul.mubr.msk.f32.gmra.mrb[30].mxu1 %vm78_vm0, %v6840_v44 }
 0x187   :  { %5621 = vmatprep.mubr.msk.f32.mxu1 %vm78_vm0, %v6845_v45 }
 0x18a   :  { %5622 = vmatmul.mubr.msk.f32.gmra.mrb[32].mxu1 %vm78_vm0, %v6854_v46 }
 0x18b   :  { %5624 = vmatprep.mubr.msk.f32.mxu1 %vm78_vm0, %v6859_v47 }
 0x18e   :  { %5625 = vmatmul.mubr.msk.f32.gmra.mrb[34].mxu1 %vm78_vm0, %v6868_v48 }
 0x217   :  { %v624_v12 = vpop.f32.mrb[0].mxu1 }
 0x218   :  { %v625_v14 = vadd.f32 %v4799_v5, %v624_v12  ;;  %v5565_v17 = vpop.f32.mrb[1].mxu1  ;;  %v6029_v5 = vpack.c.bf16 %v1463_v11, %v1462_v10 }
 0x21a   :  { %629 = vst.msk [vmem:[#allocation2] sm:$0x3] %vm628_vm4, %v625_v14  ;;  %6030 = vmatprep.subr.bf16.mxu0 %v6029_v5 }
 0x21b   :  { %6032 = vmatpush3.bf16.msra.mxu0 %v6029_v5 }
 0x221   :  { %v7123_v19 = vpop.f32.mrb[2].mxu1 }
 0x222   :  { %v7125_v20 = vpop.f32.mrb[3].mxu1  ;;  %v877_v21 = vsel %vm420_vm3, %v7123_v19, 0.0  ;;  %v1011_v22 = vmul.f32 %v7123_v19, %v7123_v19 }
 0x223   :  { %878 = vadd.xlane.f32.xlu0 %v877_v21  ;;  %v1010_v24 = vmul.f32 %v7125_v20, %v7125_v20  ;;  %v874_v26 = vsel %vm420_vm3, %v7125_v20, 0.0 }
 0x224   :  { %v1047_v23 = vsel %vm420_vm3, %v1011_v22, 0.0 }
 0x225   :  { %1048 = vadd.xlane.f32.xlu1 %v1047_v23  ;;  %v7134_v25 = vpop.f32.mrb[4].mxu1  ;;  %v1044_v28 = vsel %vm420_vm3, %v1010_v24, 0.0 }
 0x226   :  { %v7138_v27 = vpop.f32.mrb[5].mxu1  ;;  %v883_v32 = vsel %vm420_vm3, %v7134_v25, 0.0  ;;  %v1013_v35 = vmul.f32 %v7134_v25, %v7134_v25 }
 0x227   :  { %875 = vadd.xlane.f32.xlu0 %v874_v26  ;;  %v880_v29 = vsel %vm420_vm3, %v7138_v27, 0.0  ;;  %v1012_v30 = vmul.f32 %v7138_v27, %v7138_v27 }
 0x228   :  { %v1053_v38 = vsel %vm420_vm3, %v1013_v35, 0.0 }
 0x229   :  { %1045 = vadd.xlane.f32.xlu1 %v1044_v28  ;;  %v7145_v31 = vpop.f32.mrb[6].mxu1  ;;  %v1050_v34 = vsel %vm420_vm3, %v1012_v30, 0.0 }
 0x22a   :  { %v7149_v33 = vpop.f32.mrb[7].mxu1  ;;  %v889_v42 = vsel %vm420_vm3, %v7145_v31, 0.0  ;;  %v1015_v45 = vmul.f32 %v7145_v31, %v7145_v31 }
 0x22b   :  { %881 = vadd.xlane.f32.xlu0 %v880_v29  ;;  %v886_v39 = vsel %vm420_vm3, %v7149_v33, 0.0  ;;  %v1014_v40 = vmul.f32 %v7149_v33, %v7149_v33 }
 0x22c   :  { %v1059_v48 = vsel %vm420_vm3, %v1015_v45, 0.0 }
 0x22d   :  { %884 = vadd.xlane.f32.xlu1 %v883_v32  ;;  %v7154_v36 = vpop.f32.mrb[8].mxu1  ;;  %v1056_v44 = vsel %vm420_vm3, %v1014_v40, 0.0 }
 0x22e   :  { %v7156_v37 = vpop.f32.mrb[9].mxu1  ;;  %v895_v49 = vsel %vm420_vm3, %v7154_v36, 0.0  ;;  %v1017_v52 = vmul.f32 %v7154_v36, %v7154_v36 }
 0x22f   :  { %1051 = vadd.xlane.f32.xlu0 %v1050_v34  ;;  %v892_v58 = vsel %vm420_vm3, %v7156_v37, 0.0  ;;  %v1016_v16 = vmul.f32 %v7156_v37, %v7156_v37 }
 0x230   :  { %v1065_v55 = vsel %vm420_vm3, %v1017_v52, 0.0 }
 0x231   :  { %1054 = vadd.xlane.f32.xlu1 %v1053_v38  ;;  %v7163_v41 = vpop.f32.mrb[10].mxu1  ;;  %v1062_v51 = vsel %vm420_vm3, %v1016_v16, 0.0 }
 0x232   :  { %v7167_v43 = vpop.f32.mrb[11].mxu1  ;;  %v901_v60 = vsel %vm420_vm3, %v7163_v41, 0.0  ;;  %v1019_v63 = vmul.f32 %v7163_v41, %v7163_v41 }
 0x233   :  { %887 = vadd.xlane.f32.xlu0 %v886_v39  ;;  %v898_v56 = vsel %vm420_vm3, %v7167_v43, 0.0  ;;  %v1018_v57 = vmul.f32 %v7167_v43, %v7167_v43 }
 0x234   :  { %v1071_v6 = vsel %vm420_vm3, %v1019_v63, 0.0 }
 0x235   :  { %890 = vadd.xlane.f32.xlu1 %v889_v42  ;;  %v7172_v46 = vpop.f32.mrb[12].mxu1  ;;  %v1068_v62 = vsel %vm420_vm3, %v1018_v57, 0.0 }
 0x236   :  { %v7174_v47 = vpop.f32.mrb[13].mxu1  ;;  %v907_v13 = vsel %vm420_vm3, %v7172_v46, 0.0  ;;  %v1021_v14 = vmul.f32 %v7172_v46, %v7172_v46 }
 0x237   :  { %1057 = vadd.xlane.f32.xlu0 %v1056_v44  ;;  %v904_v7 = vsel %vm420_vm3, %v7174_v47, 0.0  ;;  %v1020_v8 = vmul.f32 %v7174_v47, %v7174_v47 }
 0x238   :  { %v1077_v22 = vsel %vm420_vm3, %v1021_v14, 0.0 }
 0x239   :  { %1060 = vadd.xlane.f32.xlu1 %v1059_v48  ;;  %v7181_v18 = vpop.f32.mrb[14].mxu1  ;;  %v1074_v12 = vsel %vm420_vm3, %v1020_v8, 0.0 }
 0x23a   :  { %v7185_v50 = vpop.f32.mrb[15].mxu1  ;;  %v913_v28 = vsel %vm420_vm3, %v7181_v18, 0.0  ;;  %v1023_v32 = vmul.f32 %v7181_v18, %v7181_v18 }
 0x23b   :  { %893 = vadd.xlane.f32.xlu0 %v892_v58  ;;  %v910_v23 = vsel %vm420_vm3, %v7185_v50, 0.0  ;;  %v1022_v24 = vmul.f32 %v7185_v50, %v7185_v50 }
 0x23c   :  { %v1083_v38 = vsel %vm420_vm3, %v1023_v32, 0.0 }
 0x23d   :  { %896 = vadd.xlane.f32.xlu1 %v895_v49  ;;  %v7190_v53 = vpop.f32.mrb[16].mxu1  ;;  %v1080_v30 = vsel %vm420_vm3, %v1022_v24, 0.0 }
 0x23e   :  { %v7192_v54 = vpop.f32.mrb[17].mxu1  ;;  %v919_v44 = vsel %vm420_vm3, %v7190_v53, 0.0  ;;  %v1025_v58 = vmul.f32 %v7190_v53, %v7190_v53 }
 0x23f   :  { %1063 = vadd.xlane.f32.xlu0 %v1062_v51  ;;  %v916_v39 = vsel %vm420_vm3, %v7192_v54, 0.0  ;;  %v1024_v40 = vmul.f32 %v7192_v54, %v7192_v54 }
 0x240   :  { %v1089_v51 = vsel %vm420_vm3, %v1025_v58, 0.0 }
 0x241   :  { %1066 = vadd.xlane.f32.xlu1 %v1065_v55  ;;  %v7199_v59 = vpop.f32.mrb[18].mxu1  ;;  %v1086_v48 = vsel %vm420_vm3, %v1024_v40, 0.0 }
 0x242   :  { %v7203_v61 = vpop.f32.mrb[19].mxu1  ;;  %v925_v57 = vsel %vm420_vm3, %v7199_v59, 0.0  ;;  %v1027_v63 = vmul.f32 %v7199_v59, %v7199_v59 }
 0x243   :  { %899 = vadd.xlane.f32.xlu0 %v898_v56  ;;  %v922_v52 = vsel %vm420_vm3, %v7203_v61, 0.0  ;;  %v1026_v55 = vmul.f32 %v7203_v61, %v7203_v61 }
 0x244   :  { %v1095_v1 = vsel %vm420_vm3, %v1027_v63, 0.0 }
 0x245   :  { %902 = vadd.xlane.f32.xlu1 %v901_v60  ;;  %v7208_v0 = vpop.f32.mrb[20].mxu1 }
 0x246   :  { %v7216_v3 = vpop.f32.mrb[21].mxu1  ;;  %v1029_v8 = vmul.f32 %v7208_v0, %v7208_v0 }
 0x247   :  { %1069 = vadd.xlane.f32.xlu0 %v1068_v62  ;;  %v1092_v62 = vsel %vm420_vm3, %v1026_v55, 0.0  ;;  %v928_v2 = vsel %vm420_vm3, %v7216_v3, 0.0  ;;  %v1028_v4 = vmul.f32 %v7216_v3, %v7216_v3 }
 0x248   :  { %v1101_v10 = vsel %vm420_vm3, %v1029_v8, 0.0 }
 0x249   :  { %1072 = vadd.xlane.f32.xlu1 %v1071_v6  ;;  %v7223_v9 = vpop.f32.mrb[22].mxu1  ;;  %v931_v6 = vsel %vm420_vm3, %v7208_v0, 0.0 }
 0x24a   :  { %v7233_v15 = vpop.f32.mrb[23].mxu1  ;;  %v937_v5 = vsel %vm420_vm3, %v7223_v9, 0.0  ;;  %v1031_v14 = vmul.f32 %v7223_v9, %v7223_v9 }
 0x24b   :  { %905 = vadd.xlane.f32.xlu0 %v904_v7  ;;  %v1098_v7 = vsel %vm420_vm3, %v1028_v4, 0.0  ;;  %v934_v11 = vsel %vm420_vm3, %v7233_v15, 0.0 }
 0x24d   :  { %908 = vadd.xlane.f32.xlu1 %v907_v13  ;;  %v7238_v17 = vpop.f32.mrb[24].mxu1  ;;  %v1030_v13 = vmul.f32 %v7233_v15, %v7233_v15 }
 0x24e   :  { %v7240_v21 = vpop.f32.mrb[25].mxu1  ;;  %v1033_v32 = vmul.f32 %v7238_v17, %v7238_v17 }
 0x24f   :  { %1075 = vadd.xlane.f32.xlu0 %v1074_v12  ;;  %v1104_v12 = vsel %vm420_vm3, %v1030_v13, 0.0  ;;  %v1032_v24 = vmul.f32 %v7240_v21, %v7240_v21 }
 0x251   :  { %1078 = vadd.xlane.f32.xlu1 %v1077_v22  ;;  %v7247_v26 = vpop.f32.mrb[26].mxu1  ;;  %v1107_v22 = vsel %vm420_vm3, %v1031_v14, 0.0 }
 0x252   :  { %v7251_v29 = vpop.f32.mrb[27].mxu1  ;;  %v1035_v58 = vmul.f32 %v7247_v26, %v7247_v26 }
 0x253   :  { %911 = vadd.xlane.f32.xlu0 %v910_v23  ;;  %v940_v23 = vsel %vm420_vm3, %v7240_v21, 0.0  ;;  %v1034_v40 = vmul.f32 %v7251_v29, %v7251_v29 }
 0x255   :  { %914 = vadd.xlane.f32.xlu1 %v913_v28  ;;  %v7256_v34 = vpop.f32.mrb[28].mxu1  ;;  %v943_v28 = vsel %vm420_vm3, %v7238_v17, 0.0 }
 0x256   :  { %v7258_v35 = vpop.f32.mrb[29].mxu1  ;;  %v1037_v63 = vmul.f32 %v7256_v34, %v7256_v34 }
 0x257   :  { %1081 = vadd.xlane.f32.xlu0 %v1080_v30  ;;  %v1110_v30 = vsel %vm420_vm3, %v1032_v24, 0.0  ;;  %v1036_v55 = vmul.f32 %v7258_v35, %v7258_v35 }
 0x259   :  { %1084 = vadd.xlane.f32.xlu1 %v1083_v38  ;;  %v7265_v42 = vpop.f32.mrb[30].mxu1  ;;  %v1113_v38 = vsel %vm420_vm3, %v1033_v32, 0.0 }
 0x25a   :  { %v7269_v45 = vpop.f32.mrb[31].mxu1  ;;  %v1039_v8 = vmul.f32 %v7265_v42, %v7265_v42 }
 0x25b   :  { %917 = vadd.xlane.f32.xlu0 %v916_v39  ;;  %v946_v39 = vsel %vm420_vm3, %v7251_v29, 0.0  ;;  %v1038_v4 = vmul.f32 %v7269_v45, %v7269_v45 }
 0x25d   :  { %920 = vadd.xlane.f32.xlu1 %v919_v44  ;;  %v7274_v16 = vpop.f32.mrb[32].mxu1  ;;  %v949_v44 = vsel %vm420_vm3, %v7247_v26, 0.0 }
 0x25e   :  { %v7276_v49 = vpop.f32.mrb[33].mxu1  ;;  %v1041_v14 = vmul.f32 %v7274_v16, %v7274_v16 }
 0x25f   :  { %1087 = vadd.xlane.f32.xlu0 %v1086_v48  ;;  %v1116_v48 = vsel %vm420_vm3, %v1034_v40, 0.0  ;;  %v1040_v13 = vmul.f32 %v7276_v49, %v7276_v49 }
 0x261   :  { %1090 = vadd.xlane.f32.xlu1 %v1089_v51  ;;  %v7283_v56 = vpop.f32.mrb[34].mxu1  ;;  %v1119_v51 = vsel %vm420_vm3, %v1035_v58, 0.0 }
 0x262   :  { %v7287_v60 = vpop.f32.mrb[35].mxu1  ;;  %v1043_v32 = vmul.f32 %v7283_v56, %v7283_v56 }
 0x263   :  { %923 = vadd.xlane.f32.xlu0 %v922_v52  ;;  %v952_v52 = vsel %vm420_vm3, %v7258_v35, 0.0  ;;  %v1042_v24 = vmul.f32 %v7287_v60, %v7287_v60 }
 0x265   :  { %926 = vadd.xlane.f32.xlu1 %v925_v57  ;;  %v955_v57 = vsel %vm420_vm3, %v7256_v34, 0.0 }
 0x267   :  { %1093 = vadd.xlane.f32.xlu0 %v1092_v62  ;;  %v1122_v62 = vsel %vm420_vm3, %v1036_v55, 0.0 }
 0x269   :  { %1096 = vadd.xlane.f32.xlu1 %v1095_v1  ;;  %v1125_v1 = vsel %vm420_vm3, %v1037_v63, 0.0 }
 0x26b   :  { %929 = vadd.xlane.f32.xlu0 %v928_v2  ;;  %v958_v2 = vsel %vm420_vm3, %v7269_v45, 0.0 }
 0x26d   :  { %932 = vadd.xlane.f32.xlu1 %v931_v6  ;;  %v961_v6 = vsel %vm420_vm3, %v7265_v42, 0.0 }
 0x26f   :  { %1099 = vadd.xlane.f32.xlu0 %v1098_v7  ;;  %v1128_v7 = vsel %vm420_vm3, %v1038_v4, 0.0 }
 0x271   :  { %1102 = vadd.xlane.f32.xlu1 %v1101_v10  ;;  %v1131_v10 = vsel %vm420_vm3, %v1039_v8, 0.0 }
 0x273   :  { %935 = vadd.xlane.f32.xlu0 %v934_v11  ;;  %v964_v11 = vsel %vm420_vm3, %v7276_v49, 0.0 }
 0x275   :  { %938 = vadd.xlane.f32.xlu1 %v937_v5  ;;  %v967_v5 = vsel %vm420_vm3, %v7274_v16, 0.0 }
 0x277   :  { %1105 = vadd.xlane.f32.xlu0 %v1104_v12  ;;  %v1134_v12 = vsel %vm420_vm3, %v1040_v13, 0.0 }
 0x279   :  { %1108 = vadd.xlane.f32.xlu1 %v1107_v22  ;;  %v1137_v22 = vsel %vm420_vm3, %v1041_v14, 0.0 }
 0x27b   :  { %941 = vadd.xlane.f32.xlu0 %v940_v23  ;;  %v970_v23 = vsel %vm420_vm3, %v7287_v60, 0.0 }
 0x27d   :  { %944 = vadd.xlane.f32.xlu1 %v943_v28  ;;  %v973_v28 = vsel %vm420_vm3, %v7283_v56, 0.0 }
 0x27f   :  { %1111 = vadd.xlane.f32.xlu0 %v1110_v30  ;;  %v1140_v30 = vsel %vm420_vm3, %v1042_v24, 0.0 }
 0x281   :  { %1114 = vadd.xlane.f32.xlu1 %v1113_v38  ;;  %v1143_v38 = vsel %vm420_vm3, %v1043_v32, 0.0 }
 0x283   :  { %947 = vadd.xlane.f32.xlu0 %v946_v39 }
 0x285   :  { %950 = vadd.xlane.f32.xlu1 %v949_v44 }
 0x287   :  { %1117 = vadd.xlane.f32.xlu0 %v1116_v48 }
 0x289   :  { %1120 = vadd.xlane.f32.xlu1 %v1119_v51 }
 0x28b   :  { %953 = vadd.xlane.f32.xlu0 %v952_v52 }
 0x28d   :  { %956 = vadd.xlane.f32.xlu1 %v955_v57 }
 0x28f   :  { %1123 = vadd.xlane.f32.xlu0 %v1122_v62 }
 0x291   :  { %1126 = vadd.xlane.f32.xlu1 %v1125_v1 }
 0x293   :  { %959 = vadd.xlane.f32.xlu0 %v958_v2 }
 0x295   :  { %962 = vadd.xlane.f32.xlu1 %v961_v6 }
 0x297   :  { %1129 = vadd.xlane.f32.xlu0 %v1128_v7  ;;  %v1384_v7 = vlaneseq }
 0x299   :  { %1132 = vadd.xlane.f32.xlu1 %v1131_v10  ;;  %v7379_v14 = vshrl.u32 %v1384_v7, 7 }
 0x29b   :  { %965 = vadd.xlane.f32.xlu0 %v964_v11 }
 0x29d   :  { %968 = vadd.xlane.f32.xlu1 %v967_v5 }
 0x29f   :  { %1135 = vadd.xlane.f32.xlu0 %v1134_v12 }
 0x2a1   :  { %1138 = vadd.xlane.f32.xlu1 %v1137_v22 }
 0x2a3   :  { %971 = vadd.xlane.f32.xlu0 %v970_v23 }
 0x2a5   :  { %974 = vadd.xlane.f32.xlu1 %v973_v28 }
 0x2a7   :  { %1141 = vadd.xlane.f32.xlu0 %v1140_v30 }
 0x2a9   :  { %1144 = vadd.xlane.f32.xlu1 %v1143_v38 }
 0x2b0   :  { %v879_v39 = vpop.xlane.xlu0 %878 }
 0x2b1   :  { %v977_v40 = vmul.f32 0.03125, %v879_v39 }
 0x2b2   :  { %v1049_v44 = vpop.xlane.xlu1 %1048 }
 0x2b3   :  { %v1181_v48 = vmul.f32 %v977_v40, %v977_v40  ;;  %v1147_v58 = vmul.f32 0.03125, %v1049_v44  ;;  %v1386_v44 = vsub.s32 0, %v7379_v14 }
 0x2b4   :  { %v876_v51 = vpop.xlane.xlu0 %875 }
 0x2b5   :  { %v1215_v52 = vsub.f32 %v1147_v58, %v1181_v48  ;;  %v976_v55 = vmul.f32 0.03125, %v876_v51  ;;  %v7389_v58 = vld [vmem:[%s9214_s4] sm:$0xf] }
 0x2b6   :  { %v1046_v57 = vpop.xlane.xlu1 %1045 }
 0x2b7   :  { %v1283_v62 = vadd.f32 1e-05, %v1215_v52  ;;  %v1180_v63 = vmul.f32 %v976_v55, %v976_v55  ;;  %v1146_v1 = vmul.f32 0.03125, %v1046_v57  ;;  %v1249_v52 = vsub.f32 %v7123_v19, %v977_v40 }
 0x2b8   :  { %v882_v2 = vpop.xlane.xlu0 %881  ;;  %v1248_v40 = vsub.f32 %v7125_v20, %v976_v55 }
 0x2b9   :  { %6097 = vrsqrt.f32 %v1283_v62  ;;  %v1214_v4 = vsub.f32 %v1146_v1, %v1180_v63  ;;  %v7373_v6 = vmul.f32 0.03125, %v882_v2  ;;  %v9223_v2 = vsub.s32 1, %v7379_v14 }
 0x2ba   :  { %v885_v8 = vpop.xlane.xlu1 %884 }
 0x2bb   :  { %v1282_v10 = vadd.f32 1e-05, %v1214_v4  ;;  %v1182_v11 = vmul.f32 %v7373_v6, %v7373_v6  ;;  %v7377_v13 = vmul.f32 0.03125, %v885_v8  ;;  %v7400_v8 = vrot.slane %v7389_v58, %v1386_v44 }
 0x2bc   :  { %v1052_v5 = vpop.xlane.xlu0 %1051 }
 0x2bd   :  { %6099 = vrsqrt.f32 %v1282_v10  ;;  %v1148_v12 = vmul.f32 0.03125, %v1052_v5  ;;  %v1183_v23 = vmul.f32 %v7377_v13, %v7377_v13 }
 0x2be   :  { %v1055_v22 = vpop.xlane.xlu1 %1054 }
 0x2bf   :  { %v1216_v24 = vsub.f32 %v1148_v12, %v1182_v11  ;;  %v1149_v28 = vmul.f32 0.03125, %v1055_v22 }
 0x2c0   :  { %v888_v30 = vpop.xlane.xlu0 %887 }
 0x2c1   :  { %v1284_v32 = vadd.f32 1e-05, %v1216_v24  ;;  %v1217_v38 = vsub.f32 %v1149_v28, %v1183_v23  ;;  %v7383_v39 = vmul.f32 0.03125, %v888_v30  ;;  %v7408_v28 = vrot.slane %v7389_v58, %v9223_v2 }
 0x2c2   :  { %v891_v48 = vpop.xlane.xlu1 %890 }
 0x2c3   :  { %v6098_v51 = vpop.eup %6097  ;;  %6101 = vrsqrt.f32 %v1284_v32  ;;  %v1285_v57 = vadd.f32 1e-05, %v1217_v38  ;;  %v1184_v62 = vmul.f32 %v7383_v39, %v7383_v39  ;;  %v7394_v63 = vmul.f32 0.03125, %v891_v48 }
 0x2c4   :  { %v1058_v1 = vpop.xlane.xlu0 %1057  ;;  %v1351_v4 = vmul.f32 %v6098_v51, %v1249_v52 }
 0x2c5   :  { %6103 = vrsqrt.f32 %v1285_v57  ;;  %v1150_v7 = vmul.f32 0.03125, %v1058_v1  ;;  %v1185_v5 = vmul.f32 %v7394_v63, %v7394_v63 }
 0x2c6   :  { %v1061_v10 = vpop.xlane.xlu1 %1060  ;;  %v1389_v55 = vmul.f32 %v7400_v8, %v1351_v4 }
 0x2c7   :  { %v6100_v11 = vpop.eup %6099  ;;  %v1218_v12 = vsub.f32 %v1150_v7, %v1184_v62  ;;  %v1151_v22 = vmul.f32 0.03125, %v1061_v10  ;;  %v1250_v62 = vsub.f32 %v7138_v27, %v7373_v6  ;;  %v2043_v6 = vld [vmem:[%s9216_s6] sm:$0xff] }
 0x2c8   :  { %v894_v23 = vpop.xlane.xlu0 %893  ;;  %v1350_v24 = vmul.f32 %v6100_v11, %v1248_v40  ;;  %v1427_v4 = vadd.f32 %v7408_v28, %v1389_v55 }
 0x2c9   :  { %v1286_v30 = vadd.f32 1e-05, %v1218_v12  ;;  %v1219_v32 = vsub.f32 %v1151_v22, %v1185_v5  ;;  %v7410_v38 = vmul.f32 0.03125, %v894_v23  ;;  %v1251_v5 = vsub.f32 %v7134_v25, %v7377_v13  ;;  %v2044_v23 = vld [vmem:[%s9216_s6 + $0x8] sm:$0xff] }
 0x2ca   :  { %v897_v48 = vpop.xlane.xlu1 %896  ;;  %v1388_v51 = vmul.f32 %v7400_v8, %v1350_v24  ;;  %v2045_v24 = vld [vmem:[%s9216_s6 + $0x10] sm:$0xff] }
 0x2cb   :  { %6105 = vrsqrt.f32 %v1286_v30  ;;  %v1287_v52 = vadd.f32 1e-05, %v1219_v32  ;;  %v1186_v57 = vmul.f32 %v7410_v38, %v7410_v38  ;;  %v7418_v1 = vmul.f32 0.03125, %v897_v48 }
 0x2cc   :  { %v1064_v7 = vpop.xlane.xlu0 %1063  ;;  %v1426_v40 = vadd.f32 %v7408_v28, %v1388_v51  ;;  %v6033_v48 = vpack.c.bf16 %v2044_v23, %v2043_v6  ;;  %v2046_v51 = vld [vmem:[%s9216_s6 + $0x18] sm:$0xff] }
 0x2cd   :  { %v6102_v10 = vpop.eup %6101  ;;  %6107 = vrsqrt.f32 %v1287_v52  ;;  %v1152_v11 = vmul.f32 0.03125, %v1064_v7  ;;  %v1187_v13 = vmul.f32 %v7418_v1, %v7418_v1 }
 0x2ce   :  { %5635 = vmatprep.mubr.msk.f32.mxu0 %vm420_vm3, %v1426_v40  ;;  %v1067_v12 = vpop.xlane.xlu1 %1066  ;;  %v1352_v22 = vmul.f32 %v6102_v10, %v1250_v62  ;;  %v6037_v40 = vpack.c.bf16 %v2046_v51, %v2045_v24  ;;  %v2047_v10 = vld [vmem:[%s9216_s6 + $0x20] sm:$0xff]  ;;  %6034 = vmatprep.subr.bf16.mxu1 %v6033_v48 }
 0x2cf   :  { %v6104_v30 = vpop.eup %6103  ;;  %v1220_v32 = vsub.f32 %v1152_v11, %v1186_v57  ;;  %v1153_v55 = vmul.f32 0.03125, %v1067_v12  ;;  %5636 = vmatmul.mubr.msk.f32.vlgmr.msra.gmra.mrb[36].mxu0 %vm420_vm3, %v1427_v4  ;;  %v2048_v57 = vld [vmem:[%s9216_s6 + $0x28] sm:$0xff]  ;;  %6036 = vmatpush3.bf16.msra.mxu1 %v6033_v48 }
 0x2d0   :  { %v900_v52 = vpop.xlane.xlu0 %899  ;;  %v1390_v62 = vmul.f32 %v7400_v8, %v1352_v22  ;;  %v1353_v7 = vmul.f32 %v6104_v30, %v1251_v5  ;;  %6038 = vmatprep.subr.bf16.mxu1 %v6037_v40  ;;  %v6041_v30 = vpack.c.bf16 %v2048_v57, %v2047_v10 }
 0x2d1   :  { %v1288_v11 = vadd.f32 1e-05, %v1220_v32  ;;  %v1221_v4 = vsub.f32 %v1153_v55, %v1187_v13  ;;  %v7447_v12 = vmul.f32 0.03125, %v900_v52  ;;  %v1252_v32 = vsub.f32 %v7149_v33, %v7383_v39 }
 0x2d2   :  { %v903_v6 = vpop.xlane.xlu1 %902  ;;  %v1428_v23 = vadd.f32 %v7408_v28, %v1390_v62  ;;  %v1391_v22 = vmul.f32 %v7400_v8, %v1353_v7  ;;  %v1253_v62 = vsub.f32 %v7145_v31, %v7394_v63 }
 0x2d3   :  { %6109 = vrsqrt.f32 %v1288_v11  ;;  %v1289_v5 = vadd.f32 1e-05, %v1221_v4  ;;  %v1188_v24 = vmul.f32 %v7447_v12, %v7447_v12  ;;  %v7455_v13 = vmul.f32 0.03125, %v903_v6  ;;  %6040 = vmatpush3.bf16.msra.mxu1 %v6037_v40 }
 0x2d4   :  { %5638 = vmatprep.mubr.msk.f32.mxu0 %vm420_vm3, %v1428_v23  ;;  %v1070_v55 = vpop.xlane.xlu0 %1069  ;;  %v1429_v51 = vadd.f32 %v7408_v28, %v1391_v22  ;;  %6042 = vmatprep.subr.bf16.mxu1 %v6041_v30 }
 0x2d5   :  { %v6106_v52 = vpop.eup %6105  ;;  %6111 = vrsqrt.f32 %v1289_v5  ;;  %v1154_v48 = vmul.f32 0.03125, %v1070_v55  ;;  %v1189_v39 = vmul.f32 %v7455_v13, %v7455_v13 }
 0x2d6   :  { %5639 = vmatmul.mubr.msk.f32.gmra.mrb[38].mxu0 %vm420_vm3, %v1429_v51  ;;  %v1073_v7 = vpop.xlane.xlu1 %1072  ;;  %v1354_v10 = vmul.f32 %v6106_v52, %v1252_v32  ;;  %v1254_v52 = vsub.f32 %v7156_v37, %v7410_v38 }
 0x2d7   :  { %v6108_v57 = vpop.eup %6107  ;;  %v1222_v11 = vsub.f32 %v1154_v48, %v1188_v24  ;;  %v1155_v4 = vmul.f32 0.03125, %v1073_v7  ;;  %6044 = vmatpush3.bf16.msra.mxu1 %v6041_v30  ;;  %v1255_v30 = vsub.f32 %v7154_v36, %v7418_v1 }
 0x2d8   :  { %v906_v6 = vpop.xlane.xlu0 %905  ;;  %v1392_v23 = vmul.f32 %v7400_v8, %v1354_v10  ;;  %v1355_v22 = vmul.f32 %v6108_v57, %v1253_v62 }
 0x2d9   :  { %v1290_v5 = vadd.f32 1e-05, %v1222_v11  ;;  %v1223_v55 = vsub.f32 %v1155_v4, %v1189_v39  ;;  %v7465_v2 = vmul.f32 0.03125, %v906_v6 }
 0x2da   :  { %v909_v63 = vpop.xlane.xlu1 %908  ;;  %v1430_v51 = vadd.f32 %v7408_v28, %v1392_v23  ;;  %v1393_v40 = vmul.f32 %v7400_v8, %v1355_v22 }
 0x2db   :  { %6113 = vrsqrt.f32 %v1290_v5  ;;  %v1291_v32 = vadd.f32 1e-05, %v1223_v55  ;;  %v1190_v24 = vmul.f32 %v7465_v2, %v7465_v2  ;;  %v7473_v48 = vmul.f32 0.03125, %v909_v63 }
 0x2dc   :  { %5641 = vmatprep.mubr.msk.f32.mxu0 %vm420_vm3, %v1430_v51  ;;  %v1076_v62 = vpop.xlane.xlu0 %1075  ;;  %v1431_v7 = vadd.f32 %v7408_v28, %v1393_v40 }
 0x2dd   :  { %v6110_v10 = vpop.eup %6109  ;;  %6115 = vrsqrt.f32 %v1291_v32  ;;  %v1156_v57 = vmul.f32 0.03125, %v1076_v62  ;;  %v1191_v38 = vmul.f32 %v7473_v48, %v7473_v48 }
 0x2de   :  { %5642 = vmatmul.mubr.msk.f32.gmra.mrb[40].mxu0 %vm420_vm3, %v1431_v7  ;;  %v1079_v39 = vpop.xlane.xlu1 %1078  ;;  %v1356_v11 = vmul.f32 %v6110_v10, %v1254_v52 }
 0x2df   :  { %v6112_v4 = vpop.eup %6111  ;;  %v1224_v6 = vsub.f32 %v1156_v57, %v1190_v24  ;;  %v1157_v23 = vmul.f32 0.03125, %v1079_v39  ;;  %v1256_v24 = vsub.f32 %v7167_v43, %v7447_v12 }
 0x2e0   :  { %v912_v22 = vpop.xlane.xlu0 %911  ;;  %v1394_v5 = vmul.f32 %v7400_v8, %v1356_v11  ;;  %v1357_v55 = vmul.f32 %v6112_v4, %v1255_v30  ;;  %v1257_v4 = vsub.f32 %v7163_v41, %v7455_v13 }
 0x2e1   :  { %v1292_v63 = vadd.f32 1e-05, %v1224_v6  ;;  %v1225_v51 = vsub.f32 %v1157_v23, %v1191_v38  ;;  %v7483_v40 = vmul.f32 0.03125, %v912_v22 }
 0x2e2   :  { %v915_v32 = vpop.xlane.xlu1 %914  ;;  %v1432_v1 = vadd.f32 %v7408_v28, %v1394_v5  ;;  %v1395_v62 = vmul.f32 %v7400_v8, %v1357_v55 }
 0x2e3   :  { %6117 = vrsqrt.f32 %v1292_v63  ;;  %v1293_v52 = vadd.f32 1e-05, %v1225_v51  ;;  %v1192_v7 = vmul.f32 %v7483_v40, %v7483_v40  ;;  %v7491_v10 = vmul.f32 0.03125, %v915_v32 }
 0x2e4   :  { %5644 = vmatprep.mubr.msk.f32.mxu0 %vm420_vm3, %v1432_v1  ;;  %v1082_v57 = vpop.xlane.xlu0 %1081  ;;  %v1433_v30 = vadd.f32 %v7408_v28, %v1395_v62 }
 0x2e5   :  { %v6114_v39 = vpop.eup %6113  ;;  %6119 = vrsqrt.f32 %v1293_v52  ;;  %v1158_v11 = vmul.f32 0.03125, %v1082_v57  ;;  %v1193_v12 = vmul.f32 %v7491_v10, %v7491_v10 }
 0x2e6   :  { %5645 = vmatmul.mubr.msk.f32.gmra.mrb[42].mxu0 %vm420_vm3, %v1433_v30  ;;  %v1085_v38 = vpop.xlane.xlu1 %1084  ;;  %v1358_v6 = vmul.f32 %v6114_v39, %v1256_v24 }
 0x2e7   :  { %v6116_v23 = vpop.eup %6115  ;;  %v1226_v22 = vsub.f32 %v1158_v11, %v1192_v7  ;;  %v1159_v5 = vmul.f32 0.03125, %v1085_v38  ;;  %v1258_v7 = vsub.f32 %v7174_v47, %v7465_v2 }
 0x2e8   :  { %v918_v55 = vpop.xlane.xlu0 %917  ;;  %v1396_v63 = vmul.f32 %v7400_v8, %v1358_v6  ;;  %v1359_v51 = vmul.f32 %v6116_v23, %v1257_v4  ;;  %v1259_v23 = vsub.f32 %v7172_v46, %v7473_v48 }
 0x2e9   :  { %v1294_v32 = vadd.f32 1e-05, %v1226_v22  ;;  %v1227_v1 = vsub.f32 %v1159_v5, %v1193_v12  ;;  %v7501_v62 = vmul.f32 0.03125, %v918_v55 }
 0x2ea   :  { %v921_v52 = vpop.xlane.xlu1 %920  ;;  %v1434_v13 = vadd.f32 %v7408_v28, %v1396_v63  ;;  %v1397_v57 = vmul.f32 %v7400_v8, %v1359_v51 }
 0x2eb   :  { %6121 = vrsqrt.f32 %v1294_v32  ;;  %v1295_v24 = vadd.f32 1e-05, %v1227_v1  ;;  %v1194_v30 = vmul.f32 %v7501_v62, %v7501_v62  ;;  %v7509_v39 = vmul.f32 0.03125, %v921_v52 }
 0x2ec   :  { %5647 = vmatprep.mubr.msk.f32.mxu0 %vm420_vm3, %v1434_v13  ;;  %v1088_v11 = vpop.xlane.xlu0 %1087  ;;  %v1435_v4 = vadd.f32 %v7408_v28, %v1397_v57 }
 0x2ed   :  { %v6118_v38 = vpop.eup %6117  ;;  %6123 = vrsqrt.f32 %v1295_v24  ;;  %v1160_v6 = vmul.f32 0.03125, %v1088_v11  ;;  %v1195_v2 = vmul.f32 %v7509_v39, %v7509_v39 }
 0x2ee   :  { %5648 = vmatmul.mubr.msk.f32.gmra.mrb[44].mxu0 %vm420_vm3, %v1435_v4  ;;  %v1091_v12 = vpop.xlane.xlu1 %1090  ;;  %v1360_v22 = vmul.f32 %v6118_v38, %v1258_v7 }
 0x2ef   :  { %v6120_v5 = vpop.eup %6119  ;;  %v1228_v55 = vsub.f32 %v1160_v6, %v1194_v30  ;;  %v1161_v63 = vmul.f32 0.03125, %v1091_v12  ;;  %v1260_v30 = vsub.f32 %v7185_v50, %v7483_v40 }
 0x2f0   :  { %v924_v51 = vpop.xlane.xlu0 %923  ;;  %v1398_v32 = vmul.f32 %v7400_v8, %v1360_v22  ;;  %v1361_v1 = vmul.f32 %v6120_v5, %v1259_v23  ;;  %v1261_v5 = vsub.f32 %v7181_v18, %v7491_v10 }
 0x2f1   :  { %v1296_v52 = vadd.f32 1e-05, %v1228_v55  ;;  %v1229_v13 = vsub.f32 %v1161_v63, %v1195_v2  ;;  %v7519_v57 = vmul.f32 0.03125, %v924_v51 }
 0x2f2   :  { %v927_v24 = vpop.xlane.xlu1 %926  ;;  %v1436_v48 = vadd.f32 %v7408_v28, %v1398_v32  ;;  %v1399_v11 = vmul.f32 %v7400_v8, %v1361_v1 }
 0x2f3   :  { %6125 = vrsqrt.f32 %v1296_v52  ;;  %v1297_v7 = vadd.f32 1e-05, %v1229_v13  ;;  %v1196_v4 = vmul.f32 %v7519_v57, %v7519_v57  ;;  %v7527_v38 = vmul.f32 0.03125, %v927_v24 }
 0x2f4   :  { %5650 = vmatprep.mubr.msk.f32.mxu0 %vm420_vm3, %v1436_v48  ;;  %v1094_v6 = vpop.xlane.xlu0 %1093  ;;  %v1437_v23 = vadd.f32 %v7408_v28, %v1399_v11 }
 0x2f5   :  { %v6122_v12 = vpop.eup %6121  ;;  %6127 = vrsqrt.f32 %v1297_v7  ;;  %v1162_v22 = vmul.f32 0.03125, %v1094_v6  ;;  %v1197_v40 = vmul.f32 %v7527_v38, %v7527_v38 }
 0x2f6   :  { %5651 = vmatmul.mubr.msk.f32.gmra.mrb[46].mxu0 %vm420_vm3, %v1437_v23  ;;  %v1097_v2 = vpop.xlane.xlu1 %1096  ;;  %v1362_v55 = vmul.f32 %v6122_v12, %v1260_v30 }
 0x2f7   :  { %v6124_v63 = vpop.eup %6123  ;;  %v1230_v51 = vsub.f32 %v1162_v22, %v1196_v4  ;;  %v1163_v32 = vmul.f32 0.03125, %v1097_v2  ;;  %v1262_v4 = vsub.f32 %v7192_v54, %v7501_v62 }
 0x2f8   :  { %v930_v1 = vpop.xlane.xlu0 %929  ;;  %v1400_v52 = vmul.f32 %v7400_v8, %v1362_v55  ;;  %v1363_v13 = vmul.f32 %v6124_v63, %v1261_v5  ;;  %v1263_v63 = vsub.f32 %v7190_v53, %v7509_v39 }
 0x2f9   :  { %v1298_v24 = vadd.f32 1e-05, %v1230_v51  ;;  %v1231_v48 = vsub.f32 %v1163_v32, %v1197_v40  ;;  %v7537_v11 = vmul.f32 0.03125, %v930_v1 }
 0x2fa   :  { %v933_v7 = vpop.xlane.xlu1 %932  ;;  %v1438_v10 = vadd.f32 %v7408_v28, %v1400_v52  ;;  %v1401_v6 = vmul.f32 %v7400_v8, %v1363_v13 }
 0x2fb   :  { %6129 = vrsqrt.f32 %v1298_v24  ;;  %v1299_v30 = vadd.f32 1e-05, %v1231_v48  ;;  %v1198_v23 = vmul.f32 %v7537_v11, %v7537_v11  ;;  %v7545_v12 = vmul.f32 0.03125, %v933_v7 }
 0x2fc   :  { %5653 = vmatprep.mubr.msk.f32.mxu0 %vm420_vm3, %v1438_v10  ;;  %v1100_v22 = vpop.xlane.xlu0 %1099  ;;  %v1439_v5 = vadd.f32 %v7408_v28, %v1401_v6 }
 0x2fd   :  { %v6126_v2 = vpop.eup %6125  ;;  %6131 = vrsqrt.f32 %v1299_v30  ;;  %v1164_v55 = vmul.f32 0.03125, %v1100_v22  ;;  %v1199_v62 = vmul.f32 %v7545_v12, %v7545_v12 }
 0x2fe   :  { %5654 = vmatmul.mubr.msk.f32.gmra.mrb[48].mxu0 %vm420_vm3, %v1439_v5  ;;  %v1103_v40 = vpop.xlane.xlu1 %1102  ;;  %v1364_v51 = vmul.f32 %v6126_v2, %v1262_v4 }
 0x2ff   :  { %v6128_v32 = vpop.eup %6127  ;;  %v1232_v1 = vsub.f32 %v1164_v55, %v1198_v23  ;;  %v1165_v52 = vmul.f32 0.03125, %v1103_v40  ;;  %v1264_v23 = vsub.f32 %v7203_v61, %v7519_v57 }
 0x300   :  { %v936_v13 = vpop.xlane.xlu0 %935  ;;  %v1402_v24 = vmul.f32 %v7400_v8, %v1364_v51  ;;  %v1365_v48 = vmul.f32 %v6128_v32, %v1263_v63  ;;  %v1265_v32 = vsub.f32 %v7199_v59, %v7527_v38 }
 0x301   :  { %v1300_v7 = vadd.f32 1e-05, %v1232_v1  ;;  %v1233_v10 = vsub.f32 %v1165_v52, %v1199_v62  ;;  %v7555_v6 = vmul.f32 0.03125, %v936_v13 }
 0x302   :  { %v939_v30 = vpop.xlane.xlu1 %938  ;;  %v1440_v39 = vadd.f32 %v7408_v28, %v1402_v24  ;;  %v1403_v22 = vmul.f32 %v7400_v8, %v1365_v48 }
 0x303   :  { %6133 = vrsqrt.f32 %v1300_v7  ;;  %v1301_v4 = vadd.f32 1e-05, %v1233_v10  ;;  %v1200_v5 = vmul.f32 %v7555_v6, %v7555_v6  ;;  %v7563_v2 = vmul.f32 0.03125, %v939_v30 }
 0x304   :  { %5656 = vmatprep.mubr.msk.f32.mxu0 %vm420_vm3, %v1440_v39  ;;  %v1106_v55 = vpop.xlane.xlu0 %1105  ;;  %v1441_v63 = vadd.f32 %v7408_v28, %v1403_v22 }
 0x305   :  { %v6130_v40 = vpop.eup %6129  ;;  %6135 = vrsqrt.f32 %v1301_v4  ;;  %v1166_v51 = vmul.f32 0.03125, %v1106_v55  ;;  %v1201_v57 = vmul.f32 %v7563_v2, %v7563_v2 }
 0x306   :  { %5657 = vmatmul.mubr.msk.f32.gmra.mrb[50].mxu0 %vm420_vm3, %v1441_v63  ;;  %v1109_v62 = vpop.xlane.xlu1 %1108  ;;  %v1366_v1 = vmul.f32 %v6130_v40, %v1264_v23 }
 0x307   :  { %v6132_v52 = vpop.eup %6131  ;;  %v1234_v13 = vsub.f32 %v1166_v51, %v1200_v5  ;;  %v1167_v24 = vmul.f32 0.03125, %v1109_v62  ;;  %v1266_v5 = vsub.f32 %v7216_v3, %v7537_v11 }
 0x308   :  { %v942_v48 = vpop.xlane.xlu0 %941  ;;  %v1404_v7 = vmul.f32 %v7400_v8, %v1366_v1  ;;  %v1367_v10 = vmul.f32 %v6132_v52, %v1265_v32  ;;  %v1267_v52 = vsub.f32 %v7208_v0, %v7545_v12 }
 0x309   :  { %v1302_v30 = vadd.f32 1e-05, %v1234_v13  ;;  %v1235_v39 = vsub.f32 %v1167_v24, %v1201_v57  ;;  %v7573_v22 = vmul.f32 0.03125, %v942_v48 }
 0x30a   :  { %v945_v4 = vpop.xlane.xlu1 %944  ;;  %v1442_v38 = vadd.f32 %v7408_v28, %v1404_v7  ;;  %v1405_v55 = vmul.f32 %v7400_v8, %v1367_v10 }
 0x30b   :  { %6137 = vrsqrt.f32 %v1302_v30  ;;  %v1303_v23 = vadd.f32 1e-05, %v1235_v39  ;;  %v1202_v63 = vmul.f32 %v7573_v22, %v7573_v22  ;;  %v7581_v40 = vmul.f32 0.03125, %v945_v4 }
 0x30c   :  { %5659 = vmatprep.mubr.msk.f32.mxu0 %vm420_vm3, %v1442_v38  ;;  %v1112_v51 = vpop.xlane.xlu0 %1111  ;;  %v1443_v32 = vadd.f32 %v7408_v28, %v1405_v55 }
 0x30d   :  { %v6134_v62 = vpop.eup %6133  ;;  %6139 = vrsqrt.f32 %v1303_v23  ;;  %v1168_v1 = vmul.f32 0.03125, %v1112_v51  ;;  %v1203_v11 = vmul.f32 %v7581_v40, %v7581_v40 }
 0x30e   :  { %5660 = vmatmul.mubr.msk.f32.gmra.mrb[52].mxu0 %vm420_vm3, %v1443_v32  ;;  %v1115_v57 = vpop.xlane.xlu1 %1114  ;;  %v1368_v13 = vmul.f32 %v6134_v62, %v1266_v5 }
 0x30f   :  { %v6136_v24 = vpop.eup %6135  ;;  %v1236_v48 = vsub.f32 %v1168_v1, %v1202_v63  ;;  %v1169_v7 = vmul.f32 0.03125, %v1115_v57  ;;  %v1268_v63 = vsub.f32 %v7233_v15, %v7555_v6 }
 0x310   :  { %v948_v10 = vpop.xlane.xlu0 %947  ;;  %v1406_v30 = vmul.f32 %v7400_v8, %v1368_v13  ;;  %v1369_v39 = vmul.f32 %v6136_v24, %v1267_v52  ;;  %v1269_v24 = vsub.f32 %v7223_v9, %v7563_v2 }
 0x311   :  { %v1304_v4 = vadd.f32 1e-05, %v1236_v48  ;;  %v1237_v38 = vsub.f32 %v1169_v7, %v1203_v11  ;;  %v7591_v55 = vmul.f32 0.03125, %v948_v10 }
 0x312   :  { %v951_v23 = vpop.xlane.xlu1 %950  ;;  %v1444_v12 = vadd.f32 %v7408_v28, %v1406_v30  ;;  %v1407_v51 = vmul.f32 %v7400_v8, %v1369_v39 }
 0x313   :  { %6141 = vrsqrt.f32 %v1304_v4  ;;  %v1305_v5 = vadd.f32 1e-05, %v1237_v38  ;;  %v1204_v32 = vmul.f32 %v7591_v55, %v7591_v55  ;;  %v7599_v62 = vmul.f32 0.03125, %v951_v23 }
 0x314   :  { %5662 = vmatprep.mubr.msk.f32.mxu0 %vm420_vm3, %v1444_v12  ;;  %v1118_v1 = vpop.xlane.xlu0 %1117  ;;  %v1445_v52 = vadd.f32 %v7408_v28, %v1407_v51 }
 0x315   :  { %v6138_v57 = vpop.eup %6137  ;;  %6143 = vrsqrt.f32 %v1305_v5  ;;  %v1170_v13 = vmul.f32 0.03125, %v1118_v1  ;;  %v1205_v6 = vmul.f32 %v7599_v62, %v7599_v62 }
 0x316   :  { %5663 = vmatmul.mubr.msk.f32.gmra.mrb[54].mxu0 %vm420_vm3, %v1445_v52  ;;  %v1121_v11 = vpop.xlane.xlu1 %1120  ;;  %v1370_v48 = vmul.f32 %v6138_v57, %v1268_v63 }
 0x317   :  { %v6140_v7 = vpop.eup %6139  ;;  %v1238_v10 = vsub.f32 %v1170_v13, %v1204_v32  ;;  %v1171_v30 = vmul.f32 0.03125, %v1121_v11  ;;  %v1270_v32 = vsub.f32 %v7240_v21, %v7573_v22 }
 0x318   :  { %v954_v39 = vpop.xlane.xlu0 %953  ;;  %v1408_v4 = vmul.f32 %v7400_v8, %v1370_v48  ;;  %v1371_v38 = vmul.f32 %v6140_v7, %v1269_v24  ;;  %v1271_v7 = vsub.f32 %v7238_v17, %v7581_v40 }
 0x319   :  { %v1306_v23 = vadd.f32 1e-05, %v1238_v10  ;;  %v1239_v12 = vsub.f32 %v1171_v30, %v1205_v6  ;;  %v7609_v51 = vmul.f32 0.03125, %v954_v39 }
 0x31a   :  { %v957_v5 = vpop.xlane.xlu1 %956  ;;  %v1446_v2 = vadd.f32 %v7408_v28, %v1408_v4  ;;  %v1409_v1 = vmul.f32 %v7400_v8, %v1371_v38 }
 0x31b   :  { %6145 = vrsqrt.f32 %v1306_v23  ;;  %v1307_v63 = vadd.f32 1e-05, %v1239_v12  ;;  %v1206_v52 = vmul.f32 %v7609_v51, %v7609_v51  ;;  %v7617_v57 = vmul.f32 0.03125, %v957_v5 }
 0x31c   :  { %5665 = vmatprep.mubr.msk.f32.mxu0 %vm420_vm3, %v1446_v2  ;;  %v1124_v13 = vpop.xlane.xlu0 %1123  ;;  %v1447_v24 = vadd.f32 %v7408_v28, %v1409_v1 }
 0x31d   :  { %v6142_v11 = vpop.eup %6141  ;;  %6147 = vrsqrt.f32 %v1307_v63  ;;  %v1172_v48 = vmul.f32 0.03125, %v1124_v13  ;;  %v1207_v22 = vmul.f32 %v7617_v57, %v7617_v57 }
 0x31e   :  { %5666 = vmatmul.mubr.msk.f32.gmra.mrb[56].mxu0 %vm420_vm3, %v1447_v24  ;;  %v1127_v6 = vpop.xlane.xlu1 %1126  ;;  %v1372_v10 = vmul.f32 %v6142_v11, %v1270_v32 }
 0x31f   :  { %v6144_v30 = vpop.eup %6143  ;;  %v1240_v39 = vsub.f32 %v1172_v48, %v1206_v52  ;;  %v1173_v4 = vmul.f32 0.03125, %v1127_v6  ;;  %v1272_v52 = vsub.f32 %v7251_v29, %v7591_v55 }
 0x320   :  { %v960_v38 = vpop.xlane.xlu0 %959  ;;  %v1410_v23 = vmul.f32 %v7400_v8, %v1372_v10  ;;  %v1373_v12 = vmul.f32 %v6144_v30, %v1271_v7  ;;  %v1273_v30 = vsub.f32 %v7247_v26, %v7599_v62 }
 0x321   :  { %v1308_v5 = vadd.f32 1e-05, %v1240_v39  ;;  %v1241_v2 = vsub.f32 %v1173_v4, %v1207_v22  ;;  %v7627_v1 = vmul.f32 0.03125, %v960_v38 }
 0x322   :  { %v963_v63 = vpop.xlane.xlu1 %962  ;;  %v1448_v40 = vadd.f32 %v7408_v28, %v1410_v23  ;;  %v1411_v13 = vmul.f32 %v7400_v8, %v1373_v12 }
 0x323   :  { %6149 = vrsqrt.f32 %v1308_v5  ;;  %v1309_v32 = vadd.f32 1e-05, %v1241_v2  ;;  %v1208_v24 = vmul.f32 %v7627_v1, %v7627_v1  ;;  %v7635_v11 = vmul.f32 0.03125, %v963_v63 }
 0x324   :  { %5668 = vmatprep.mubr.msk.f32.mxu0 %vm420_vm3, %v1448_v40  ;;  %v1130_v48 = vpop.xlane.xlu0 %1129  ;;  %v1449_v7 = vadd.f32 %v7408_v28, %v1411_v13 }
 0x325   :  { %v6146_v6 = vpop.eup %6145  ;;  %6151 = vrsqrt.f32 %v1309_v32  ;;  %v1174_v10 = vmul.f32 0.03125, %v1130_v48  ;;  %v1209_v55 = vmul.f32 %v7635_v11, %v7635_v11 }
 0x326   :  { %5669 = vmatmul.mubr.msk.f32.gmra.mrb[58].mxu0 %vm420_vm3, %v1449_v7  ;;  %v1133_v22 = vpop.xlane.xlu1 %1132  ;;  %v1374_v39 = vmul.f32 %v6146_v6, %v1272_v52 }
 0x327   :  { %v6148_v4 = vpop.eup %6147  ;;  %v1242_v38 = vsub.f32 %v1174_v10, %v1208_v24  ;;  %v1175_v23 = vmul.f32 0.03125, %v1133_v22  ;;  %v1274_v24 = vsub.f32 %v7258_v35, %v7609_v51 }
 0x328   :  { %v966_v12 = vpop.xlane.xlu0 %965  ;;  %v1412_v5 = vmul.f32 %v7400_v8, %v1374_v39  ;;  %v1375_v2 = vmul.f32 %v6148_v4, %v1273_v30  ;;  %v1275_v4 = vsub.f32 %v7256_v34, %v7617_v57 }
 0x329   :  { %v1310_v63 = vadd.f32 1e-05, %v1242_v38  ;;  %v1243_v40 = vsub.f32 %v1175_v23, %v1209_v55  ;;  %v7645_v13 = vmul.f32 0.03125, %v966_v12 }
 0x32a   :  { %v969_v32 = vpop.xlane.xlu1 %968  ;;  %v1450_v62 = vadd.f32 %v7408_v28, %v1412_v5  ;;  %v1413_v48 = vmul.f32 %v7400_v8, %v1375_v2 }
 0x32b   :  { %6153 = vrsqrt.f32 %v1310_v63  ;;  %v1311_v52 = vadd.f32 1e-05, %v1243_v40  ;;  %v1210_v7 = vmul.f32 %v7645_v13, %v7645_v13  ;;  %v7653_v6 = vmul.f32 0.03125, %v969_v32 }
 0x32c   :  { %5671 = vmatprep.mubr.msk.f32.mxu0 %vm420_vm3, %v1450_v62  ;;  %v1136_v10 = vpop.xlane.xlu0 %1135  ;;  %v1451_v30 = vadd.f32 %v7408_v28, %v1413_v48 }
 0x32d   :  { %v6150_v22 = vpop.eup %6149  ;;  %6155 = vrsqrt.f32 %v1311_v52  ;;  %v1176_v39 = vmul.f32 0.03125, %v1136_v10  ;;  %v1211_v51 = vmul.f32 %v7653_v6, %v7653_v6 }
 0x32e   :  { %5672 = vmatmul.mubr.msk.f32.gmra.mrb[60].mxu0 %vm420_vm3, %v1451_v30  ;;  %v1139_v55 = vpop.xlane.xlu1 %1138  ;;  %v1376_v38 = vmul.f32 %v6150_v22, %v1274_v24  ;;  %v1276_v22 = vsub.f32 %v7269_v45, %v7627_v1 }
 0x32f   :  { %v6152_v23 = vpop.eup %6151  ;;  %v1244_v12 = vsub.f32 %v1176_v39, %v1210_v7  ;;  %v1177_v5 = vmul.f32 0.03125, %v1139_v55 }
 0x330   :  { %v972_v2 = vpop.xlane.xlu0 %971  ;;  %v1414_v63 = vmul.f32 %v7400_v8, %v1376_v38  ;;  %v1377_v40 = vmul.f32 %v6152_v23, %v1275_v4  ;;  %v1277_v23 = vsub.f32 %v7265_v42, %v7635_v11  ;;  %v1278_v11 = vsub.f32 %v7276_v49, %v7645_v13 }
 0x331   :  { %v1312_v32 = vadd.f32 1e-05, %v1244_v12  ;;  %v1245_v62 = vsub.f32 %v1177_v5, %v1211_v51  ;;  %v1008_v48 = vmul.f32 0.03125, %v972_v2 }
 0x332   :  { %v975_v52 = vpop.xlane.xlu1 %974  ;;  %v1452_v57 = vadd.f32 %v7408_v28, %v1414_v63  ;;  %v1415_v10 = vmul.f32 %v7400_v8, %v1377_v40 }
 0x333   :  { %6157 = vrsqrt.f32 %v1312_v32  ;;  %v1313_v24 = vadd.f32 1e-05, %v1245_v62  ;;  %v1212_v30 = vmul.f32 %v1008_v48, %v1008_v48  ;;  %v1009_v7 = vmul.f32 0.03125, %v975_v52 }
 0x334   :  { %5674 = vmatprep.mubr.msk.f32.mxu0 %vm420_vm3, %v1452_v57  ;;  %v1142_v39 = vpop.xlane.xlu0 %1141  ;;  %v1453_v4 = vadd.f32 %v7408_v28, %v1415_v10 }
 0x335   :  { %v6154_v55 = vpop.eup %6153  ;;  %6159 = vrsqrt.f32 %v1313_v24  ;;  %v1178_v38 = vmul.f32 0.03125, %v1142_v39  ;;  %v1213_v2 = vmul.f32 %v1009_v7, %v1009_v7  ;;  %v2049_v39 = vld [vmem:[%s9216_s6 + $0x30] sm:$0xff] }
 0x336   :  { %5675 = vmatmul.mubr.msk.f32.gmra.mrb[62].mxu0 %vm420_vm3, %v1453_v4  ;;  %v1145_v51 = vpop.xlane.xlu1 %1144  ;;  %v1378_v12 = vmul.f32 %v6154_v55, %v1276_v22  ;;  %v2050_v4 = vld [vmem:[%s9216_s6 + $0x38] sm:$0xff]  ;;  %v1279_v55 = vsub.f32 %v7274_v16, %v7653_v6 }
 0x337   :  { %v6156_v5 = vpop.eup %6155  ;;  %v1246_v63 = vsub.f32 %v1178_v38, %v1212_v30  ;;  %v1179_v1 = vmul.f32 0.03125, %v1145_v51  ;;  %v6045_v38 = vpack.c.bf16 %v2050_v4, %v2049_v39 }
 0x338   :  { %v1416_v40 = vmul.f32 %v7400_v8, %v1378_v12  ;;  %v1379_v32 = vmul.f32 %v6156_v5, %v1277_v23 }
 0x339   :  { %v1314_v62 = vadd.f32 1e-05, %v1246_v63  ;;  %v1247_v52 = vsub.f32 %v1179_v1, %v1213_v2  ;;  %6046 = vmatprep.subr.bf16.mxu1 %v6045_v38  ;;  %v1280_v63 = vsub.f32 %v7287_v60, %v1008_v48 }
 0x33a   :  { %v1454_v57 = vadd.f32 %v7408_v28, %v1416_v40  ;;  %v1417_v10 = vmul.f32 %v7400_v8, %v1379_v32  ;;  %6048 = vmatpush3.bf16.msra.mxu1 %v6045_v38  ;;  %v1281_v40 = vsub.f32 %v7283_v56, %v1009_v7 }
 0x33b   :  { %6161 = vrsqrt.f32 %v1314_v62  ;;  %v1315_v24 = vadd.f32 1e-05, %v1247_v52 }
 0x33c   :  { %5677 = vmatprep.mubr.msk.f32.mxu0 %vm420_vm3, %v1454_v57  ;;  %v1455_v22 = vadd.f32 %v7408_v28, %v1417_v10 }
 0x33d   :  { %v6158_v30 = vpop.eup %6157  ;;  %6163 = vrsqrt.f32 %v1315_v24 }
 0x33e   :  { %5678 = vmatmul.mubr.msk.f32.gmra.mrb[64].mxu0 %vm420_vm3, %v1455_v22  ;;  %v1380_v13 = vmul.f32 %v6158_v30, %v1278_v11  ;;  %v1466_v11 = vsub.s32 2, %v7379_v14 }
 0x33f   :  { %v6160_v23 = vpop.eup %6159 }
 0x340   :  { %v1418_v51 = vmul.f32 %v7400_v8, %v1380_v13  ;;  %v1381_v12 = vmul.f32 %v6160_v23, %v1279_v55  ;;  %v7706_v7 = vrot.slane %v7389_v58, %v1466_v11 }
 0x342   :  { %v1456_v5 = vadd.f32 %v7408_v28, %v1418_v51  ;;  %v1419_v2 = vmul.f32 %v7400_v8, %v1381_v12 }
 0x344   :  { %5680 = vmatprep.mubr.msk.f32.mxu0 %vm420_vm3, %v1456_v5  ;;  %v1457_v6 = vadd.f32 %v7408_v28, %v1419_v2 }
 0x345   :  { %v6162_v1 = vpop.eup %6161 }
 0x346   :  { %5681 = vmatmul.mubr.msk.f32.gmra.mrb[66].mxu0 %vm420_vm3, %v1457_v6  ;;  %v1382_v32 = vmul.f32 %v6162_v1, %v1280_v63 }
 0x347   :  { %v6164_v62 = vpop.eup %6163 }
 0x348   :  { %v1420_v52 = vmul.f32 %v7400_v8, %v1382_v32  ;;  %v1383_v57 = vmul.f32 %v6164_v62, %v1281_v40 }
 0x34a   :  { %v1458_v10 = vadd.f32 %v7408_v28, %v1420_v52  ;;  %v1421_v24 = vmul.f32 %v7400_v8, %v1383_v57 }
 0x34c   :  { %5683 = vmatprep.mubr.msk.f32.mxu0 %vm420_vm3, %v1458_v10  ;;  %v1459_v48 = vadd.f32 %v7408_v28, %v1421_v24 }
 0x34e   :  { %5684 = vmatmul.mubr.msk.f32.gmra.mrb[68].mxu0 %vm420_vm3, %v1459_v48 }
 0x3a2   :  { %v5637_v22 = vpop.f32.mrb[36].mxu0 }
 0x3a3   :  { %v1642_v30 = vadd.f32 %v5637_v22, %v7706_v7  ;;  %v1636_v39 = vpop.f32.mrb[37].mxu0 }
 0x3a4   :  { %v1637_v4 = vadd.f32 %v1636_v39, %v7706_v7 }
 0x3a5   :  { %v4871_v8 = vmul.f32 -1.442695, %v1642_v30 }
 0x3a6   :  { %v4870_v55 = vmul.f32 -1.442695, %v1637_v4 }
 0x3a7   :  { %6165 = vpow2.f32 %v4871_v8 }
 0x3a8   :  { %6167 = vpow2.f32 %v4870_v55 }
 0x3a9   :  { %v5640_v28 = vpop.f32.mrb[38].mxu0 }
 0x3aa   :  { %v7711_v13 = vadd.f32 %v5640_v28, %v7706_v7  ;;  %v1646_v38 = vpop.f32.mrb[39].mxu0 }
 0x3ab   :  { %v1647_v23 = vadd.f32 %v1646_v38, %v7706_v7 }
 0x3ac   :  { %v4873_v58 = vmul.f32 -1.442695, %v7711_v13 }
 0x3ad   :  { %v4872_v51 = vmul.f32 -1.442695, %v1647_v23 }
 0x3ae   :  { %6169 = vpow2.f32 %v4873_v58 }
 0x3af   :  { %6171 = vpow2.f32 %v4872_v51 }
 0x3b1   :  { %v6166_v12 = vpop.eup %6165  ;;  %v5643_v5 = vpop.f32.mrb[40].mxu0 }
 0x3b2   :  { %v6168_v2 = vpop.eup %6167  ;;  %v1908_v63 = vadd.f32 1.0, %v6166_v12  ;;  %v7716_v6 = vadd.f32 %v5643_v5, %v7706_v7  ;;  %v1656_v1 = vpop.f32.mrb[41].mxu0 }
 0x3b3   :  { %v1907_v40 = vadd.f32 1.0, %v6168_v2  ;;  %v7719_v32 = vadd.f32 %v1656_v1, %v7706_v7 }
 0x3b4   :  { %6173 = vrcp.f32 %v1908_v63  ;;  %v4875_v62 = vmul.f32 -1.442695, %v7716_v6 }
 0x3b5   :  { %6175 = vrcp.f32 %v1907_v40  ;;  %v4874_v52 = vmul.f32 -1.442695, %v7719_v32 }
 0x3b6   :  { %6177 = vpow2.f32 %v4875_v62 }
 0x3b7   :  { %6179 = vpow2.f32 %v4874_v52 }
 0x3b8   :  { %v6170_v57 = vpop.eup %6169 }
 0x3b9   :  { %v6172_v10 = vpop.eup %6171  ;;  %v1910_v24 = vadd.f32 1.0, %v6170_v57  ;;  %v5646_v48 = vpop.f32.mrb[42].mxu0 }
 0x3ba   :  { %v1909_v22 = vadd.f32 1.0, %v6172_v10  ;;  %v7724_v39 = vadd.f32 %v5646_v48, %v7706_v7  ;;  %v1666_v8 = vpop.f32.mrb[43].mxu0  ;;  %v2427_v10 = vld [vmem:[%s9217_s7] sm:$0xff] }
 0x3bb   :  { %6181 = vrcp.f32 %v1910_v24  ;;  %v7727_v55 = vadd.f32 %v1666_v8, %v7706_v7  ;;  %v2428_v24 = vld [vmem:[%s9217_s7 + $0x8] sm:$0xff] }
 0x3bc   :  { %6183 = vrcp.f32 %v1909_v22  ;;  %v4877_v28 = vmul.f32 -1.442695, %v7724_v39 }
 0x3bd   :  { %v4876_v38 = vmul.f32 -1.442695, %v7727_v55 }
 0x3be   :  { %v6174_v58 = vpop.eup %6173  ;;  %6185 = vpow2.f32 %v4877_v28 }
 0x3bf   :  { %v6176_v51 = vpop.eup %6175  ;;  %6187 = vpow2.f32 %v4876_v38  ;;  %v2010_v63 = vmul.f32 %v6174_v58, %v1642_v30 }
 0x3c0   :  { %v6178_v12 = vpop.eup %6177  ;;  %v2009_v5 = vmul.f32 %v6176_v51, %v1637_v4  ;;  %v6049_v4 = vpack.c.bf16 %v2428_v24, %v2427_v10 }
 0x3c1   :  { %v6180_v2 = vpop.eup %6179  ;;  %v1912_v1 = vadd.f32 1.0, %v6178_v12  ;;  %v5649_v40 = vpop.f32.mrb[44].mxu0 }
 0x3c2   :  { %v1911_v62 = vadd.f32 1.0, %v6180_v2  ;;  %v7732_v52 = vadd.f32 %v5649_v40, %v7706_v7  ;;  %v1676_v57 = vpop.f32.mrb[45].mxu0  ;;  %5702 = vmatprep.mubr.msk.f32.mxu1 %vm2055_vm5, %v2009_v5  ;;  %6050 = vmatprep.subr.bf16.mxu0 %v6049_v4 }
 0x3c3   :  { %6189 = vrcp.f32 %v1912_v1  ;;  %v7742_v30 = vadd.f32 %v1676_v57, %v7706_v7  ;;  %5703 = vmatmul.mubr.msk.f32.vlgmr.msra.gmra.mrb[36].mxu1 %vm2055_vm5, %v2010_v63  ;;  %6052 = vmatpush3.bf16.msra.mxu0 %v6049_v4 }
 0x3c4   :  { %6191 = vrcp.f32 %v1911_v62  ;;  %v4879_v48 = vmul.f32 -1.442695, %v7732_v52 }
 0x3c5   :  { %v6182_v22 = vpop.eup %6181  ;;  %v4878_v8 = vmul.f32 -1.442695, %v7742_v30 }
 0x3c6   :  { %v6184_v28 = vpop.eup %6183  ;;  %6193 = vpow2.f32 %v4879_v48  ;;  %v2012_v51 = vmul.f32 %v6182_v22, %v7711_v13 }
 0x3c7   :  { %v2011_v38 = vmul.f32 %v6184_v28, %v1647_v23  ;;  %6195 = vpow2.f32 %v4878_v8 }
 0x3c8   :  { %v6186_v58 = vpop.eup %6185 }
 0x3c9   :  { %v6188_v12 = vpop.eup %6187  ;;  %v1914_v5 = vadd.f32 1.0, %v6186_v58  ;;  %v5652_v2 = vpop.f32.mrb[46].mxu0  ;;  %5705 = vmatprep.mubr.msk.f32.mxu1 %vm2055_vm5, %v2011_v38 }
 0x3ca   :  { %v1913_v63 = vadd.f32 1.0, %v6188_v12  ;;  %v7750_v1 = vadd.f32 %v5652_v2, %v7706_v7  ;;  %v1686_v40 = vpop.f32.mrb[47].mxu0  ;;  %5706 = vmatmul.mubr.msk.f32.gmra.mrb[38].mxu1 %vm2055_vm5, %v2012_v51 }
 0x3cb   :  { %6197 = vrcp.f32 %v1914_v5  ;;  %v7754_v62 = vadd.f32 %v1686_v40, %v7706_v7 }
 0x3cc   :  { %6199 = vrcp.f32 %v1913_v63  ;;  %v4881_v23 = vmul.f32 -1.442695, %v7750_v1 }
 0x3cd   :  { %v6190_v13 = vpop.eup %6189  ;;  %v4880_v57 = vmul.f32 -1.442695, %v7754_v62 }
 0x3ce   :  { %v6192_v10 = vpop.eup %6191  ;;  %6201 = vpow2.f32 %v4881_v23  ;;  %v2014_v48 = vmul.f32 %v6190_v13, %v7716_v6 }
 0x3cf   :  { %v2013_v24 = vmul.f32 %v6192_v10, %v7719_v32  ;;  %6203 = vpow2.f32 %v4880_v57 }
 0x3d0   :  { %v6194_v4 = vpop.eup %6193 }
 0x3d1   :  { %v6196_v22 = vpop.eup %6195  ;;  %v1916_v8 = vadd.f32 1.0, %v6194_v4  ;;  %v5655_v28 = vpop.f32.mrb[48].mxu0  ;;  %5708 = vmatprep.mubr.msk.f32.mxu1 %vm2055_vm5, %v2013_v24 }
 0x3d2   :  { %v1915_v38 = vadd.f32 1.0, %v6196_v22  ;;  %v7762_v58 = vadd.f32 %v5655_v28, %v7706_v7  ;;  %v1696_v51 = vpop.f32.mrb[49].mxu0  ;;  %5709 = vmatmul.mubr.msk.f32.gmra.mrb[40].mxu1 %vm2055_vm5, %v2014_v48 }
 0x3d3   :  { %6205 = vrcp.f32 %v1916_v8  ;;  %v7766_v12 = vadd.f32 %v1696_v51, %v7706_v7 }
 0x3d4   :  { %6207 = vrcp.f32 %v1915_v38  ;;  %v4883_v32 = vmul.f32 -1.442695, %v7762_v58 }
 0x3d5   :  { %v6198_v6 = vpop.eup %6197  ;;  %v4882_v5 = vmul.f32 -1.442695, %v7766_v12 }
 0x3d6   :  { %v6200_v2 = vpop.eup %6199  ;;  %6209 = vpow2.f32 %v4883_v32  ;;  %v2016_v23 = vmul.f32 %v6198_v6, %v7724_v39 }
 0x3d7   :  { %v2015_v63 = vmul.f32 %v6200_v2, %v7727_v55  ;;  %6211 = vpow2.f32 %v4882_v5 }
 0x3d8   :  { %v6202_v40 = vpop.eup %6201 }
 0x3d9   :  { %v6204_v13 = vpop.eup %6203  ;;  %v1918_v57 = vadd.f32 1.0, %v6202_v40  ;;  %v5658_v10 = vpop.f32.mrb[50].mxu0  ;;  %5711 = vmatprep.mubr.msk.f32.mxu1 %vm2055_vm5, %v2015_v63 }
 0x3da   :  { %v1917_v24 = vadd.f32 1.0, %v6204_v13  ;;  %v7774_v4 = vadd.f32 %v5658_v10, %v7706_v7  ;;  %v1706_v48 = vpop.f32.mrb[51].mxu0  ;;  %5712 = vmatmul.mubr.msk.f32.gmra.mrb[42].mxu1 %vm2055_vm5, %v2016_v23 }
 0x3db   :  { %6213 = vrcp.f32 %v1918_v57  ;;  %v7778_v22 = vadd.f32 %v1706_v48, %v7706_v7 }
 0x3dc   :  { %6215 = vrcp.f32 %v1917_v24  ;;  %v4885_v55 = vmul.f32 -1.442695, %v7774_v4 }
 0x3dd   :  { %v6206_v39 = vpop.eup %6205  ;;  %v4884_v8 = vmul.f32 -1.442695, %v7778_v22 }
 0x3de   :  { %v6208_v28 = vpop.eup %6207  ;;  %6217 = vpow2.f32 %v4885_v55  ;;  %v2018_v32 = vmul.f32 %v6206_v39, %v7732_v52 }
 0x3df   :  { %v2017_v38 = vmul.f32 %v6208_v28, %v7742_v30  ;;  %6219 = vpow2.f32 %v4884_v8 }
 0x3e0   :  { %v6210_v51 = vpop.eup %6209 }
 0x3e1   :  { %v6212_v6 = vpop.eup %6211  ;;  %v1920_v5 = vadd.f32 1.0, %v6210_v51  ;;  %v5661_v2 = vpop.f32.mrb[52].mxu0  ;;  %5714 = vmatprep.mubr.msk.f32.mxu1 %vm2055_vm5, %v2017_v38 }
 0x3e2   :  { %v1919_v63 = vadd.f32 1.0, %v6212_v6  ;;  %v7786_v40 = vadd.f32 %v5661_v2, %v7706_v7  ;;  %v1716_v23 = vpop.f32.mrb[53].mxu0  ;;  %5715 = vmatmul.mubr.msk.f32.gmra.mrb[44].mxu1 %vm2055_vm5, %v2018_v32 }
 0x3e3   :  { %6221 = vrcp.f32 %v1920_v5  ;;  %v7790_v13 = vadd.f32 %v1716_v23, %v7706_v7 }
 0x3e4   :  { %6223 = vrcp.f32 %v1919_v63  ;;  %v4887_v30 = vmul.f32 -1.442695, %v7786_v40 }
 0x3e5   :  { %v6214_v52 = vpop.eup %6213  ;;  %v4886_v57 = vmul.f32 -1.442695, %v7790_v13 }
 0x3e6   :  { %v6216_v10 = vpop.eup %6215  ;;  %6225 = vpow2.f32 %v4887_v30  ;;  %v2020_v55 = vmul.f32 %v6214_v52, %v7750_v1 }
 0x3e7   :  { %v2019_v24 = vmul.f32 %v6216_v10, %v7754_v62  ;;  %6227 = vpow2.f32 %v4886_v57 }
 0x3e8   :  { %v6218_v48 = vpop.eup %6217 }
 0x3e9   :  { %v6220_v39 = vpop.eup %6219  ;;  %v1922_v8 = vadd.f32 1.0, %v6218_v48  ;;  %v5664_v28 = vpop.f32.mrb[54].mxu0  ;;  %5717 = vmatprep.mubr.msk.f32.mxu1 %vm2055_vm5, %v2019_v24 }
 0x3ea   :  { %v1921_v38 = vadd.f32 1.0, %v6220_v39  ;;  %v7798_v51 = vadd.f32 %v5664_v28, %v7706_v7  ;;  %v1726_v32 = vpop.f32.mrb[55].mxu0  ;;  %5718 = vmatmul.mubr.msk.f32.gmra.mrb[46].mxu1 %vm2055_vm5, %v2020_v55 }
 0x3eb   :  { %6229 = vrcp.f32 %v1922_v8  ;;  %v7802_v6 = vadd.f32 %v1726_v32, %v7706_v7 }
 0x3ec   :  { %6231 = vrcp.f32 %v1921_v38  ;;  %v4889_v62 = vmul.f32 -1.442695, %v7798_v51 }
 0x3ed   :  { %v6222_v1 = vpop.eup %6221  ;;  %v4888_v5 = vmul.f32 -1.442695, %v7802_v6 }
 0x3ee   :  { %v6224_v2 = vpop.eup %6223  ;;  %6233 = vpow2.f32 %v4889_v62  ;;  %v2022_v30 = vmul.f32 %v6222_v1, %v7762_v58 }
 0x3ef   :  { %v2021_v63 = vmul.f32 %v6224_v2, %v7766_v12  ;;  %6235 = vpow2.f32 %v4888_v5 }
 0x3f0   :  { %v6226_v23 = vpop.eup %6225 }
 0x3f1   :  { %v6228_v52 = vpop.eup %6227  ;;  %v1924_v57 = vadd.f32 1.0, %v6226_v23  ;;  %v5667_v10 = vpop.f32.mrb[56].mxu0  ;;  %5720 = vmatprep.mubr.msk.f32.mxu1 %vm2055_vm5, %v2021_v63 }
 0x3f2   :  { %v1923_v24 = vadd.f32 1.0, %v6228_v52  ;;  %v7810_v48 = vadd.f32 %v5667_v10, %v7706_v7  ;;  %v1736_v55 = vpop.f32.mrb[57].mxu0  ;;  %5721 = vmatmul.mubr.msk.f32.gmra.mrb[48].mxu1 %vm2055_vm5, %v2022_v30 }
 0x3f3   :  { %6237 = vrcp.f32 %v1924_v57  ;;  %v7814_v39 = vadd.f32 %v1736_v55, %v7706_v7 }
 0x3f4   :  { %6239 = vrcp.f32 %v1923_v24  ;;  %v4891_v12 = vmul.f32 -1.442695, %v7810_v48 }
 0x3f5   :  { %v6230_v58 = vpop.eup %6229  ;;  %v4890_v8 = vmul.f32 -1.442695, %v7814_v39 }
 0x3f6   :  { %v6232_v28 = vpop.eup %6231  ;;  %6241 = vpow2.f32 %v4891_v12  ;;  %v2024_v62 = vmul.f32 %v6230_v58, %v7774_v4 }
 0x3f7   :  { %v2023_v38 = vmul.f32 %v6232_v28, %v7778_v22  ;;  %6243 = vpow2.f32 %v4890_v8 }
 0x3f8   :  { %v6234_v32 = vpop.eup %6233 }
 0x3f9   :  { %v6236_v1 = vpop.eup %6235  ;;  %v1926_v5 = vadd.f32 1.0, %v6234_v32  ;;  %v5670_v2 = vpop.f32.mrb[58].mxu0  ;;  %5723 = vmatprep.mubr.msk.f32.mxu1 %vm2055_vm5, %v2023_v38 }
 0x3fa   :  { %v1925_v63 = vadd.f32 1.0, %v6236_v1  ;;  %v7822_v23 = vadd.f32 %v5670_v2, %v7706_v7  ;;  %v1746_v30 = vpop.f32.mrb[59].mxu0  ;;  %5724 = vmatmul.mubr.msk.f32.gmra.mrb[50].mxu1 %vm2055_vm5, %v2024_v62 }
 0x3fb   :  { %6245 = vrcp.f32 %v1926_v5  ;;  %v7826_v52 = vadd.f32 %v1746_v30, %v7706_v7 }
 0x3fc   :  { %6247 = vrcp.f32 %v1925_v63  ;;  %v4893_v22 = vmul.f32 -1.442695, %v7822_v23 }
 0x3fd   :  { %v6238_v4 = vpop.eup %6237  ;;  %v4892_v57 = vmul.f32 -1.442695, %v7826_v52 }
 0x3fe   :  { %v6240_v10 = vpop.eup %6239  ;;  %6249 = vpow2.f32 %v4893_v22  ;;  %v2026_v12 = vmul.f32 %v6238_v4, %v7786_v40 }
 0x3ff   :  { %v2025_v24 = vmul.f32 %v6240_v10, %v7790_v13  ;;  %6251 = vpow2.f32 %v4892_v57 }
 0x400   :  { %v6242_v55 = vpop.eup %6241 }
 0x401   :  { %v6244_v58 = vpop.eup %6243  ;;  %v1928_v8 = vadd.f32 1.0, %v6242_v55  ;;  %v5673_v28 = vpop.f32.mrb[60].mxu0  ;;  %5726 = vmatprep.mubr.msk.f32.mxu1 %vm2055_vm5, %v2025_v24 }
 0x402   :  { %v1927_v38 = vadd.f32 1.0, %v6244_v58  ;;  %v7834_v32 = vadd.f32 %v5673_v28, %v7706_v7  ;;  %v1756_v62 = vpop.f32.mrb[61].mxu0  ;;  %5727 = vmatmul.mubr.msk.f32.gmra.mrb[52].mxu1 %vm2055_vm5, %v2026_v12 }
 0x403   :  { %6253 = vrcp.f32 %v1928_v8  ;;  %v7838_v1 = vadd.f32 %v1756_v62, %v7706_v7 }
 0x404   :  { %6255 = vrcp.f32 %v1927_v38  ;;  %v4895_v13 = vmul.f32 -1.442695, %v7834_v32 }
 0x405   :  { %v6246_v40 = vpop.eup %6245  ;;  %v4894_v5 = vmul.f32 -1.442695, %v7838_v1 }
 0x406   :  { %v6248_v2 = vpop.eup %6247  ;;  %6257 = vpow2.f32 %v4895_v13  ;;  %v2028_v22 = vmul.f32 %v6246_v40, %v7798_v51 }
 0x407   :  { %v2027_v63 = vmul.f32 %v6248_v2, %v7802_v6  ;;  %6259 = vpow2.f32 %v4894_v5 }
 0x408   :  { %v6250_v30 = vpop.eup %6249 }
 0x409   :  { %v6252_v4 = vpop.eup %6251  ;;  %v1930_v57 = vadd.f32 1.0, %v6250_v30  ;;  %v5676_v10 = vpop.f32.mrb[62].mxu0  ;;  %5729 = vmatprep.mubr.msk.f32.mxu1 %vm2055_vm5, %v2027_v63 }
 0x40a   :  { %v1929_v24 = vadd.f32 1.0, %v6252_v4  ;;  %v7846_v55 = vadd.f32 %v5676_v10, %v7706_v7  ;;  %v1766_v12 = vpop.f32.mrb[63].mxu0  ;;  %5730 = vmatmul.mubr.msk.f32.gmra.mrb[54].mxu1 %vm2055_vm5, %v2028_v22 }
 0x40b   :  { %6261 = vrcp.f32 %v1930_v57  ;;  %v7850_v58 = vadd.f32 %v1766_v12, %v7706_v7  ;;  %v2429_v12 = vld [vmem:[%s9217_s7 + $0x10] sm:$0xff] }
 0x40c   :  { %6263 = vrcp.f32 %v1929_v24  ;;  %v4897_v6 = vmul.f32 -1.442695, %v7846_v55 }
 0x40d   :  { %v6254_v51 = vpop.eup %6253  ;;  %v4896_v8 = vmul.f32 -1.442695, %v7850_v58 }
 0x40e   :  { %v6256_v28 = vpop.eup %6255  ;;  %6265 = vpow2.f32 %v4897_v6  ;;  %v2030_v13 = vmul.f32 %v6254_v51, %v7810_v48  ;;  %v2430_v6 = vld [vmem:[%s9217_s7 + $0x18] sm:$0xff] }
 0x40f   :  { %v2029_v38 = vmul.f32 %v6256_v28, %v7814_v39  ;;  %6267 = vpow2.f32 %v4896_v8  ;;  %v6053_v28 = vpack.c.bf16 %v2430_v6, %v2429_v12 }
 0x410   :  { %v6258_v62 = vpop.eup %6257 }
 0x411   :  { %v6260_v40 = vpop.eup %6259  ;;  %v1932_v5 = vadd.f32 1.0, %v6258_v62  ;;  %v5679_v2 = vpop.f32.mrb[64].mxu0  ;;  %5732 = vmatprep.mubr.msk.f32.mxu1 %vm2055_vm5, %v2029_v38  ;;  %6054 = vmatprep.subr.bf16.mxu0 %v6053_v28 }
 0x412   :  { %v1931_v63 = vadd.f32 1.0, %v6260_v40  ;;  %v7858_v30 = vadd.f32 %v5679_v2, %v7706_v7  ;;  %v1776_v22 = vpop.f32.mrb[65].mxu0  ;;  %5733 = vmatmul.mubr.msk.f32.gmra.mrb[56].mxu1 %vm2055_vm5, %v2030_v13  ;;  %6056 = vmatpush3.bf16.msra.mxu0 %v6053_v28 }
 0x413   :  { %6269 = vrcp.f32 %v1932_v5  ;;  %v7862_v4 = vadd.f32 %v1776_v22, %v7706_v7 }
 0x414   :  { %6271 = vrcp.f32 %v1931_v63  ;;  %v4899_v39 = vmul.f32 -1.442695, %v7858_v30 }
 0x415   :  { %v6262_v48 = vpop.eup %6261  ;;  %v4898_v57 = vmul.f32 -1.442695, %v7862_v4 }
 0x416   :  { %v6264_v10 = vpop.eup %6263  ;;  %6273 = vpow2.f32 %v4899_v39  ;;  %v2032_v8 = vmul.f32 %v6262_v48, %v7822_v23 }
 0x417   :  { %v2031_v24 = vmul.f32 %v6264_v10, %v7826_v52  ;;  %6275 = vpow2.f32 %v4898_v57 }
 0x418   :  { %v6266_v51 = vpop.eup %6265 }
 0x419   :  { %v6268_v38 = vpop.eup %6267  ;;  %v1934_v62 = vadd.f32 1.0, %v6266_v51  ;;  %v5682_v13 = vpop.f32.mrb[66].mxu0  ;;  %5735 = vmatprep.mubr.msk.f32.mxu1 %vm2055_vm5, %v2031_v24 }
 0x41a   :  { %v1933_v40 = vadd.f32 1.0, %v6268_v38  ;;  %v1792_v52 = vadd.f32 %v5682_v13, %v7706_v7  ;;  %v1786_v5 = vpop.f32.mrb[67].mxu0  ;;  %5736 = vmatmul.mubr.msk.f32.gmra.mrb[58].mxu1 %vm2055_vm5, %v2032_v8 }
 0x41b   :  { %6277 = vrcp.f32 %v1934_v62  ;;  %v1787_v2 = vadd.f32 %v1786_v5, %v7706_v7 }
 0x41c   :  { %6279 = vrcp.f32 %v1933_v40  ;;  %v4901_v63 = vmul.f32 -1.442695, %v1792_v52 }
 0x41d   :  { %v6270_v23 = vpop.eup %6269  ;;  %v4900_v22 = vmul.f32 -1.442695, %v1787_v2 }
 0x41e   :  { %v6272_v39 = vpop.eup %6271  ;;  %6281 = vpow2.f32 %v4901_v63  ;;  %v2034_v10 = vmul.f32 %v6270_v23, %v7834_v32 }
 0x41f   :  { %v2033_v48 = vmul.f32 %v6272_v39, %v7838_v1  ;;  %6283 = vpow2.f32 %v4900_v22 }
 0x420   :  { %v6274_v57 = vpop.eup %6273 }
 0x421   :  { %v6276_v24 = vpop.eup %6275  ;;  %v1936_v12 = vadd.f32 1.0, %v6274_v57  ;;  %v5685_v6 = vpop.f32.mrb[68].mxu0  ;;  %5738 = vmatprep.mubr.msk.f32.mxu1 %vm2055_vm5, %v2033_v48 }
 0x422   :  { %v1935_v51 = vadd.f32 1.0, %v6276_v24  ;;  %v1802_v8 = vadd.f32 %v5685_v6, %v7706_v7  ;;  %v1796_v28 = vpop.f32.mrb[69].mxu0  ;;  %5739 = vmatmul.mubr.msk.f32.gmra.mrb[60].mxu1 %vm2055_vm5, %v2034_v10 }
 0x423   :  { %6285 = vrcp.f32 %v1936_v12  ;;  %v1797_v38 = vadd.f32 %v1796_v28, %v7706_v7 }
 0x424   :  { %6287 = vrcp.f32 %v1935_v51  ;;  %v4903_v1 = vmul.f32 -1.442695, %v1802_v8 }
 0x425   :  { %v6278_v62 = vpop.eup %6277  ;;  %v4902_v13 = vmul.f32 -1.442695, %v1797_v38 }
 0x426   :  { %v6280_v40 = vpop.eup %6279  ;;  %6289 = vpow2.f32 %v4903_v1  ;;  %v2036_v63 = vmul.f32 %v6278_v62, %v7846_v55 }
 0x427   :  { %v2035_v32 = vmul.f32 %v6280_v40, %v7850_v58  ;;  %6291 = vpow2.f32 %v4902_v13  ;;  %v9224_v40 = vsub.s32 3, %v7379_v14 }
 0x428   :  { %v6282_v5 = vpop.eup %6281 }
 0x429   :  { %v6284_v23 = vpop.eup %6283  ;;  %v1938_v22 = vadd.f32 1.0, %v6282_v5  ;;  %5741 = vmatprep.mubr.msk.f32.mxu1 %vm2055_vm5, %v2035_v32  ;;  %v6505_v32 = vld [vmem:[%s9214_s4] sm:$0xf] }
 0x42a   :  { %v1937_v39 = vadd.f32 1.0, %v6284_v23  ;;  %5742 = vmatmul.mubr.msk.f32.gmra.mrb[62].mxu1 %vm2055_vm5, %v2036_v63 }
 0x42b   :  { %6293 = vrcp.f32 %v1938_v22 }
 0x42c   :  { %6295 = vrcp.f32 %v1937_v39 }
 0x42d   :  { %v6286_v7 = vpop.eup %6285 }
 0x42e   :  { %v6288_v48 = vpop.eup %6287  ;;  %v2038_v58 = vmul.f32 %v6286_v7, %v7858_v30 }
 0x42f   :  { %v2037_v57 = vmul.f32 %v6288_v48, %v7862_v4 }
 0x430   :  { %v6290_v10 = vpop.eup %6289 }
 0x431   :  { %v6292_v24 = vpop.eup %6291  ;;  %v1940_v12 = vadd.f32 1.0, %v6290_v10  ;;  %5744 = vmatprep.mubr.msk.f32.mxu1 %vm2055_vm5, %v2037_v57 }
 0x432   :  { %v1939_v55 = vadd.f32 1.0, %v6292_v24  ;;  %5745 = vmatmul.mubr.msk.f32.gmra.mrb[64].mxu1 %vm2055_vm5, %v2038_v58 }
 0x433   :  { %6297 = vrcp.f32 %v1940_v12 }
 0x434   :  { %6299 = vrcp.f32 %v1939_v55 }
 0x435   :  { %v6294_v6 = vpop.eup %6293 }
 0x436   :  { %v6296_v51 = vpop.eup %6295  ;;  %v2040_v1 = vmul.f32 %v6294_v6, %v1792_v52  ;;  %v7902_v52 = vrot.slane %v6505_v32, %v9224_v40 }
 0x437   :  { %v2039_v28 = vmul.f32 %v6296_v51, %v1787_v2 }
 0x439   :  { %5747 = vmatprep.mubr.msk.f32.mxu1 %vm2055_vm5, %v2039_v28 }
 0x43a   :  { %5748 = vmatmul.mubr.msk.f32.gmra.mrb[66].mxu1 %vm2055_vm5, %v2040_v1 }
 0x43d   :  { %v6298_v4 = vpop.eup %6297 }
 0x43e   :  { %v6300_v62 = vpop.eup %6299  ;;  %v2042_v13 = vmul.f32 %v6298_v4, %v1802_v8 }
 0x43f   :  { %v2041_v30 = vmul.f32 %v6300_v62, %v1797_v38 }
 0x441   :  { %5750 = vmatprep.mubr.msk.f32.mxu1 %vm2055_vm5, %v2041_v30 }
 0x442   :  { %5751 = vmatmul.mubr.msk.f32.gmra.mrb[68].mxu1 %vm2055_vm5, %v2042_v13 }
 0x496   :  { %v5704_v2 = vpop.f32.mrb[36].mxu1 }
 0x497   :  { %v2230_v5 = vadd.f32 %v5704_v2, %v7902_v52  ;;  %v2224_v63 = vpop.f32.mrb[37].mxu1 }
 0x498   :  { %v2225_v8 = vadd.f32 %v2224_v63, %v7902_v52 }
 0x499   :  { %v7907_v38 = vadd.f32 %v7123_v19, %v2230_v5 }
 0x49a   :  { %v7910_v23 = vadd.f32 %v2225_v8, %v7125_v20 }
 0x49b   :  { %v2807_v22 = vsel %vm420_vm3, %v7907_v38, 0.0  ;;  %v2941_v39 = vmul.f32 %v7907_v38, %v7907_v38 }
 0x49c   :  { %2808 = vadd.xlane.f32.xlu1 %v2807_v22  ;;  %5761 = vmatprep.mubr.msk.f32.mxu0 %vm420_vm3, %v7910_v23  ;;  %v2804_v7 = vsel %vm420_vm3, %v7910_v23, 0.0  ;;  %v2940_v19 = vmul.f32 %v7910_v23, %v7910_v23 }
 0x49d   :  { %v5707_v48 = vpop.f32.mrb[38].mxu1  ;;  %2805 = vadd.xlane.f32.xlu0 %v2804_v7  ;;  %5762 = vmatmul.mubr.msk.f32.vlgmr.msra.gmra.mrb[70].mxu0 %vm420_vm3, %v7907_v38  ;;  %v2977_v58 = vsel %vm420_vm3, %v2941_v39, 0.0 }
 0x49e   :  { %v2240_v20 = vadd.f32 %v5707_v48, %v7902_v52  ;;  %v2234_v57 = vpop.f32.mrb[39].mxu1  ;;  %v2974_v12 = vsel %vm420_vm3, %v2940_v19, 0.0 }
 0x49f   :  { %v2235_v10 = vadd.f32 %v2234_v57, %v7902_v52 }
 0x4a0   :  { %v7928_v24 = vadd.f32 %v7134_v25, %v2240_v20  ;;  %2978 = vadd.xlane.f32.xlu1 %v2977_v58 }
 0x4a1   :  { %v7932_v55 = vadd.f32 %v2235_v10, %v7138_v27  ;;  %2975 = vadd.xlane.f32.xlu0 %v2974_v12 }
 0x4a2   :  { %v2813_v6 = vsel %vm420_vm3, %v7928_v24, 0.0  ;;  %v2943_v25 = vmul.f32 %v7928_v24, %v7928_v24 }
 0x4a3   :  { %5764 = vmatprep.mubr.msk.f32.mxu0 %vm420_vm3, %v7932_v55  ;;  %v2810_v51 = vsel %vm420_vm3, %v7932_v55, 0.0  ;;  %v2942_v27 = vmul.f32 %v7932_v55, %v7932_v55 }
 0x4a4   :  { %2814 = vadd.xlane.f32.xlu1 %v2813_v6  ;;  %5765 = vmatmul.mubr.msk.f32.gmra.mrb[72].mxu0 %vm420_vm3, %v7928_v24  ;;  %v2983_v30 = vsel %vm420_vm3, %v2943_v25, 0.0 }
 0x4a5   :  { %v5710_v28 = vpop.f32.mrb[40].mxu1  ;;  %2811 = vadd.xlane.f32.xlu0 %v2810_v51  ;;  %v2980_v32 = vsel %vm420_vm3, %v2942_v27, 0.0 }
 0x4a6   :  { %v2250_v1 = vadd.f32 %v5710_v28, %v7902_v52  ;;  %v2244_v4 = vpop.f32.mrb[41].mxu1 }
 0x4a7   :  { %v2245_v62 = vadd.f32 %v2244_v4, %v7902_v52 }
 0x4a8   :  { %v7950_v13 = vadd.f32 %v7145_v31, %v2250_v1  ;;  %2984 = vadd.xlane.f32.xlu1 %v2983_v30 }
 0x4a9   :  { %v7954_v2 = vadd.f32 %v2245_v62, %v7149_v33  ;;  %2981 = vadd.xlane.f32.xlu0 %v2980_v32 }
 0x4aa   :  { %v2819_v5 = vsel %vm420_vm3, %v7950_v13, 0.0  ;;  %v2945_v31 = vmul.f32 %v7950_v13, %v7950_v13 }
 0x4ab   :  { %5767 = vmatprep.mubr.msk.f32.mxu0 %vm420_vm3, %v7954_v2  ;;  %v2816_v63 = vsel %vm420_vm3, %v7954_v2, 0.0  ;;  %v2944_v33 = vmul.f32 %v7954_v2, %v7954_v2 }
 0x4ac   :  { %2820 = vadd.xlane.f32.xlu1 %v2819_v5  ;;  %5768 = vmatmul.mubr.msk.f32.gmra.mrb[74].mxu0 %vm420_vm3, %v7950_v13  ;;  %v2989_v19 = vsel %vm420_vm3, %v2945_v31, 0.0  ;;  %v4973_v5 = vld [vmem:[%s9215_s5 + $0x20] sm:$0xff] }
 0x4ad   :  { %v5713_v8 = vpop.f32.mrb[42].mxu1  ;;  %2817 = vadd.xlane.f32.xlu0 %v2816_v63  ;;  %v2986_v20 = vsel %vm420_vm3, %v2944_v33, 0.0  ;;  %v4974_v63 = vld [vmem:[%s9215_s5 + $0x28] sm:$0xff] }
 0x4ae   :  { %v2260_v22 = vadd.f32 %v5713_v8, %v7902_v52  ;;  %v2254_v39 = vpop.f32.mrb[43].mxu1  ;;  %v6057_v8 = vpack.c.bf16 %v4974_v63, %v4973_v5 }
 0x4af   :  { %v2255_v7 = vadd.f32 %v2254_v39, %v7902_v52 }
 0x4b0   :  { %v7972_v48 = vadd.f32 %v7154_v36, %v2260_v22  ;;  %2990 = vadd.xlane.f32.xlu1 %v2989_v19  ;;  %6058 = vmatprep.subr.bf16.mxu1 %v6057_v8 }
 0x4b1   :  { %v7976_v57 = vadd.f32 %v2255_v7, %v7156_v37  ;;  %2987 = vadd.xlane.f32.xlu0 %v2986_v20  ;;  %6060 = vmatpush3.bf16.msra.mxu1 %v6057_v8 }
 0x4b2   :  { %v2825_v10 = vsel %vm420_vm3, %v7972_v48, 0.0  ;;  %v2947_v36 = vmul.f32 %v7972_v48, %v7972_v48 }
 0x4b3   :  { %5770 = vmatprep.mubr.msk.f32.mxu0 %vm420_vm3, %v7976_v57  ;;  %v2822_v58 = vsel %vm420_vm3, %v7976_v57, 0.0  ;;  %v2946_v37 = vmul.f32 %v7976_v57, %v7976_v57 }
 0x4b4   :  { %2826 = vadd.xlane.f32.xlu1 %v2825_v10  ;;  %5771 = vmatmul.mubr.msk.f32.gmra.mrb[76].mxu0 %vm420_vm3, %v7972_v48  ;;  %v2995_v27 = vsel %vm420_vm3, %v2947_v36, 0.0  ;;  %v4975_v10 = vld [vmem:[%s9215_s5 + $0x30] sm:$0xff] }
 0x4b5   :  { %v5716_v12 = vpop.f32.mrb[44].mxu1  ;;  %2823 = vadd.xlane.f32.xlu0 %v2822_v58  ;;  %v2992_v1 = vsel %vm420_vm3, %v2946_v37, 0.0  ;;  %v4976_v58 = vld [vmem:[%s9215_s5 + $0x38] sm:$0xff] }
 0x4b6   :  { %v2270_v6 = vadd.f32 %v5716_v12, %v7902_v52  ;;  %v2264_v51 = vpop.f32.mrb[45].mxu1  ;;  %v6061_v36 = vpack.c.bf16 %v4976_v58, %v4975_v10 }
 0x4b7   :  { %v2265_v25 = vadd.f32 %v2264_v51, %v7902_v52 }
 0x4b8   :  { %v7994_v28 = vadd.f32 %v7163_v41, %v2270_v6  ;;  %2996 = vadd.xlane.f32.xlu1 %v2995_v27  ;;  %6062 = vmatprep.subr.bf16.mxu1 %v6061_v36 }
 0x4b9   :  { %v7998_v4 = vadd.f32 %v2265_v25, %v7167_v43  ;;  %2993 = vadd.xlane.f32.xlu0 %v2992_v1  ;;  %6064 = vmatpush3.bf16.msra.mxu1 %v6061_v36 }
 0x4ba   :  { %v2831_v62 = vsel %vm420_vm3, %v7994_v28, 0.0  ;;  %v2949_v41 = vmul.f32 %v7994_v28, %v7994_v28 }
 0x4bb   :  { %5773 = vmatprep.mubr.msk.f32.mxu0 %vm420_vm3, %v7998_v4  ;;  %v2828_v30 = vsel %vm420_vm3, %v7998_v4, 0.0  ;;  %v2948_v43 = vmul.f32 %v7998_v4, %v7998_v4 }
 0x4bc   :  { %2832 = vadd.xlane.f32.xlu1 %v2831_v62  ;;  %5774 = vmatmul.mubr.msk.f32.gmra.mrb[78].mxu0 %vm420_vm3, %v7994_v28  ;;  %v3001_v39 = vsel %vm420_vm3, %v2949_v41, 0.0 }
 0x4bd   :  { %v5719_v32 = vpop.f32.mrb[46].mxu1  ;;  %2829 = vadd.xlane.f32.xlu0 %v2828_v30  ;;  %v2998_v19 = vsel %vm420_vm3, %v2948_v43, 0.0 }
 0x4be   :  { %v2280_v31 = vadd.f32 %v5719_v32, %v7902_v52  ;;  %v2274_v33 = vpop.f32.mrb[47].mxu1 }
 0x4bf   :  { %v2275_v22 = vadd.f32 %v2274_v33, %v7902_v52 }
 0x4c0   :  { %v8022_v7 = vadd.f32 %v7172_v46, %v2280_v31  ;;  %3002 = vadd.xlane.f32.xlu1 %v3001_v39 }
 0x4c1   :  { %v8026_v20 = vadd.f32 %v2275_v22, %v7174_v47  ;;  %2999 = vadd.xlane.f32.xlu0 %v2998_v19 }
 0x4c2   :  { %v2837_v46 = vsel %vm420_vm3, %v8022_v7, 0.0  ;;  %v2951_v37 = vmul.f32 %v8022_v7, %v8022_v7 }
 0x4c3   :  { %5776 = vmatprep.mubr.msk.f32.mxu0 %vm420_vm3, %v8026_v20  ;;  %v2834_v47 = vsel %vm420_vm3, %v8026_v20, 0.0  ;;  %v2950_v12 = vmul.f32 %v8026_v20, %v8026_v20 }
 0x4c4   :  { %2838 = vadd.xlane.f32.xlu1 %v2837_v46  ;;  %5777 = vmatmul.mubr.msk.f32.gmra.mrb[80].mxu0 %vm420_vm3, %v8022_v7  ;;  %v3007_v1 = vsel %vm420_vm3, %v2951_v37, 0.0 }
 0x4c5   :  { %v5722_v6 = vpop.f32.mrb[48].mxu1  ;;  %2835 = vadd.xlane.f32.xlu0 %v2834_v47  ;;  %v3004_v30 = vsel %vm420_vm3, %v2950_v12, 0.0 }
 0x4c6   :  { %v2290_v51 = vadd.f32 %v5722_v6, %v7902_v52  ;;  %v2284_v25 = vpop.f32.mrb[49].mxu1 }
 0x4c7   :  { %v2285_v27 = vadd.f32 %v2284_v25, %v7902_v52 }
 0x4c8   :  { %v8050_v62 = vadd.f32 %v7181_v18, %v2290_v51  ;;  %3008 = vadd.xlane.f32.xlu1 %v3007_v1 }
 0x4c9   :  { %v8054_v41 = vadd.f32 %v2285_v27, %v7185_v50  ;;  %3005 = vadd.xlane.f32.xlu0 %v3004_v30 }
 0x4ca   :  { %v2843_v43 = vsel %vm420_vm3, %v8050_v62, 0.0  ;;  %v2953_v18 = vmul.f32 %v8050_v62, %v8050_v62 }
 0x4cb   :  { %5779 = vmatprep.mubr.msk.f32.mxu0 %vm420_vm3, %v8054_v41  ;;  %v2840_v32 = vsel %vm420_vm3, %v8054_v41, 0.0  ;;  %v2952_v50 = vmul.f32 %v8054_v41, %v8054_v41 }
 0x4cc   :  { %2844 = vadd.xlane.f32.xlu1 %v2843_v43  ;;  %5780 = vmatmul.mubr.msk.f32.gmra.mrb[82].mxu0 %vm420_vm3, %v8050_v62  ;;  %v3013_v8 = vsel %vm420_vm3, %v2953_v18, 0.0 }
 0x4cd   :  { %v5725_v5 = vpop.f32.mrb[50].mxu1  ;;  %2841 = vadd.xlane.f32.xlu0 %v2840_v32  ;;  %v3010_v39 = vsel %vm420_vm3, %v2952_v50, 0.0 }
 0x4ce   :  { %v2300_v63 = vadd.f32 %v5725_v5, %v7902_v52  ;;  %v2294_v31 = vpop.f32.mrb[51].mxu1 }
 0x4cf   :  { %v2295_v33 = vadd.f32 %v2294_v31, %v7902_v52 }
 0x4d0   :  { %v8072_v22 = vadd.f32 %v7190_v53, %v2300_v63  ;;  %3014 = vadd.xlane.f32.xlu1 %v3013_v8 }
 0x4d1   :  { %v8076_v19 = vadd.f32 %v2295_v33, %v7192_v54  ;;  %3011 = vadd.xlane.f32.xlu0 %v3010_v39 }
 0x4d2   :  { %v2849_v10 = vsel %vm420_vm3, %v8072_v22, 0.0  ;;  %v2955_v53 = vmul.f32 %v8072_v22, %v8072_v22 }
 0x4d3   :  { %5782 = vmatprep.mubr.msk.f32.mxu0 %vm420_vm3, %v8076_v19  ;;  %v2846_v58 = vsel %vm420_vm3, %v8076_v19, 0.0  ;;  %v2954_v54 = vmul.f32 %v8076_v19, %v8076_v19 }
 0x4d4   :  { %2850 = vadd.xlane.f32.xlu1 %v2849_v10  ;;  %5783 = vmatmul.mubr.msk.f32.gmra.mrb[84].mxu0 %vm420_vm3, %v8072_v22  ;;  %v3019_v12 = vsel %vm420_vm3, %v2955_v53, 0.0 }
 0x4d5   :  { %v5728_v46 = vpop.f32.mrb[52].mxu1  ;;  %2847 = vadd.xlane.f32.xlu0 %v2846_v58  ;;  %v3016_v51 = vsel %vm420_vm3, %v2954_v54, 0.0 }
 0x4d6   :  { %v2310_v36 = vadd.f32 %v5728_v46, %v7902_v52  ;;  %v2304_v47 = vpop.f32.mrb[53].mxu1 }
 0x4d7   :  { %v2305_v37 = vadd.f32 %v2304_v47, %v7902_v52 }
 0x4d8   :  { %v8094_v6 = vadd.f32 %v7199_v59, %v2310_v36  ;;  %3020 = vadd.xlane.f32.xlu1 %v3019_v12 }
 0x4d9   :  { %v8098_v25 = vadd.f32 %v2305_v37, %v7203_v61  ;;  %3017 = vadd.xlane.f32.xlu0 %v3016_v51 }
 0x4da   :  { %v2855_v27 = vsel %vm420_vm3, %v8094_v6, 0.0  ;;  %v2957_v59 = vmul.f32 %v8094_v6, %v8094_v6 }
 0x4db   :  { %5785 = vmatprep.mubr.msk.f32.mxu0 %vm420_vm3, %v8098_v25  ;;  %v2852_v1 = vsel %vm420_vm3, %v8098_v25, 0.0  ;;  %v2956_v61 = vmul.f32 %v8098_v25, %v8098_v25 }
 0x4dc   :  { %2856 = vadd.xlane.f32.xlu1 %v2855_v27  ;;  %5786 = vmatmul.mubr.msk.f32.gmra.mrb[86].mxu0 %vm420_vm3, %v8094_v6  ;;  %v3025_v50 = vsel %vm420_vm3, %v2957_v59, 0.0 }
 0x4dd   :  { %v5731_v30 = vpop.f32.mrb[54].mxu1  ;;  %2853 = vadd.xlane.f32.xlu0 %v2852_v1  ;;  %v3022_v63 = vsel %vm420_vm3, %v2956_v61, 0.0 }
 0x4de   :  { %v2320_v43 = vadd.f32 %v5731_v30, %v7902_v52  ;;  %v2314_v32 = vpop.f32.mrb[55].mxu1 }
 0x4df   :  { %v2315_v18 = vadd.f32 %v2314_v32, %v7902_v52 }
 0x4e0   :  { %v8116_v5 = vadd.f32 %v7208_v0, %v2320_v43  ;;  %3026 = vadd.xlane.f32.xlu1 %v3025_v50 }
 0x4e1   :  { %v8120_v31 = vadd.f32 %v2315_v18, %v7216_v3  ;;  %3023 = vadd.xlane.f32.xlu0 %v3022_v63 }
 0x4e2   :  { %v2861_v33 = vsel %vm420_vm3, %v8116_v5, 0.0  ;;  %v2959_v0 = vmul.f32 %v8116_v5, %v8116_v5 }
 0x4e3   :  { %5788 = vmatprep.mubr.msk.f32.mxu0 %vm420_vm3, %v8120_v31  ;;  %v2858_v8 = vsel %vm420_vm3, %v8120_v31, 0.0  ;;  %v2958_v3 = vmul.f32 %v8120_v31, %v8120_v31 }
 0x4e4   :  { %2862 = vadd.xlane.f32.xlu1 %v2861_v33  ;;  %5789 = vmatmul.mubr.msk.f32.gmra.mrb[88].mxu0 %vm420_vm3, %v8116_v5  ;;  %v3031_v54 = vsel %vm420_vm3, %v2959_v0, 0.0 }
 0x4e5   :  { %v5734_v39 = vpop.f32.mrb[56].mxu1  ;;  %2859 = vadd.xlane.f32.xlu0 %v2858_v8  ;;  %v3028_v36 = vsel %vm420_vm3, %v2958_v3, 0.0 }
 0x4e6   :  { %v2330_v10 = vadd.f32 %v5734_v39, %v7902_v52  ;;  %v2324_v58 = vpop.f32.mrb[57].mxu1 }
 0x4e7   :  { %v2325_v53 = vadd.f32 %v2324_v58, %v7902_v52 }
 0x4e8   :  { %v8138_v46 = vadd.f32 %v7223_v9, %v2330_v10  ;;  %3032 = vadd.xlane.f32.xlu1 %v3031_v54 }
 0x4e9   :  { %v8142_v47 = vadd.f32 %v2325_v53, %v7233_v15  ;;  %3029 = vadd.xlane.f32.xlu0 %v3028_v36 }
 0x4ea   :  { %v2867_v37 = vsel %vm420_vm3, %v8138_v46, 0.0  ;;  %v2961_v9 = vmul.f32 %v8138_v46, %v8138_v46 }
 0x4eb   :  { %5791 = vmatprep.mubr.msk.f32.mxu0 %vm420_vm3, %v8142_v47  ;;  %v2864_v12 = vsel %vm420_vm3, %v8142_v47, 0.0  ;;  %v2960_v15 = vmul.f32 %v8142_v47, %v8142_v47 }
 0x4ec   :  { %2868 = vadd.xlane.f32.xlu1 %v2867_v37  ;;  %5792 = vmatmul.mubr.msk.f32.gmra.mrb[90].mxu0 %vm420_vm3, %v8138_v46  ;;  %v3037_v61 = vsel %vm420_vm3, %v2961_v9, 0.0 }
 0x4ed   :  { %v5737_v51 = vpop.f32.mrb[58].mxu1  ;;  %2865 = vadd.xlane.f32.xlu0 %v2864_v12  ;;  %v3034_v43 = vsel %vm420_vm3, %v2960_v15, 0.0 }
 0x4ee   :  { %v2340_v27 = vadd.f32 %v5737_v51, %v7902_v52  ;;  %v2334_v1 = vpop.f32.mrb[59].mxu1 }
 0x4ef   :  { %v2335_v59 = vadd.f32 %v2334_v1, %v7902_v52 }
 0x4f0   :  { %v8160_v30 = vadd.f32 %v7238_v17, %v2340_v27  ;;  %3038 = vadd.xlane.f32.xlu1 %v3037_v61 }
 0x4f1   :  { %v8164_v32 = vadd.f32 %v2335_v59, %v7240_v21  ;;  %3035 = vadd.xlane.f32.xlu0 %v3034_v43 }
 0x4f2   :  { %v2873_v18 = vsel %vm420_vm3, %v8160_v30, 0.0  ;;  %v2963_v17 = vmul.f32 %v8160_v30, %v8160_v30 }
 0x4f3   :  { %5794 = vmatprep.mubr.msk.f32.mxu0 %vm420_vm3, %v8164_v32  ;;  %v2870_v50 = vsel %vm420_vm3, %v8164_v32, 0.0  ;;  %v2962_v21 = vmul.f32 %v8164_v32, %v8164_v32 }
 0x4f4   :  { %2874 = vadd.xlane.f32.xlu1 %v2873_v18  ;;  %5795 = vmatmul.mubr.msk.f32.gmra.mrb[92].mxu0 %vm420_vm3, %v8160_v30  ;;  %v3043_v3 = vsel %vm420_vm3, %v2963_v17, 0.0 }
 0x4f5   :  { %v5740_v63 = vpop.f32.mrb[60].mxu1  ;;  %2871 = vadd.xlane.f32.xlu0 %v2870_v50  ;;  %v3040_v10 = vsel %vm420_vm3, %v2962_v21, 0.0 }
 0x4f6   :  { %v2350_v33 = vadd.f32 %v5740_v63, %v7902_v52  ;;  %v2344_v8 = vpop.f32.mrb[61].mxu1 }
 0x4f7   :  { %v2345_v0 = vadd.f32 %v2344_v8, %v7902_v52 }
 0x4f8   :  { %v8182_v39 = vadd.f32 %v7247_v26, %v2350_v33  ;;  %3044 = vadd.xlane.f32.xlu1 %v3043_v3 }
 0x4f9   :  { %v8186_v58 = vadd.f32 %v2345_v0, %v7251_v29  ;;  %3041 = vadd.xlane.f32.xlu0 %v3040_v10 }
 0x4fa   :  { %v2879_v53 = vsel %vm420_vm3, %v8182_v39, 0.0  ;;  %v2965_v26 = vmul.f32 %v8182_v39, %v8182_v39 }
 0x4fb   :  { %5797 = vmatprep.mubr.msk.f32.mxu0 %vm420_vm3, %v8186_v58  ;;  %v2876_v54 = vsel %vm420_vm3, %v8186_v58, 0.0  ;;  %v2964_v29 = vmul.f32 %v8186_v58, %v8186_v58 }
 0x4fc   :  { %2880 = vadd.xlane.f32.xlu1 %v2879_v53  ;;  %5798 = vmatmul.mubr.msk.f32.gmra.mrb[94].mxu0 %vm420_vm3, %v8182_v39  ;;  %v3049_v15 = vsel %vm420_vm3, %v2965_v26, 0.0 }
 0x4fd   :  { %v5743_v36 = vpop.f32.mrb[62].mxu1  ;;  %2877 = vadd.xlane.f32.xlu0 %v2876_v54  ;;  %v3046_v27 = vsel %vm420_vm3, %v2964_v29, 0.0 }
 0x4fe   :  { %v2360_v37 = vadd.f32 %v5743_v36, %v7902_v52  ;;  %v2354_v12 = vpop.f32.mrb[63].mxu1 }
 0x4ff   :  { %v2355_v9 = vadd.f32 %v2354_v12, %v7902_v52 }
 0x500   :  { %v8204_v51 = vadd.f32 %v7256_v34, %v2360_v37  ;;  %3050 = vadd.xlane.f32.xlu1 %v3049_v15 }
 0x501   :  { %v8208_v1 = vadd.f32 %v2355_v9, %v7258_v35  ;;  %3047 = vadd.xlane.f32.xlu0 %v3046_v27 }
 0x502   :  { %v2885_v59 = vsel %vm420_vm3, %v8204_v51, 0.0  ;;  %v2967_v34 = vmul.f32 %v8204_v51, %v8204_v51 }
 0x503   :  { %5800 = vmatprep.mubr.msk.f32.mxu0 %vm420_vm3, %v8208_v1  ;;  %v2882_v61 = vsel %vm420_vm3, %v8208_v1, 0.0  ;;  %v2966_v35 = vmul.f32 %v8208_v1, %v8208_v1 }
 0x504   :  { %2886 = vadd.xlane.f32.xlu1 %v2885_v59  ;;  %5801 = vmatmul.mubr.msk.f32.gmra.mrb[96].mxu0 %vm420_vm3, %v8204_v51  ;;  %v3055_v21 = vsel %vm420_vm3, %v2967_v34, 0.0 }
 0x505   :  { %v5746_v43 = vpop.f32.mrb[64].mxu1  ;;  %2883 = vadd.xlane.f32.xlu0 %v2882_v61  ;;  %v3052_v33 = vsel %vm420_vm3, %v2966_v35, 0.0 }
 0x506   :  { %v2370_v18 = vadd.f32 %v5746_v43, %v7902_v52  ;;  %v2364_v50 = vpop.f32.mrb[65].mxu1 }
 0x507   :  { %v2365_v17 = vadd.f32 %v2364_v50, %v7902_v52 }
 0x508   :  { %v8226_v63 = vadd.f32 %v7265_v42, %v2370_v18  ;;  %3056 = vadd.xlane.f32.xlu1 %v3055_v21 }
 0x509   :  { %v8230_v8 = vadd.f32 %v2365_v17, %v7269_v45  ;;  %3053 = vadd.xlane.f32.xlu0 %v3052_v33 }
 0x50a   :  { %v2891_v0 = vsel %vm420_vm3, %v8226_v63, 0.0  ;;  %v2969_v42 = vmul.f32 %v8226_v63, %v8226_v63 }
 0x50b   :  { %5803 = vmatprep.mubr.msk.f32.mxu0 %vm420_vm3, %v8230_v8  ;;  %v2888_v3 = vsel %vm420_vm3, %v8230_v8, 0.0  ;;  %v2968_v45 = vmul.f32 %v8230_v8, %v8230_v8 }
 0x50c   :  { %2892 = vadd.xlane.f32.xlu1 %v2891_v0  ;;  %5804 = vmatmul.mubr.msk.f32.gmra.mrb[98].mxu0 %vm420_vm3, %v8226_v63  ;;  %v3061_v29 = vsel %vm420_vm3, %v2969_v42, 0.0 }
 0x50d   :  { %v5749_v10 = vpop.f32.mrb[66].mxu1  ;;  %2889 = vadd.xlane.f32.xlu0 %v2888_v3  ;;  %v3058_v37 = vsel %vm420_vm3, %v2968_v45, 0.0 }
 0x50e   :  { %v2380_v53 = vadd.f32 %v5749_v10, %v7902_v52  ;;  %v2374_v54 = vpop.f32.mrb[67].mxu1 }
 0x50f   :  { %v2375_v26 = vadd.f32 %v2374_v54, %v7902_v52 }
 0x510   :  { %v8248_v36 = vadd.f32 %v7274_v16, %v2380_v53  ;;  %3062 = vadd.xlane.f32.xlu1 %v3061_v29 }
 0x511   :  { %v8252_v12 = vadd.f32 %v2375_v26, %v7276_v49  ;;  %3059 = vadd.xlane.f32.xlu0 %v3058_v37 }
 0x512   :  { %v2897_v9 = vsel %vm420_vm3, %v8248_v36, 0.0  ;;  %v2971_v16 = vmul.f32 %v8248_v36, %v8248_v36 }
 0x513   :  { %5806 = vmatprep.mubr.msk.f32.mxu0 %vm420_vm3, %v8252_v12  ;;  %v2894_v15 = vsel %vm420_vm3, %v8252_v12, 0.0  ;;  %v2970_v49 = vmul.f32 %v8252_v12, %v8252_v12 }
 0x514   :  { %2898 = vadd.xlane.f32.xlu1 %v2897_v9  ;;  %5807 = vmatmul.mubr.msk.f32.gmra.mrb[100].mxu0 %vm420_vm3, %v8248_v36  ;;  %v3067_v35 = vsel %vm420_vm3, %v2971_v16, 0.0 }
 0x515   :  { %v5752_v27 = vpop.f32.mrb[68].mxu1  ;;  %2895 = vadd.xlane.f32.xlu0 %v2894_v15  ;;  %v3064_v18 = vsel %vm420_vm3, %v2970_v49, 0.0 }
 0x516   :  { %v2390_v59 = vadd.f32 %v5752_v27, %v7902_v52  ;;  %v2384_v61 = vpop.f32.mrb[69].mxu1 }
 0x517   :  { %v2385_v34 = vadd.f32 %v2384_v61, %v7902_v52 }
 0x518   :  { %v8270_v43 = vadd.f32 %v7283_v56, %v2390_v59  ;;  %3068 = vadd.xlane.f32.xlu1 %v3067_v35 }
 0x519   :  { %v8274_v50 = vadd.f32 %v2385_v34, %v7287_v60  ;;  %3065 = vadd.xlane.f32.xlu0 %v3064_v18 }
 0x51a   :  { %v2903_v17 = vsel %vm420_vm3, %v8270_v43, 0.0  ;;  %v2973_v56 = vmul.f32 %v8270_v43, %v8270_v43 }
 0x51b   :  { %5809 = vmatprep.mubr.msk.f32.mxu0 %vm420_vm3, %v8274_v50  ;;  %v2900_v52 = vsel %vm420_vm3, %v8274_v50, 0.0  ;;  %v2972_v60 = vmul.f32 %v8274_v50, %v8274_v50 }
 0x51c   :  { %2904 = vadd.xlane.f32.xlu1 %v2903_v17  ;;  %5810 = vmatmul.mubr.msk.f32.gmra.mrb[102].mxu0 %vm420_vm3, %v8270_v43  ;;  %v3073_v21 = vsel %vm420_vm3, %v2973_v56, 0.0 }
 0x51d   :  { %2901 = vadd.xlane.f32.xlu0 %v2900_v52  ;;  %v3070_v33 = vsel %vm420_vm3, %v2972_v60, 0.0 }
 0x520   :  { %3074 = vadd.xlane.f32.xlu1 %v3073_v21 }
 0x521   :  { %3071 = vadd.xlane.f32.xlu0 %v3070_v33 }
 0x529   :  { %v2809_v0 = vpop.xlane.xlu1 %2808 }
 0x52a   :  { %v2907_v3 = vmul.f32 0.03125, %v2809_v0  ;;  %v2806_v42 = vpop.xlane.xlu0 %2805 }
 0x52b   :  { %v2906_v45 = vmul.f32 0.03125, %v2806_v42  ;;  %v4972_v42 = vld [vmem:[%s9214_s4 + $0x4] sm:$0xf] }
 0x52c   :  { %v3111_v53 = vmul.f32 %v2907_v3, %v2907_v3 }
 0x52d   :  { %v2979_v10 = vpop.xlane.xlu1 %2978  ;;  %v3110_v29 = vmul.f32 %v2906_v45, %v2906_v45 }
 0x52e   :  { %v3077_v54 = vmul.f32 0.03125, %v2979_v10  ;;  %v2976_v26 = vpop.xlane.xlu0 %2975 }
 0x52f   :  { %v3076_v37 = vmul.f32 0.03125, %v2976_v26 }
 0x530   :  { %v3145_v9 = vsub.f32 %v3077_v54, %v3111_v53 }
 0x531   :  { %v3144_v15 = vsub.f32 %v3076_v37, %v3110_v29  ;;  %v2815_v16 = vpop.xlane.xlu1 %2814  ;;  %v3179_v37 = vsub.f32 %v7907_v38, %v2907_v3 }
 0x532   :  { %v3213_v49 = vadd.f32 1e-05, %v3145_v9  ;;  %v8290_v27 = vmul.f32 0.03125, %v2815_v16  ;;  %v2812_v59 = vpop.xlane.xlu0 %2811  ;;  %v8308_v9 = vrot.slane %v4972_v42, %v1386_v44  ;;  %v9225_v44 = vsub.s32 1, %v7379_v14 }
 0x533   :  { %v3212_v61 = vadd.f32 1e-05, %v3144_v15  ;;  %v8292_v34 = vmul.f32 0.03125, %v2812_v59 }
 0x534   :  { %6301 = vrsqrt.f32 %v3213_v49  ;;  %v3113_v18 = vmul.f32 %v8290_v27, %v8290_v27  ;;  %v3178_v49 = vsub.f32 %v7910_v23, %v2906_v45 }
 0x535   :  { %6303 = vrsqrt.f32 %v3212_v61  ;;  %v2985_v35 = vpop.xlane.xlu1 %2984  ;;  %v3112_v56 = vmul.f32 %v8292_v34, %v8292_v34 }
 0x536   :  { %v3079_v17 = vmul.f32 0.03125, %v2985_v35  ;;  %v2982_v52 = vpop.xlane.xlu0 %2981 }
 0x537   :  { %v3078_v60 = vmul.f32 0.03125, %v2982_v52 }
 0x538   :  { %v3147_v21 = vsub.f32 %v3079_v17, %v3113_v18 }
 0x539   :  { %v3146_v33 = vsub.f32 %v3078_v60, %v3112_v56  ;;  %v2821_v0 = vpop.xlane.xlu1 %2820 }
 0x53a   :  { %v3215_v10 = vadd.f32 1e-05, %v3147_v21  ;;  %v8301_v53 = vmul.f32 0.03125, %v2821_v0  ;;  %v2818_v54 = vpop.xlane.xlu0 %2817  ;;  %v8317_v21 = vrot.slane %v4972_v42, %v9225_v44  ;;  %v3181_v42 = vsub.f32 %v7928_v24, %v8290_v27 }
 0x53b   :  { %v3214_v26 = vadd.f32 1e-05, %v3146_v33  ;;  %v8303_v29 = vmul.f32 0.03125, %v2818_v54 }
 0x53c   :  { %6305 = vrsqrt.f32 %v3215_v10  ;;  %v3115_v59 = vmul.f32 %v8301_v53, %v8301_v53 }
 0x53d   :  { %6307 = vrsqrt.f32 %v3214_v26  ;;  %v2991_v15 = vpop.xlane.xlu1 %2990  ;;  %v3114_v52 = vmul.f32 %v8303_v29, %v8303_v29 }
 0x53e   :  { %v6302_v16 = vpop.eup %6301  ;;  %v3081_v61 = vmul.f32 0.03125, %v2991_v15  ;;  %v2988_v35 = vpop.xlane.xlu0 %2987 }
 0x53f   :  { %v6304_v18 = vpop.eup %6303  ;;  %v3281_v17 = vmul.f32 %v6302_v16, %v3179_v37  ;;  %v3080_v3 = vmul.f32 0.03125, %v2988_v35 }
 0x540   :  { %v3149_v56 = vsub.f32 %v3081_v61, %v3115_v59  ;;  %v3280_v60 = vmul.f32 %v6304_v18, %v3178_v49  ;;  %v3180_v18 = vsub.f32 %v7932_v55, %v8292_v34 }
 0x541   :  { %v3319_v33 = vmul.f32 %v8308_v9, %v3281_v17  ;;  %v3148_v45 = vsub.f32 %v3080_v3, %v3114_v52  ;;  %v2827_v0 = vpop.xlane.xlu1 %2826 }
 0x542   :  { %v3217_v10 = vadd.f32 1e-05, %v3149_v56  ;;  %v8320_v54 = vmul.f32 0.03125, %v2827_v0  ;;  %v2824_v26 = vpop.xlane.xlu0 %2823  ;;  %v3318_v37 = vmul.f32 %v8308_v9, %v3280_v60 }
 0x543   :  { %v3216_v15 = vadd.f32 1e-05, %v3148_v45  ;;  %v8323_v16 = vmul.f32 0.03125, %v2824_v26  ;;  %v3357_v61 = vadd.f32 %v8317_v21, %v3319_v33 }
 0x544   :  { %6309 = vrsqrt.f32 %v3217_v10  ;;  %v3356_v49 = vadd.f32 %v8317_v21, %v3318_v37  ;;  %v3117_v17 = vmul.f32 %v8320_v54, %v8320_v54 }
 0x545   :  { %6311 = vrsqrt.f32 %v3216_v15  ;;  %v2997_v59 = vpop.xlane.xlu1 %2996  ;;  %v3116_v60 = vmul.f32 %v8323_v16, %v8323_v16 }
 0x546   :  { %v6306_v35 = vpop.eup %6305  ;;  %v3083_v52 = vmul.f32 0.03125, %v2997_v59  ;;  %5820 = vmatprep.mubr.msk.f32.mxu1 %vm420_vm3, %v3356_v49  ;;  %v2994_v3 = vpop.xlane.xlu0 %2993 }
 0x547   :  { %v6308_v56 = vpop.eup %6307  ;;  %v3082_v27 = vmul.f32 0.03125, %v2994_v3  ;;  %5821 = vmatmul.mubr.msk.f32.vlgmr.msra.gmra.mrb[70].mxu1 %vm420_vm3, %v3357_v61  ;;  %v3283_v44 = vmul.f32 %v6306_v35, %v3181_v42  ;;  %v3183_v42 = vsub.f32 %v7950_v13, %v8301_v53 }
 0x548   :  { %v3151_v33 = vsub.f32 %v3083_v52, %v3117_v17  ;;  %v3282_v45 = vmul.f32 %v6308_v56, %v3180_v18  ;;  %v3182_v17 = vsub.f32 %v7954_v2, %v8303_v29 }
 0x549   :  { %v3150_v0 = vsub.f32 %v3082_v27, %v3116_v60  ;;  %v2833_v10 = vpop.xlane.xlu1 %2832  ;;  %v3321_v34 = vmul.f32 %v8308_v9, %v3283_v44 }
 0x54a   :  { %v3219_v26 = vadd.f32 1e-05, %v3151_v33  ;;  %v8338_v37 = vmul.f32 0.03125, %v2833_v10  ;;  %v2830_v15 = vpop.xlane.xlu0 %2829  ;;  %v3320_v49 = vmul.f32 %v8308_v9, %v3282_v45 }
 0x54b   :  { %v3218_v59 = vadd.f32 1e-05, %v3150_v0  ;;  %v8341_v40 = vmul.f32 0.03125, %v2830_v15  ;;  %v3359_v35 = vadd.f32 %v8317_v21, %v3321_v34 }
 0x54c   :  { %6313 = vrsqrt.f32 %v3219_v26  ;;  %v3358_v3 = vadd.f32 %v8317_v21, %v3320_v49  ;;  %v3119_v52 = vmul.f32 %v8338_v37, %v8338_v37 }
 0x54d   :  { %6315 = vrsqrt.f32 %v3218_v59  ;;  %v3003_v61 = vpop.xlane.xlu1 %3002  ;;  %v3118_v44 = vmul.f32 %v8341_v40, %v8341_v40 }
 0x54e   :  { %v6310_v18 = vpop.eup %6309  ;;  %v3085_v56 = vmul.f32 0.03125, %v3003_v61  ;;  %5823 = vmatprep.mubr.msk.f32.mxu1 %vm420_vm3, %v3358_v3  ;;  %v3000_v60 = vpop.xlane.xlu0 %2999 }
 0x54f   :  { %v6312_v27 = vpop.eup %6311  ;;  %v3084_v53 = vmul.f32 0.03125, %v3000_v60  ;;  %5824 = vmatmul.mubr.msk.f32.gmra.mrb[72].mxu1 %vm420_vm3, %v3359_v35  ;;  %v3285_v33 = vmul.f32 %v6310_v18, %v3183_v42  ;;  %v3185_v42 = vsub.f32 %v7972_v48, %v8320_v54 }
 0x550   :  { %v3153_v45 = vsub.f32 %v3085_v56, %v3119_v52  ;;  %v3284_v0 = vmul.f32 %v6312_v27, %v3182_v17  ;;  %v3184_v52 = vsub.f32 %v7976_v57, %v8323_v16 }
 0x551   :  { %v3152_v10 = vsub.f32 %v3084_v53, %v3118_v44  ;;  %v2839_v34 = vpop.xlane.xlu1 %2838  ;;  %v3323_v29 = vmul.f32 %v8308_v9, %v3285_v33 }
 0x552   :  { %v3221_v26 = vadd.f32 1e-05, %v3153_v45  ;;  %v8356_v15 = vmul.f32 0.03125, %v2839_v34  ;;  %v2836_v49 = vpop.xlane.xlu0 %2835  ;;  %v3322_v59 = vmul.f32 %v8308_v9, %v3284_v0 }
 0x553   :  { %v3220_v3 = vadd.f32 1e-05, %v3152_v10  ;;  %v8359_v61 = vmul.f32 0.03125, %v2836_v49  ;;  %v3361_v18 = vadd.f32 %v8317_v21, %v3323_v29 }
 0x554   :  { %6317 = vrsqrt.f32 %v3221_v26  ;;  %v3360_v60 = vadd.f32 %v8317_v21, %v3322_v59  ;;  %v3121_v56 = vmul.f32 %v8356_v15, %v8356_v15 }
 0x555   :  { %6319 = vrsqrt.f32 %v3220_v3  ;;  %v3009_v35 = vpop.xlane.xlu1 %3008  ;;  %v3120_v33 = vmul.f32 %v8359_v61, %v8359_v61 }
 0x556   :  { %v6314_v17 = vpop.eup %6313  ;;  %v3087_v27 = vmul.f32 0.03125, %v3009_v35  ;;  %5826 = vmatprep.mubr.msk.f32.mxu1 %vm420_vm3, %v3360_v60  ;;  %v3006_v44 = vpop.xlane.xlu0 %3005 }
 0x557   :  { %v6316_v53 = vpop.eup %6315  ;;  %v3086_v54 = vmul.f32 0.03125, %v3006_v44  ;;  %5827 = vmatmul.mubr.msk.f32.gmra.mrb[74].mxu1 %vm420_vm3, %v3361_v18  ;;  %v3287_v45 = vmul.f32 %v6314_v17, %v3185_v42  ;;  %v3187_v42 = vsub.f32 %v7994_v28, %v8338_v37 }
 0x558   :  { %v3155_v0 = vsub.f32 %v3087_v27, %v3121_v56  ;;  %v3286_v10 = vmul.f32 %v6316_v53, %v3184_v52  ;;  %v3186_v56 = vsub.f32 %v7998_v4, %v8341_v40 }
 0x559   :  { %v3154_v34 = vsub.f32 %v3086_v54, %v3120_v33  ;;  %v2845_v29 = vpop.xlane.xlu1 %2844  ;;  %v3325_v16 = vmul.f32 %v8308_v9, %v3287_v45 }
 0x55a   :  { %v3223_v26 = vadd.f32 1e-05, %v3155_v0  ;;  %v8374_v49 = vmul.f32 0.03125, %v2845_v29  ;;  %v2842_v59 = vpop.xlane.xlu0 %2841  ;;  %v3324_v3 = vmul.f32 %v8308_v9, %v3286_v10 }
 0x55b   :  { %v3222_v60 = vadd.f32 1e-05, %v3154_v34  ;;  %v8377_v35 = vmul.f32 0.03125, %v2842_v59  ;;  %v3363_v17 = vadd.f32 %v8317_v21, %v3325_v16 }
 0x55c   :  { %6321 = vrsqrt.f32 %v3223_v26  ;;  %v3362_v44 = vadd.f32 %v8317_v21, %v3324_v3  ;;  %v3123_v27 = vmul.f32 %v8374_v49, %v8374_v49 }
 0x55d   :  { %6323 = vrsqrt.f32 %v3222_v60  ;;  %v3015_v18 = vpop.xlane.xlu1 %3014  ;;  %v3122_v45 = vmul.f32 %v8377_v35, %v8377_v35 }
 0x55e   :  { %v6318_v52 = vpop.eup %6317  ;;  %v3089_v53 = vmul.f32 0.03125, %v3015_v18  ;;  %5829 = vmatprep.mubr.msk.f32.mxu1 %vm420_vm3, %v3362_v44  ;;  %v3012_v33 = vpop.xlane.xlu0 %3011 }
 0x55f   :  { %v6320_v54 = vpop.eup %6319  ;;  %v3088_v37 = vmul.f32 0.03125, %v3012_v33  ;;  %5830 = vmatmul.mubr.msk.f32.gmra.mrb[76].mxu1 %vm420_vm3, %v3363_v17  ;;  %v3289_v0 = vmul.f32 %v6318_v52, %v3187_v42  ;;  %v3189_v42 = vsub.f32 %v8022_v7, %v8356_v15 }
 0x560   :  { %v3157_v10 = vsub.f32 %v3089_v53, %v3123_v27  ;;  %v3288_v34 = vmul.f32 %v6320_v54, %v3186_v56  ;;  %v3188_v27 = vsub.f32 %v8026_v20, %v8359_v61 }
 0x561   :  { %v3156_v29 = vsub.f32 %v3088_v37, %v3122_v45  ;;  %v2851_v16 = vpop.xlane.xlu1 %2850  ;;  %v3327_v40 = vmul.f32 %v8308_v9, %v3289_v0 }
 0x562   :  { %v3225_v26 = vadd.f32 1e-05, %v3157_v10  ;;  %v8392_v59 = vmul.f32 0.03125, %v2851_v16  ;;  %v2848_v3 = vpop.xlane.xlu0 %2847  ;;  %v3326_v60 = vmul.f32 %v8308_v9, %v3288_v34 }
 0x563   :  { %v3224_v44 = vadd.f32 1e-05, %v3156_v29  ;;  %v8395_v18 = vmul.f32 0.03125, %v2848_v3  ;;  %v3365_v52 = vadd.f32 %v8317_v21, %v3327_v40 }
 0x564   :  { %6325 = vrsqrt.f32 %v3225_v26  ;;  %v3364_v33 = vadd.f32 %v8317_v21, %v3326_v60  ;;  %v3125_v53 = vmul.f32 %v8392_v59, %v8392_v59 }
 0x565   :  { %6327 = vrsqrt.f32 %v3224_v44  ;;  %v3021_v17 = vpop.xlane.xlu1 %3020  ;;  %v3124_v0 = vmul.f32 %v8395_v18, %v8395_v18 }
 0x566   :  { %v6322_v56 = vpop.eup %6321  ;;  %v3091_v54 = vmul.f32 0.03125, %v3021_v17  ;;  %5832 = vmatprep.mubr.msk.f32.mxu1 %vm420_vm3, %v3364_v33  ;;  %v3018_v45 = vpop.xlane.xlu0 %3017 }
 0x567   :  { %v6324_v37 = vpop.eup %6323  ;;  %v3090_v15 = vmul.f32 0.03125, %v3018_v45  ;;  %5833 = vmatmul.mubr.msk.f32.gmra.mrb[78].mxu1 %vm420_vm3, %v3365_v52  ;;  %v3291_v10 = vmul.f32 %v6322_v56, %v3189_v42  ;;  %v3191_v42 = vsub.f32 %v8050_v62, %v8374_v49 }
 0x568   :  { %v3159_v34 = vsub.f32 %v3091_v54, %v3125_v53  ;;  %v3290_v29 = vmul.f32 %v6324_v37, %v3188_v27  ;;  %v3190_v53 = vsub.f32 %v8054_v41, %v8377_v35 }
 0x569   :  { %v3158_v16 = vsub.f32 %v3090_v15, %v3124_v0  ;;  %v2857_v40 = vpop.xlane.xlu1 %2856  ;;  %v3329_v61 = vmul.f32 %v8308_v9, %v3291_v10 }
 0x56a   :  { %v3227_v26 = vadd.f32 1e-05, %v3159_v34  ;;  %v8410_v3 = vmul.f32 0.03125, %v2857_v40  ;;  %v2854_v60 = vpop.xlane.xlu0 %2853  ;;  %v3328_v44 = vmul.f32 %v8308_v9, %v3290_v29 }
 0x56b   :  { %v3226_v33 = vadd.f32 1e-05, %v3158_v16  ;;  %v8413_v17 = vmul.f32 0.03125, %v2854_v60  ;;  %v3367_v56 = vadd.f32 %v8317_v21, %v3329_v61 }
 0x56c   :  { %6329 = vrsqrt.f32 %v3227_v26  ;;  %v3366_v45 = vadd.f32 %v8317_v21, %v3328_v44  ;;  %v3127_v54 = vmul.f32 %v8410_v3, %v8410_v3 }
 0x56d   :  { %6331 = vrsqrt.f32 %v3226_v33  ;;  %v3027_v52 = vpop.xlane.xlu1 %3026  ;;  %v3126_v10 = vmul.f32 %v8413_v17, %v8413_v17 }
 0x56e   :  { %v6326_v27 = vpop.eup %6325  ;;  %v3093_v37 = vmul.f32 0.03125, %v3027_v52  ;;  %5835 = vmatprep.mubr.msk.f32.mxu1 %vm420_vm3, %v3366_v45  ;;  %v3024_v0 = vpop.xlane.xlu0 %3023 }
 0x56f   :  { %v6328_v15 = vpop.eup %6327  ;;  %v3092_v49 = vmul.f32 0.03125, %v3024_v0  ;;  %5836 = vmatmul.mubr.msk.f32.gmra.mrb[80].mxu1 %vm420_vm3, %v3367_v56  ;;  %v3293_v34 = vmul.f32 %v6326_v27, %v3191_v42 }
 0x570   :  { %v3161_v29 = vsub.f32 %v3093_v37, %v3127_v54  ;;  %v5763_v16 = vpop.f32.mrb[70].mxu0  ;;  %v3292_v40 = vmul.f32 %v6328_v15, %v3190_v53  ;;  %v3193_v53 = vsub.f32 %v8072_v22, %v8392_v59  ;;  %v3192_v15 = vsub.f32 %v8076_v19, %v8395_v18 }
 0x571   :  { %v3160_v61 = vsub.f32 %v3092_v49, %v3126_v10  ;;  %2769 = vst.msk [vmem:[%s9220_s10 + $0x8] sm:$0xff] %vm420_vm3, %v5763_v16  ;;  %v2863_v35 = vpop.xlane.xlu1 %2862  ;;  %v2599_v26 = vpop.f32.mrb[71].mxu0  ;;  %v3331_v60 = vmul.f32 %v8308_v9, %v3293_v34 }
 0x572   :  { %v3229_v44 = vadd.f32 1e-05, %v3161_v29  ;;  %v8432_v33 = vmul.f32 0.03125, %v2863_v35  ;;  %2768 = vst.msk [vmem:[%s9220_s10] sm:$0xff] %vm420_vm3, %v2599_v26  ;;  %v2860_v45 = vpop.xlane.xlu0 %2859  ;;  %v3330_v42 = vmul.f32 %v8308_v9, %v3292_v40 }
 0x573   :  { %v3228_v52 = vadd.f32 1e-05, %v3160_v61  ;;  %v8439_v56 = vmul.f32 0.03125, %v2860_v45  ;;  %v3369_v37 = vadd.f32 %v8317_v21, %v3331_v60 }
 0x574   :  { %6333 = vrsqrt.f32 %v3229_v44  ;;  %v3368_v27 = vadd.f32 %v8317_v21, %v3330_v42  ;;  %v3129_v10 = vmul.f32 %v8432_v33, %v8432_v33 }
 0x575   :  { %6335 = vrsqrt.f32 %v3228_v52  ;;  %v3033_v54 = vpop.xlane.xlu1 %3032  ;;  %v3128_v16 = vmul.f32 %v8439_v56, %v8439_v56 }
 0x576   :  { %v6330_v0 = vpop.eup %6329  ;;  %v3095_v49 = vmul.f32 0.03125, %v3033_v54  ;;  %5838 = vmatprep.mubr.msk.f32.mxu1 %vm420_vm3, %v3368_v27  ;;  %v3030_v34 = vpop.xlane.xlu0 %3029 }
 0x577   :  { %v6332_v29 = vpop.eup %6331  ;;  %v3094_v59 = vmul.f32 0.03125, %v3030_v34  ;;  %v5766_v40 = vpop.f32.mrb[72].mxu0  ;;  %5839 = vmatmul.mubr.msk.f32.gmra.mrb[82].mxu1 %vm420_vm3, %v3369_v37  ;;  %v3295_v61 = vmul.f32 %v6330_v0, %v3193_v53 }
 0x578   :  { %v3163_v35 = vsub.f32 %v3095_v49, %v3129_v10  ;;  %2771 = vst.msk [vmem:[%s9220_s10 + $0x18] sm:$0xff] %vm420_vm3, %v5766_v40  ;;  %v2609_v18 = vpop.f32.mrb[73].mxu0  ;;  %v3294_v26 = vmul.f32 %v6332_v29, %v3192_v15  ;;  %v3195_v15 = vsub.f32 %v8094_v6, %v8410_v3  ;;  %v3194_v29 = vsub.f32 %v8098_v25, %v8413_v17 }
 0x579   :  { %v3162_v60 = vsub.f32 %v3094_v59, %v3128_v16  ;;  %2770 = vst.msk [vmem:[%s9220_s10 + $0x10] sm:$0xff] %vm420_vm3, %v2609_v18  ;;  %v2869_v44 = vpop.xlane.xlu1 %2868  ;;  %v3333_v45 = vmul.f32 %v8308_v9, %v3295_v61 }
 0x57a   :  { %v3231_v42 = vadd.f32 1e-05, %v3163_v35  ;;  %v8462_v52 = vmul.f32 0.03125, %v2869_v44  ;;  %v2866_v27 = vpop.xlane.xlu0 %2865  ;;  %v3332_v53 = vmul.f32 %v8308_v9, %v3294_v26 }
 0x57b   :  { %v3230_v54 = vadd.f32 1e-05, %v3162_v60  ;;  %v8465_v37 = vmul.f32 0.03125, %v2866_v27  ;;  %v3371_v49 = vadd.f32 %v8317_v21, %v3333_v45 }
 0x57c   :  { %6337 = vrsqrt.f32 %v3231_v42  ;;  %v3370_v0 = vadd.f32 %v8317_v21, %v3332_v53  ;;  %v3131_v16 = vmul.f32 %v8462_v52, %v8462_v52 }
 0x57d   :  { %6339 = vrsqrt.f32 %v3230_v54  ;;  %v3039_v10 = vpop.xlane.xlu1 %3038  ;;  %v3130_v35 = vmul.f32 %v8465_v37, %v8465_v37 }
 0x57e   :  { %v6334_v34 = vpop.eup %6333  ;;  %v3097_v59 = vmul.f32 0.03125, %v3039_v10  ;;  %5841 = vmatprep.mubr.msk.f32.mxu1 %vm420_vm3, %v3370_v0  ;;  %v3036_v40 = vpop.xlane.xlu0 %3035 }
 0x57f   :  { %v6336_v61 = vpop.eup %6335  ;;  %v3096_v3 = vmul.f32 0.03125, %v3036_v40  ;;  %v5769_v18 = vpop.f32.mrb[74].mxu0  ;;  %5842 = vmatmul.mubr.msk.f32.gmra.mrb[84].mxu1 %vm420_vm3, %v3371_v49  ;;  %v3297_v26 = vmul.f32 %v6334_v34, %v3195_v15 }
 0x580   :  { %v3165_v60 = vsub.f32 %v3097_v59, %v3131_v16  ;;  %2773 = vst.msk [vmem:[%s9220_s10 + $0x28] sm:$0xff] %vm420_vm3, %v5769_v18  ;;  %v2619_v17 = vpop.f32.mrb[75].mxu0  ;;  %v3296_v44 = vmul.f32 %v6336_v61, %v3194_v29  ;;  %v3197_v29 = vsub.f32 %v8116_v5, %v8432_v33  ;;  %v3196_v61 = vsub.f32 %v8120_v31, %v8439_v56 }
 0x581   :  { %v3164_v45 = vsub.f32 %v3096_v3, %v3130_v35  ;;  %2772 = vst.msk [vmem:[%s9220_s10 + $0x20] sm:$0xff] %vm420_vm3, %v2619_v17  ;;  %v2875_v42 = vpop.xlane.xlu1 %2874  ;;  %v3335_v27 = vmul.f32 %v8308_v9, %v3297_v26 }
 0x582   :  { %v3233_v53 = vadd.f32 1e-05, %v3165_v60  ;;  %v8488_v54 = vmul.f32 0.03125, %v2875_v42  ;;  %v2872_v0 = vpop.xlane.xlu0 %2871  ;;  %v3334_v15 = vmul.f32 %v8308_v9, %v3296_v44 }
 0x583   :  { %v3232_v10 = vadd.f32 1e-05, %v3164_v45  ;;  %v8491_v49 = vmul.f32 0.03125, %v2872_v0  ;;  %v3373_v59 = vadd.f32 %v8317_v21, %v3335_v27 }
 0x584   :  { %6341 = vrsqrt.f32 %v3233_v53  ;;  %v3372_v34 = vadd.f32 %v8317_v21, %v3334_v15  ;;  %v3133_v35 = vmul.f32 %v8488_v54, %v8488_v54 }
 0x585   :  { %6343 = vrsqrt.f32 %v3232_v10  ;;  %v3045_v16 = vpop.xlane.xlu1 %3044  ;;  %v3132_v60 = vmul.f32 %v8491_v49, %v8491_v49 }
 0x586   :  { %v6338_v40 = vpop.eup %6337  ;;  %v3099_v3 = vmul.f32 0.03125, %v3045_v16  ;;  %5844 = vmatprep.mubr.msk.f32.mxu1 %vm420_vm3, %v3372_v34  ;;  %v3042_v18 = vpop.xlane.xlu0 %3041 }
 0x587   :  { %v6340_v26 = vpop.eup %6339  ;;  %v3098_v33 = vmul.f32 0.03125, %v3042_v18  ;;  %v5772_v17 = vpop.f32.mrb[76].mxu0  ;;  %5845 = vmatmul.mubr.msk.f32.gmra.mrb[86].mxu1 %vm420_vm3, %v3373_v59  ;;  %v3299_v44 = vmul.f32 %v6338_v40, %v3197_v29 }
 0x588   :  { %v3167_v45 = vsub.f32 %v3099_v3, %v3133_v35  ;;  %2775 = vst.msk [vmem:[%s9220_s10 + $0x38] sm:$0xff] %vm420_vm3, %v5772_v17  ;;  %v2629_v56 = vpop.f32.mrb[77].mxu0  ;;  %v3298_v42 = vmul.f32 %v6340_v26, %v3196_v61  ;;  %v3199_v61 = vsub.f32 %v8138_v46, %v8462_v52  ;;  %v3198_v26 = vsub.f32 %v8142_v47, %v8465_v37 }
 0x589   :  { %v3166_v27 = vsub.f32 %v3098_v33, %v3132_v60  ;;  %2774 = vst.msk [vmem:[%s9220_s10 + $0x30] sm:$0xff] %vm420_vm3, %v2629_v56  ;;  %v2881_v53 = vpop.xlane.xlu1 %2880  ;;  %v3337_v0 = vmul.f32 %v8308_v9, %v3299_v44 }
 0x58a   :  { %v3235_v15 = vadd.f32 1e-05, %v3167_v45  ;;  %v8514_v10 = vmul.f32 0.03125, %v2881_v53  ;;  %v2878_v34 = vpop.xlane.xlu0 %2877  ;;  %v3336_v29 = vmul.f32 %v8308_v9, %v3298_v42 }
 0x58b   :  { %v3234_v16 = vadd.f32 1e-05, %v3166_v27  ;;  %v8517_v59 = vmul.f32 0.03125, %v2878_v34  ;;  %v3375_v3 = vadd.f32 %v8317_v21, %v3337_v0 }
 0x58c   :  { %6345 = vrsqrt.f32 %v3235_v15  ;;  %v3374_v40 = vadd.f32 %v8317_v21, %v3336_v29  ;;  %v3135_v60 = vmul.f32 %v8514_v10, %v8514_v10 }
 0x58d   :  { %6347 = vrsqrt.f32 %v3234_v16  ;;  %v3051_v35 = vpop.xlane.xlu1 %3050  ;;  %v3134_v45 = vmul.f32 %v8517_v59, %v8517_v59 }
 0x58e   :  { %v6342_v18 = vpop.eup %6341  ;;  %v3101_v33 = vmul.f32 0.03125, %v3051_v35  ;;  %5847 = vmatprep.mubr.msk.f32.mxu1 %vm420_vm3, %v3374_v40  ;;  %v3048_v17 = vpop.xlane.xlu0 %3047 }
 0x58f   :  { %v6344_v44 = vpop.eup %6343  ;;  %v3100_v52 = vmul.f32 0.03125, %v3048_v17  ;;  %v5775_v56 = vpop.f32.mrb[78].mxu0  ;;  %5848 = vmatmul.mubr.msk.f32.gmra.mrb[88].mxu1 %vm420_vm3, %v3375_v3  ;;  %v3301_v42 = vmul.f32 %v6342_v18, %v3199_v61 }
 0x590   :  { %v3169_v27 = vsub.f32 %v3101_v33, %v3135_v60  ;;  %2777 = vst.msk [vmem:[%s9220_s10 + $0x48] sm:$0xff] %vm420_vm3, %v5775_v56  ;;  %v2639_v37 = vpop.f32.mrb[79].mxu0  ;;  %v3300_v53 = vmul.f32 %v6344_v44, %v3198_v26  ;;  %v3201_v26 = vsub.f32 %v8160_v30, %v8488_v54  ;;  %v3200_v44 = vsub.f32 %v8164_v32, %v8491_v49 }
 0x591   :  { %v3168_v0 = vsub.f32 %v3100_v52, %v3134_v45  ;;  %2776 = vst.msk [vmem:[%s9220_s10 + $0x40] sm:$0xff] %vm420_vm3, %v2639_v37  ;;  %v2887_v15 = vpop.xlane.xlu1 %2886  ;;  %v3339_v34 = vmul.f32 %v8308_v9, %v3301_v42 }
 0x592   :  { %v3237_v29 = vadd.f32 1e-05, %v3169_v27  ;;  %v8540_v16 = vmul.f32 0.03125, %v2887_v15  ;;  %v2884_v40 = vpop.xlane.xlu0 %2883  ;;  %v3338_v61 = vmul.f32 %v8308_v9, %v3300_v53 }
 0x593   :  { %v3236_v35 = vadd.f32 1e-05, %v3168_v0  ;;  %v8543_v3 = vmul.f32 0.03125, %v2884_v40  ;;  %v3377_v33 = vadd.f32 %v8317_v21, %v3339_v34 }
 0x594   :  { %6349 = vrsqrt.f32 %v3237_v29  ;;  %v3376_v18 = vadd.f32 %v8317_v21, %v3338_v61  ;;  %v3137_v45 = vmul.f32 %v8540_v16, %v8540_v16 }
 0x595   :  { %6351 = vrsqrt.f32 %v3236_v35  ;;  %v3057_v60 = vpop.xlane.xlu1 %3056  ;;  %v3136_v27 = vmul.f32 %v8543_v3, %v8543_v3 }
 0x596   :  { %v6346_v17 = vpop.eup %6345  ;;  %v3103_v52 = vmul.f32 0.03125, %v3057_v60  ;;  %5850 = vmatprep.mubr.msk.f32.mxu1 %vm420_vm3, %v3376_v18  ;;  %v3054_v56 = vpop.xlane.xlu0 %3053 }
 0x597   :  { %v6348_v42 = vpop.eup %6347  ;;  %v3102_v54 = vmul.f32 0.03125, %v3054_v56  ;;  %v5778_v37 = vpop.f32.mrb[80].mxu0  ;;  %5851 = vmatmul.mubr.msk.f32.gmra.mrb[90].mxu1 %vm420_vm3, %v3377_v33  ;;  %v3303_v53 = vmul.f32 %v6346_v17, %v3201_v26 }
 0x598   :  { %v3171_v0 = vsub.f32 %v3103_v52, %v3137_v45  ;;  %2779 = vst.msk [vmem:[%s9220_s10 + $0x58] sm:$0xff] %vm420_vm3, %v5778_v37  ;;  %v2649_v49 = vpop.f32.mrb[81].mxu0  ;;  %v3302_v15 = vmul.f32 %v6348_v42, %v3200_v44  ;;  %v3203_v44 = vsub.f32 %v8182_v39, %v8514_v10  ;;  %v3202_v42 = vsub.f32 %v8186_v58, %v8517_v59 }
 0x599   :  { %v3170_v34 = vsub.f32 %v3102_v54, %v3136_v27  ;;  %2778 = vst.msk [vmem:[%s9220_s10 + $0x50] sm:$0xff] %vm420_vm3, %v2649_v49  ;;  %v2893_v29 = vpop.xlane.xlu1 %2892  ;;  %v3341_v40 = vmul.f32 %v8308_v9, %v3303_v53 }
 0x59a   :  { %v3239_v61 = vadd.f32 1e-05, %v3171_v0  ;;  %v8566_v35 = vmul.f32 0.03125, %v2893_v29  ;;  %v2890_v18 = vpop.xlane.xlu0 %2889  ;;  %v3340_v26 = vmul.f32 %v8308_v9, %v3302_v15 }
 0x59b   :  { %v3238_v60 = vadd.f32 1e-05, %v3170_v34  ;;  %v8569_v33 = vmul.f32 0.03125, %v2890_v18  ;;  %v3379_v52 = vadd.f32 %v8317_v21, %v3341_v40 }
 0x59c   :  { %6353 = vrsqrt.f32 %v3239_v61  ;;  %v3378_v17 = vadd.f32 %v8317_v21, %v3340_v26  ;;  %v3139_v27 = vmul.f32 %v8566_v35, %v8566_v35 }
 0x59d   :  { %6355 = vrsqrt.f32 %v3238_v60  ;;  %v3063_v45 = vpop.xlane.xlu1 %3062  ;;  %v3138_v0 = vmul.f32 %v8569_v33, %v8569_v33 }
 0x59e   :  { %v6350_v56 = vpop.eup %6349  ;;  %v3105_v54 = vmul.f32 0.03125, %v3063_v45  ;;  %5853 = vmatprep.mubr.msk.f32.mxu1 %vm420_vm3, %v3378_v17  ;;  %v3060_v37 = vpop.xlane.xlu0 %3059 }
 0x59f   :  { %v6352_v53 = vpop.eup %6351  ;;  %v3104_v10 = vmul.f32 0.03125, %v3060_v37  ;;  %v5781_v49 = vpop.f32.mrb[82].mxu0  ;;  %5854 = vmatmul.mubr.msk.f32.gmra.mrb[92].mxu1 %vm420_vm3, %v3379_v52  ;;  %v3305_v15 = vmul.f32 %v6350_v56, %v3203_v44 }
 0x5a0   :  { %v3173_v34 = vsub.f32 %v3105_v54, %v3139_v27  ;;  %2781 = vst.msk [vmem:[%s9220_s10 + $0x68] sm:$0xff] %vm420_vm3, %v5781_v49  ;;  %v2659_v59 = vpop.f32.mrb[83].mxu0  ;;  %v3304_v29 = vmul.f32 %v6352_v53, %v3202_v42  ;;  %v3205_v42 = vsub.f32 %v8204_v51, %v8540_v16  ;;  %v3204_v53 = vsub.f32 %v8208_v1, %v8543_v3 }
 0x5a1   :  { %v3172_v40 = vsub.f32 %v3104_v10, %v3138_v0  ;;  %2780 = vst.msk [vmem:[%s9220_s10 + $0x60] sm:$0xff] %vm420_vm3, %v2659_v59  ;;  %v2899_v61 = vpop.xlane.xlu1 %2898  ;;  %v3343_v18 = vmul.f32 %v8308_v9, %v3305_v15 }
 0x5a2   :  { %v3241_v26 = vadd.f32 1e-05, %v3173_v34  ;;  %v8592_v60 = vmul.f32 0.03125, %v2899_v61  ;;  %v2896_v17 = vpop.xlane.xlu0 %2895  ;;  %v3342_v44 = vmul.f32 %v8308_v9, %v3304_v29 }
 0x5a3   :  { %v3240_v45 = vadd.f32 1e-05, %v3172_v40  ;;  %v8595_v52 = vmul.f32 0.03125, %v2896_v17  ;;  %v3381_v54 = vadd.f32 %v8317_v21, %v3343_v18 }
 0x5a4   :  { %6357 = vrsqrt.f32 %v3241_v26  ;;  %v3380_v56 = vadd.f32 %v8317_v21, %v3342_v44  ;;  %v3141_v0 = vmul.f32 %v8592_v60, %v8592_v60  ;;  %v5045_v44 = vld [vmem:[%s9216_s6 + $0x40] sm:$0xff] }
 0x5a5   :  { %6359 = vrsqrt.f32 %v3240_v45  ;;  %v3069_v27 = vpop.xlane.xlu1 %3068  ;;  %v3140_v34 = vmul.f32 %v8595_v52, %v8595_v52  ;;  %v5046_v45 = vld [vmem:[%s9216_s6 + $0x48] sm:$0xff] }
 0x5a6   :  { %v6354_v37 = vpop.eup %6353  ;;  %v3107_v10 = vmul.f32 0.03125, %v3069_v27  ;;  %5856 = vmatprep.mubr.msk.f32.mxu1 %vm420_vm3, %v3380_v56  ;;  %v3066_v49 = vpop.xlane.xlu0 %3065 }
 0x5a7   :  { %v6356_v15 = vpop.eup %6355  ;;  %v3106_v16 = vmul.f32 0.03125, %v3066_v49  ;;  %v5784_v59 = vpop.f32.mrb[84].mxu0  ;;  %5857 = vmatmul.mubr.msk.f32.gmra.mrb[94].mxu1 %vm420_vm3, %v3381_v54  ;;  %v3307_v29 = vmul.f32 %v6354_v37, %v3205_v42  ;;  %v6065_v37 = vpack.c.bf16 %v5046_v45, %v5045_v44  ;;  %v3207_v49 = vsub.f32 %v8226_v63, %v8566_v35 }
 0x5a8   :  { %v3175_v40 = vsub.f32 %v3107_v10, %v3141_v0  ;;  %2783 = vst.msk [vmem:[%s9220_s10 + $0x78] sm:$0xff] %vm420_vm3, %v5784_v59  ;;  %v2669_v3 = vpop.f32.mrb[85].mxu0  ;;  %v3306_v61 = vmul.f32 %v6356_v15, %v3204_v53  ;;  %v5048_v59 = vld [vmem:[%s9216_s6 + $0x58] sm:$0xff] }
 0x5a9   :  { %v3174_v18 = vsub.f32 %v3106_v16, %v3140_v34  ;;  %2782 = vst.msk [vmem:[%s9220_s10 + $0x70] sm:$0xff] %vm420_vm3, %v2669_v3  ;;  %v2905_v26 = vpop.xlane.xlu1 %2904  ;;  %v3345_v17 = vmul.f32 %v8308_v9, %v3307_v29  ;;  %6066 = vmatprep.subr.bf16.mxu0 %v6065_v37  ;;  %v5047_v16 = vld [vmem:[%s9216_s6 + $0x50] sm:$0xff] }
 0x5aa   :  { %v3243_v56 = vadd.f32 1e-05, %v3175_v40  ;;  %v8624_v42 = vmul.f32 0.03125, %v2905_v26  ;;  %v2902_v27 = vpop.xlane.xlu0 %2901  ;;  %v3344_v54 = vmul.f32 %v8308_v9, %v3306_v61  ;;  %6068 = vmatpush3.bf16.msra.mxu0 %v6065_v37  ;;  %v3206_v40 = vsub.f32 %v8230_v8, %v8569_v33 }
 0x5ab   :  { %v3242_v53 = vadd.f32 1e-05, %v3174_v18  ;;  %v8627_v0 = vmul.f32 0.03125, %v2902_v27  ;;  %v3383_v34 = vadd.f32 %v8317_v21, %v3345_v17  ;;  %v6069_v18 = vpack.c.bf16 %v5048_v59, %v5047_v16 }
 0x5ac   :  { %6361 = vrsqrt.f32 %v3243_v56  ;;  %v3382_v10 = vadd.f32 %v8317_v21, %v3344_v54  ;;  %v3143_v35 = vmul.f32 %v8624_v42, %v8624_v42 }
 0x5ad   :  { %6363 = vrsqrt.f32 %v3242_v53  ;;  %v3075_v15 = vpop.xlane.xlu1 %3074  ;;  %v3142_v17 = vmul.f32 %v8627_v0, %v8627_v0  ;;  %6070 = vmatprep.subr.bf16.mxu0 %v6069_v18 }
 0x5ae   :  { %v6358_v29 = vpop.eup %6357  ;;  %v3109_v3 = vmul.f32 0.03125, %v3075_v15  ;;  %5859 = vmatprep.mubr.msk.f32.mxu1 %vm420_vm3, %v3382_v10  ;;  %v3072_v61 = vpop.xlane.xlu0 %3071  ;;  %6072 = vmatpush3.bf16.msra.mxu0 %v6069_v18  ;;  %v5049_v10 = vld [vmem:[%s9216_s6 + $0x60] sm:$0xff] }
 0x5af   :  { %v6360_v26 = vpop.eup %6359  ;;  %v3108_v44 = vmul.f32 0.03125, %v3072_v61  ;;  %v5787_v45 = vpop.f32.mrb[86].mxu0  ;;  %5860 = vmatmul.mubr.msk.f32.gmra.mrb[96].mxu1 %vm420_vm3, %v3383_v34  ;;  %v3309_v56 = vmul.f32 %v6358_v29, %v3207_v49  ;;  %v5050_v49 = vld [vmem:[%s9216_s6 + $0x68] sm:$0xff]  ;;  %v5052_v61 = vld [vmem:[%s9216_s6 + $0x78] sm:$0xff] }
 0x5b0   :  { %v3177_v27 = vsub.f32 %v3109_v3, %v3143_v35  ;;  %2785 = vst.msk [vmem:[%s9220_s10 + $0x88] sm:$0xff] %vm420_vm3, %v5787_v45  ;;  %v2679_v33 = vpop.f32.mrb[87].mxu0  ;;  %v3308_v54 = vmul.f32 %v6360_v26, %v3206_v40  ;;  %v6073_v16 = vpack.c.bf16 %v5050_v49, %v5049_v10  ;;  %v3209_v40 = vsub.f32 %v8248_v36, %v8592_v60  ;;  %v5051_v3 = vld [vmem:[%s9216_s6 + $0x70] sm:$0xff] }
 0x5b1   :  { %v3176_v37 = vsub.f32 %v3108_v44, %v3142_v17  ;;  %2784 = vst.msk [vmem:[%s9220_s10 + $0x80] sm:$0xff] %vm420_vm3, %v2679_v33  ;;  %v3347_v53 = vmul.f32 %v8308_v9, %v3309_v56  ;;  %v3208_v26 = vsub.f32 %v8252_v12, %v8595_v52  ;;  %v6077_v17 = vpack.c.bf16 %v5052_v61, %v5051_v3 }
 0x5b2   :  { %v3245_v15 = vadd.f32 1e-05, %v3177_v27  ;;  %v3346_v34 = vmul.f32 %v8308_v9, %v3308_v54  ;;  %6074 = vmatprep.subr.bf16.mxu0 %v6073_v16  ;;  %v3210_v49 = vsub.f32 %v8274_v50, %v8627_v0 }
 0x5b3   :  { %v3244_v59 = vadd.f32 1e-05, %v3176_v37  ;;  %v3385_v35 = vadd.f32 %v8317_v21, %v3347_v53  ;;  %6076 = vmatpush3.bf16.msra.mxu0 %v6073_v16  ;;  %v3211_v37 = vsub.f32 %v8270_v43, %v8624_v42 }
 0x5b4   :  { %6365 = vrsqrt.f32 %v3245_v15  ;;  %v3384_v29 = vadd.f32 %v8317_v21, %v3346_v34  ;;  %6078 = vmatprep.subr.bf16.mxu0 %v6077_v17 }
 0x5b5   :  { %6367 = vrsqrt.f32 %v3244_v59 }
 0x5b6   :  { %v6362_v18 = vpop.eup %6361  ;;  %5862 = vmatprep.mubr.msk.f32.mxu1 %vm420_vm3, %v3384_v29 }
 0x5b7   :  { %v6364_v60 = vpop.eup %6363  ;;  %v5790_v44 = vpop.f32.mrb[88].mxu0  ;;  %5863 = vmatmul.mubr.msk.f32.gmra.mrb[98].mxu1 %vm420_vm3, %v3385_v35  ;;  %v3311_v45 = vmul.f32 %v6362_v18, %v3209_v40  ;;  %6080 = vmatpush3.bf16.msra.mxu0 %v6077_v17 }
 0x5b8   :  { %2787 = vst.msk [vmem:[%s9220_s10 + $0x98] sm:$0xff] %vm420_vm3, %v5790_v44  ;;  %v2689_v56 = vpop.f32.mrb[89].mxu0  ;;  %v3310_v27 = vmul.f32 %v6364_v60, %v3208_v26 }
 0x5b9   :  { %2786 = vst.msk [vmem:[%s9220_s10 + $0x90] sm:$0xff] %vm420_vm3, %v2689_v56  ;;  %v3349_v52 = vmul.f32 %v8308_v9, %v3311_v45 }
 0x5ba   :  { %v3348_v33 = vmul.f32 %v8308_v9, %v3310_v27 }
 0x5bb   :  { %v3387_v53 = vadd.f32 %v8317_v21, %v3349_v52  ;;  %v8760_v52 = vld [vmem:[%s9214_s4 + $0x4] sm:$0xf] }
 0x5bc   :  { %v3386_v54 = vadd.f32 %v8317_v21, %v3348_v33  ;;  %v8765_v33 = vrot.slane %v8760_v52, %v1466_v11 }
 0x5be   :  { %v6366_v10 = vpop.eup %6365  ;;  %5865 = vmatprep.mubr.msk.f32.mxu1 %vm420_vm3, %v3386_v54 }
 0x5bf   :  { %v6368_v15 = vpop.eup %6367  ;;  %v5793_v34 = vpop.f32.mrb[90].mxu0  ;;  %5866 = vmatmul.mubr.msk.f32.gmra.mrb[100].mxu1 %vm420_vm3, %v3387_v53  ;;  %v3313_v16 = vmul.f32 %v6366_v10, %v3211_v37 }
 0x5c0   :  { %2789 = vst.msk [vmem:[%s9220_s10 + $0xa8] sm:$0xff] %vm420_vm3, %v5793_v34  ;;  %v2699_v59 = vpop.f32.mrb[91].mxu0  ;;  %v3312_v42 = vmul.f32 %v6368_v15, %v3210_v49 }
 0x5c1   :  { %2788 = vst.msk [vmem:[%s9220_s10 + $0xa0] sm:$0xff] %vm420_vm3, %v2699_v59  ;;  %v3351_v0 = vmul.f32 %v8308_v9, %v3313_v16 }
 0x5c2   :  { %v3350_v29 = vmul.f32 %v8308_v9, %v3312_v42 }
 0x5c3   :  { %v3389_v35 = vadd.f32 %v8317_v21, %v3351_v0 }
 0x5c4   :  { %v3388_v40 = vadd.f32 %v8317_v21, %v3350_v29 }
 0x5c6   :  { %5868 = vmatprep.mubr.msk.f32.mxu1 %vm420_vm3, %v3388_v40 }
 0x5c7   :  { %v5796_v3 = vpop.f32.mrb[92].mxu0  ;;  %5869 = vmatmul.mubr.msk.f32.gmra.mrb[102].mxu1 %vm420_vm3, %v3389_v35 }
 0x5c8   :  { %2791 = vst.msk [vmem:[%s9220_s10 + $0xb8] sm:$0xff] %vm420_vm3, %v5796_v3  ;;  %v2709_v61 = vpop.f32.mrb[93].mxu0 }
 0x5c9   :  { %2790 = vst.msk [vmem:[%s9220_s10 + $0xb0] sm:$0xff] %vm420_vm3, %v2709_v61 }
 0x5cf   :  { %v5799_v9 = vpop.f32.mrb[94].mxu0 }
 0x5d0   :  { %2793 = vst.msk [vmem:[%s9220_s10 + $0xc8] sm:$0xff] %vm420_vm3, %v5799_v9  ;;  %v2719_v21 = vpop.f32.mrb[95].mxu0 }
 0x5d1   :  { %2792 = vst.msk [vmem:[%s9220_s10 + $0xc0] sm:$0xff] %vm420_vm3, %v2719_v21 }
 0x5d7   :  { %v5802_v18 = vpop.f32.mrb[96].mxu0 }
 0x5d8   :  { %2795 = vst.msk [vmem:[%s9220_s10 + $0xd8] sm:$0xff] %vm420_vm3, %v5802_v18  ;;  %v2729_v26 = vpop.f32.mrb[97].mxu0 }
 0x5d9   :  { %2794 = vst.msk [vmem:[%s9220_s10 + $0xd0] sm:$0xff] %vm420_vm3, %v2729_v26 }
 0x5df   :  { %v5805_v17 = vpop.f32.mrb[98].mxu0 }
 0x5e0   :  { %2797 = vst.msk [vmem:[%s9220_s10 + $0xe8] sm:$0xff] %vm420_vm3, %v5805_v17  ;;  %v2739_v60 = vpop.f32.mrb[99].mxu0 }
 0x5e1   :  { %2796 = vst.msk [vmem:[%s9220_s10 + $0xe0] sm:$0xff] %vm420_vm3, %v2739_v60 }
 0x5e7   :  { %v5808_v44 = vpop.f32.mrb[100].mxu0 }
 0x5e8   :  { %2799 = vst.msk [vmem:[%s9220_s10 + $0xf8] sm:$0xff] %vm420_vm3, %v5808_v44  ;;  %v2749_v45 = vpop.f32.mrb[101].mxu0 }
 0x5e9   :  { %2798 = vst.msk [vmem:[%s9220_s10 + $0xf0] sm:$0xff] %vm420_vm3, %v2749_v45 }
 0x5ef   :  { %v5811_v56 = vpop.f32.mrb[102].mxu0 }
 0x5f0   :  { %2801 = vst.msk [vmem:[%s9220_s10 + $0x108] sm:$0xff] %vm420_vm3, %v5811_v56  ;;  %v2759_v27 = vpop.f32.mrb[103].mxu0 }
 0x5f1   :  { %2800 = vst.msk [vmem:[%s9220_s10 + $0x100] sm:$0xff] %vm420_vm3, %v2759_v27 }
 0x61a   :  { %v5822_v54 = vpop.f32.mrb[70].mxu1 }
 0x61b   :  { %v3573_v37 = vadd.f32 %v5822_v54, %v8765_v33  ;;  %v3567_v53 = vpop.f32.mrb[71].mxu1 }
 0x61c   :  { %v3568_v10 = vadd.f32 %v3567_v53, %v8765_v33 }
 0x61d   :  { %v5012_v49 = vmul.f32 -1.442695, %v3573_v37 }
 0x61e   :  { %v5011_v15 = vmul.f32 -1.442695, %v3568_v10 }
 0x61f   :  { %6369 = vpow2.f32 %v5012_v49 }
 0x620   :  { %6371 = vpow2.f32 %v5011_v15 }
 0x622   :  { %v5825_v34 = vpop.f32.mrb[72].mxu1 }
 0x623   :  { %v8770_v16 = vadd.f32 %v5825_v34, %v8765_v33  ;;  %v3577_v59 = vpop.f32.mrb[73].mxu1 }
 0x624   :  { %v3578_v42 = vadd.f32 %v3577_v59, %v8765_v33 }
 0x625   :  { %v5014_v11 = vmul.f32 -1.442695, %v8770_v16 }
 0x626   :  { %v5013_v0 = vmul.f32 -1.442695, %v3578_v42 }
 0x627   :  { %6373 = vpow2.f32 %v5014_v11 }
 0x628   :  { %6375 = vpow2.f32 %v5013_v0 }
 0x629   :  { %v6370_v29 = vpop.eup %6369 }
 0x62a   :  { %v6372_v40 = vpop.eup %6371  ;;  %v3839_v35 = vadd.f32 1.0, %v6370_v29  ;;  %v5828_v3 = vpop.f32.mrb[74].mxu1 }
 0x62b   :  { %v3838_v61 = vadd.f32 1.0, %v6372_v40  ;;  %v8775_v9 = vadd.f32 %v5828_v3, %v8765_v33  ;;  %v3587_v21 = vpop.f32.mrb[75].mxu1 }
 0x62c   :  { %6377 = vrcp.f32 %v3839_v35  ;;  %v8778_v18 = vadd.f32 %v3587_v21, %v8765_v33 }
 0x62d   :  { %6379 = vrcp.f32 %v3838_v61  ;;  %v5016_v26 = vmul.f32 -1.442695, %v8775_v9 }
 0x62e   :  { %v5015_v17 = vmul.f32 -1.442695, %v8778_v18 }
 0x62f   :  { %6381 = vpow2.f32 %v5016_v26 }
 0x630   :  { %6383 = vpow2.f32 %v5015_v17 }
 0x631   :  { %v6374_v60 = vpop.eup %6373 }
 0x632   :  { %v6376_v44 = vpop.eup %6375  ;;  %v3841_v45 = vadd.f32 1.0, %v6374_v60  ;;  %v5831_v56 = vpop.f32.mrb[76].mxu1  ;;  %v5087_v60 = vld [vmem:[%s9217_s7 + $0x20] sm:$0xff] }
 0x633   :  { %v3840_v27 = vadd.f32 1.0, %v6376_v44  ;;  %v8783_v54 = vadd.f32 %v5831_v56, %v8765_v33  ;;  %v3597_v53 = vpop.f32.mrb[77].mxu1 }
 0x634   :  { %6385 = vrcp.f32 %v3841_v45  ;;  %v8786_v49 = vadd.f32 %v3597_v53, %v8765_v33 }
 0x635   :  { %6387 = vrcp.f32 %v3840_v27  ;;  %v5018_v15 = vmul.f32 -1.442695, %v8783_v54 }
 0x636   :  { %v6378_v34 = vpop.eup %6377  ;;  %v5017_v59 = vmul.f32 -1.442695, %v8786_v49 }
 0x637   :  { %v6380_v11 = vpop.eup %6379  ;;  %6389 = vpow2.f32 %v5018_v15  ;;  %v3941_v40 = vmul.f32 %v6378_v34, %v3573_v37  ;;  %v5088_v37 = vld [vmem:[%s9217_s7 + $0x28] sm:$0xff] }
 0x638   :  { %v3940_v0 = vmul.f32 %v6380_v11, %v3568_v10  ;;  %6391 = vpow2.f32 %v5017_v59  ;;  %v6081_v44 = vpack.c.bf16 %v5088_v37, %v5087_v60 }
 0x639   :  { %v6382_v29 = vpop.eup %6381 }
 0x63a   :  { %v6384_v35 = vpop.eup %6383  ;;  %v3843_v3 = vadd.f32 1.0, %v6382_v29  ;;  %v5834_v61 = vpop.f32.mrb[78].mxu1  ;;  %5887 = vmatprep.mubr.msk.f32.mxu0 %vm2055_vm5, %v3940_v0  ;;  %6082 = vmatprep.subr.bf16.mxu1 %v6081_v44 }
 0x63b   :  { %v3842_v21 = vadd.f32 1.0, %v6384_v35  ;;  %v8792_v26 = vadd.f32 %v5834_v61, %v8765_v33  ;;  %v3607_v17 = vpop.f32.mrb[79].mxu1  ;;  %5888 = vmatmul.mubr.msk.f32.vlgmr.msra.gmra.mrb[104].mxu0 %vm2055_vm5, %v3941_v40  ;;  %6084 = vmatpush3.bf16.msra.mxu1 %v6081_v44 }
 0x63c   :  { %6393 = vrcp.f32 %v3843_v3  ;;  %v8802_v10 = vadd.f32 %v3607_v17, %v8765_v33 }
 0x63d   :  { %6395 = vrcp.f32 %v3842_v21  ;;  %v5020_v45 = vmul.f32 -1.442695, %v8792_v26 }
 0x63e   :  { %v6386_v56 = vpop.eup %6385  ;;  %v5019_v27 = vmul.f32 -1.442695, %v8802_v10 }
 0x63f   :  { %v6388_v53 = vpop.eup %6387  ;;  %6397 = vpow2.f32 %v5020_v45  ;;  %v3943_v59 = vmul.f32 %v6386_v56, %v8770_v16 }
 0x640   :  { %v3942_v15 = vmul.f32 %v6388_v53, %v3578_v42  ;;  %6399 = vpow2.f32 %v5019_v27 }
 0x641   :  { %v6390_v34 = vpop.eup %6389 }
 0x642   :  { %v6392_v11 = vpop.eup %6391  ;;  %v3845_v0 = vadd.f32 1.0, %v6390_v34  ;;  %v5837_v29 = vpop.f32.mrb[80].mxu1  ;;  %5890 = vmatprep.mubr.msk.f32.mxu0 %vm2055_vm5, %v3942_v15 }
 0x643   :  { %v3844_v40 = vadd.f32 1.0, %v6392_v11  ;;  %v8809_v35 = vadd.f32 %v5837_v29, %v8765_v33  ;;  %v3617_v3 = vpop.f32.mrb[81].mxu1  ;;  %5891 = vmatmul.mubr.msk.f32.gmra.mrb[106].mxu0 %vm2055_vm5, %v3943_v59 }
 0x644   :  { %6401 = vrcp.f32 %v3845_v0  ;;  %v8813_v61 = vadd.f32 %v3617_v3, %v8765_v33 }
 0x645   :  { %6403 = vrcp.f32 %v3844_v40  ;;  %v5022_v42 = vmul.f32 -1.442695, %v8809_v35 }
 0x646   :  { %v6394_v16 = vpop.eup %6393  ;;  %v5021_v21 = vmul.f32 -1.442695, %v8813_v61 }
 0x647   :  { %v6396_v17 = vpop.eup %6395  ;;  %6405 = vpow2.f32 %v5022_v42  ;;  %v3945_v44 = vmul.f32 %v6394_v16, %v8775_v9 }
 0x648   :  { %v3944_v60 = vmul.f32 %v6396_v17, %v8778_v18  ;;  %6407 = vpow2.f32 %v5021_v21 }
 0x649   :  { %v6398_v37 = vpop.eup %6397 }
 0x64a   :  { %v6400_v45 = vpop.eup %6399  ;;  %v3847_v56 = vadd.f32 1.0, %v6398_v37  ;;  %v5840_v27 = vpop.f32.mrb[82].mxu1  ;;  %5893 = vmatprep.mubr.msk.f32.mxu0 %vm2055_vm5, %v3944_v60 }
 0x64b   :  { %v3846_v53 = vadd.f32 1.0, %v6400_v45  ;;  %v8821_v15 = vadd.f32 %v5840_v27, %v8765_v33  ;;  %v3627_v34 = vpop.f32.mrb[83].mxu1  ;;  %5894 = vmatmul.mubr.msk.f32.gmra.mrb[108].mxu0 %vm2055_vm5, %v3945_v44 }
 0x64c   :  { %6409 = vrcp.f32 %v3847_v56  ;;  %v8825_v59 = vadd.f32 %v3627_v34, %v8765_v33 }
 0x64d   :  { %6411 = vrcp.f32 %v3846_v53  ;;  %v5024_v18 = vmul.f32 -1.442695, %v8821_v15 }
 0x64e   :  { %v6402_v9 = vpop.eup %6401  ;;  %v5023_v11 = vmul.f32 -1.442695, %v8825_v59 }
 0x64f   :  { %v6404_v0 = vpop.eup %6403  ;;  %6413 = vpow2.f32 %v5024_v18  ;;  %v3947_v3 = vmul.f32 %v6402_v9, %v8783_v54 }
 0x650   :  { %v3946_v29 = vmul.f32 %v6404_v0, %v8786_v49  ;;  %6415 = vpow2.f32 %v5023_v11 }
 0x651   :  { %v6406_v40 = vpop.eup %6405 }
 0x652   :  { %v6408_v42 = vpop.eup %6407  ;;  %v3849_v16 = vadd.f32 1.0, %v6406_v40  ;;  %v5843_v21 = vpop.f32.mrb[84].mxu1  ;;  %5896 = vmatprep.mubr.msk.f32.mxu0 %vm2055_vm5, %v3946_v29 }
 0x653   :  { %v3848_v17 = vadd.f32 1.0, %v6408_v42  ;;  %v8833_v60 = vadd.f32 %v5843_v21, %v8765_v33  ;;  %v3637_v37 = vpop.f32.mrb[85].mxu1  ;;  %5897 = vmatmul.mubr.msk.f32.gmra.mrb[110].mxu0 %vm2055_vm5, %v3947_v3 }
 0x654   :  { %6417 = vrcp.f32 %v3849_v16  ;;  %v8837_v44 = vadd.f32 %v3637_v37, %v8765_v33 }
 0x655   :  { %6419 = vrcp.f32 %v3848_v17  ;;  %v5026_v49 = vmul.f32 -1.442695, %v8833_v60 }
 0x656   :  { %v6410_v54 = vpop.eup %6409  ;;  %v5025_v45 = vmul.f32 -1.442695, %v8837_v44 }
 0x657   :  { %v6412_v56 = vpop.eup %6411  ;;  %6421 = vpow2.f32 %v5026_v49  ;;  %v3949_v34 = vmul.f32 %v6410_v54, %v8792_v26 }
 0x658   :  { %v3948_v27 = vmul.f32 %v6412_v56, %v8802_v10  ;;  %6423 = vpow2.f32 %v5025_v45 }
 0x659   :  { %v6414_v53 = vpop.eup %6413 }
 0x65a   :  { %v6416_v18 = vpop.eup %6415  ;;  %v3851_v9 = vadd.f32 1.0, %v6414_v53  ;;  %v5846_v11 = vpop.f32.mrb[86].mxu1  ;;  %5899 = vmatprep.mubr.msk.f32.mxu0 %vm2055_vm5, %v3948_v27 }
 0x65b   :  { %v3850_v0 = vadd.f32 1.0, %v6416_v18  ;;  %v8845_v29 = vadd.f32 %v5846_v11, %v8765_v33  ;;  %v3647_v40 = vpop.f32.mrb[87].mxu1  ;;  %5900 = vmatmul.mubr.msk.f32.gmra.mrb[112].mxu0 %vm2055_vm5, %v3949_v34 }
 0x65c   :  { %6425 = vrcp.f32 %v3851_v9  ;;  %v8849_v3 = vadd.f32 %v3647_v40, %v8765_v33 }
 0x65d   :  { %6427 = vrcp.f32 %v3850_v0  ;;  %v5028_v10 = vmul.f32 -1.442695, %v8845_v29 }
 0x65e   :  { %v6418_v26 = vpop.eup %6417  ;;  %v5027_v42 = vmul.f32 -1.442695, %v8849_v3 }
 0x65f   :  { %v6420_v16 = vpop.eup %6419  ;;  %6429 = vpow2.f32 %v5028_v10  ;;  %v3951_v37 = vmul.f32 %v6418_v26, %v8809_v35 }
 0x660   :  { %v3950_v21 = vmul.f32 %v6420_v16, %v8813_v61  ;;  %6431 = vpow2.f32 %v5027_v42 }
 0x661   :  { %v6422_v17 = vpop.eup %6421 }
 0x662   :  { %v6424_v49 = vpop.eup %6423  ;;  %v3853_v54 = vadd.f32 1.0, %v6422_v17  ;;  %v5849_v45 = vpop.f32.mrb[88].mxu1  ;;  %5902 = vmatprep.mubr.msk.f32.mxu0 %vm2055_vm5, %v3950_v21 }
 0x663   :  { %v3852_v56 = vadd.f32 1.0, %v6424_v49  ;;  %v8857_v27 = vadd.f32 %v5849_v45, %v8765_v33  ;;  %v3657_v53 = vpop.f32.mrb[89].mxu1  ;;  %5903 = vmatmul.mubr.msk.f32.gmra.mrb[114].mxu0 %vm2055_vm5, %v3951_v37 }
 0x664   :  { %6433 = vrcp.f32 %v3853_v54  ;;  %v8861_v34 = vadd.f32 %v3657_v53, %v8765_v33 }
 0x665   :  { %6435 = vrcp.f32 %v3852_v56  ;;  %v5030_v61 = vmul.f32 -1.442695, %v8857_v27 }
 0x666   :  { %v6426_v35 = vpop.eup %6425  ;;  %v5029_v18 = vmul.f32 -1.442695, %v8861_v34 }
 0x667   :  { %v6428_v9 = vpop.eup %6427  ;;  %6437 = vpow2.f32 %v5030_v61  ;;  %v3953_v40 = vmul.f32 %v6426_v35, %v8821_v15 }
 0x668   :  { %v3952_v11 = vmul.f32 %v6428_v9, %v8825_v59  ;;  %6439 = vpow2.f32 %v5029_v18 }
 0x669   :  { %v6430_v0 = vpop.eup %6429 }
 0x66a   :  { %v6432_v10 = vpop.eup %6431  ;;  %v3855_v26 = vadd.f32 1.0, %v6430_v0  ;;  %v5852_v42 = vpop.f32.mrb[90].mxu1  ;;  %5905 = vmatprep.mubr.msk.f32.mxu0 %vm2055_vm5, %v3952_v11 }
 0x66b   :  { %v3854_v16 = vadd.f32 1.0, %v6432_v10  ;;  %v8869_v21 = vadd.f32 %v5852_v42, %v8765_v33  ;;  %v3667_v17 = vpop.f32.mrb[91].mxu1  ;;  %5906 = vmatmul.mubr.msk.f32.gmra.mrb[116].mxu0 %vm2055_vm5, %v3953_v40 }
 0x66c   :  { %6441 = vrcp.f32 %v3855_v26  ;;  %v8873_v37 = vadd.f32 %v3667_v17, %v8765_v33 }
 0x66d   :  { %6443 = vrcp.f32 %v3854_v16  ;;  %v5032_v59 = vmul.f32 -1.442695, %v8869_v21 }
 0x66e   :  { %v6434_v15 = vpop.eup %6433  ;;  %v5031_v49 = vmul.f32 -1.442695, %v8873_v37 }
 0x66f   :  { %v6436_v54 = vpop.eup %6435  ;;  %6445 = vpow2.f32 %v5032_v59  ;;  %v3955_v53 = vmul.f32 %v6434_v15, %v8833_v60 }
 0x670   :  { %v3954_v45 = vmul.f32 %v6436_v54, %v8837_v44  ;;  %6447 = vpow2.f32 %v5031_v49 }
 0x671   :  { %v6438_v56 = vpop.eup %6437 }
 0x672   :  { %v6440_v61 = vpop.eup %6439  ;;  %v3857_v35 = vadd.f32 1.0, %v6438_v56  ;;  %v5855_v18 = vpop.f32.mrb[92].mxu1  ;;  %5908 = vmatprep.mubr.msk.f32.mxu0 %vm2055_vm5, %v3954_v45 }
 0x673   :  { %v3856_v9 = vadd.f32 1.0, %v6440_v61  ;;  %v8881_v11 = vadd.f32 %v5855_v18, %v8765_v33  ;;  %v3677_v0 = vpop.f32.mrb[93].mxu1  ;;  %5909 = vmatmul.mubr.msk.f32.gmra.mrb[118].mxu0 %vm2055_vm5, %v3955_v53 }
 0x674   :  { %6449 = vrcp.f32 %v3857_v35  ;;  %v8885_v40 = vadd.f32 %v3677_v0, %v8765_v33 }
 0x675   :  { %6451 = vrcp.f32 %v3856_v9  ;;  %v5034_v44 = vmul.f32 -1.442695, %v8881_v11 }
 0x676   :  { %v6442_v60 = vpop.eup %6441  ;;  %v5033_v10 = vmul.f32 -1.442695, %v8885_v40 }
 0x677   :  { %v6444_v26 = vpop.eup %6443  ;;  %6453 = vpow2.f32 %v5034_v44  ;;  %v3957_v17 = vmul.f32 %v6442_v60, %v8845_v29 }
 0x678   :  { %v3956_v42 = vmul.f32 %v6444_v26, %v8849_v3  ;;  %6455 = vpow2.f32 %v5033_v10 }
 0x679   :  { %v6446_v16 = vpop.eup %6445 }
 0x67a   :  { %v6448_v59 = vpop.eup %6447  ;;  %v3859_v15 = vadd.f32 1.0, %v6446_v16  ;;  %v5858_v49 = vpop.f32.mrb[94].mxu1  ;;  %5911 = vmatprep.mubr.msk.f32.mxu0 %vm2055_vm5, %v3956_v42 }
 0x67b   :  { %v3858_v54 = vadd.f32 1.0, %v6448_v59  ;;  %v8893_v45 = vadd.f32 %v5858_v49, %v8765_v33  ;;  %v3687_v56 = vpop.f32.mrb[95].mxu1  ;;  %5912 = vmatmul.mubr.msk.f32.gmra.mrb[120].mxu0 %vm2055_vm5, %v3957_v17 }
 0x67c   :  { %6457 = vrcp.f32 %v3859_v15  ;;  %v8897_v53 = vadd.f32 %v3687_v56, %v8765_v33 }
 0x67d   :  { %6459 = vrcp.f32 %v3858_v54  ;;  %v5036_v3 = vmul.f32 -1.442695, %v8893_v45 }
 0x67e   :  { %v6450_v29 = vpop.eup %6449  ;;  %v5035_v61 = vmul.f32 -1.442695, %v8897_v53 }
 0x67f   :  { %v6452_v35 = vpop.eup %6451  ;;  %6461 = vpow2.f32 %v5036_v3  ;;  %v3959_v0 = vmul.f32 %v6450_v29, %v8857_v27 }
 0x680   :  { %v3958_v18 = vmul.f32 %v6452_v35, %v8861_v34  ;;  %6463 = vpow2.f32 %v5035_v61 }
 0x681   :  { %v6454_v9 = vpop.eup %6453 }
 0x682   :  { %v6456_v44 = vpop.eup %6455  ;;  %v3861_v60 = vadd.f32 1.0, %v6454_v9  ;;  %v5861_v10 = vpop.f32.mrb[96].mxu1  ;;  %5914 = vmatprep.mubr.msk.f32.mxu0 %vm2055_vm5, %v3958_v18 }
 0x683   :  { %v3860_v26 = vadd.f32 1.0, %v6456_v44  ;;  %v8905_v42 = vadd.f32 %v5861_v10, %v8765_v33  ;;  %v3697_v16 = vpop.f32.mrb[97].mxu1  ;;  %5915 = vmatmul.mubr.msk.f32.gmra.mrb[122].mxu0 %vm2055_vm5, %v3959_v0  ;;  %v5089_v10 = vld [vmem:[%s9217_s7 + $0x30] sm:$0xff] }
 0x684   :  { %6465 = vrcp.f32 %v3861_v60  ;;  %v8909_v17 = vadd.f32 %v3697_v16, %v8765_v33 }
 0x685   :  { %6467 = vrcp.f32 %v3860_v26  ;;  %v5038_v34 = vmul.f32 -1.442695, %v8905_v42  ;;  %v5090_v26 = vld [vmem:[%s9217_s7 + $0x38] sm:$0xff] }
 0x686   :  { %v6458_v27 = vpop.eup %6457  ;;  %v5037_v59 = vmul.f32 -1.442695, %v8909_v17 }
 0x687   :  { %v6460_v15 = vpop.eup %6459  ;;  %6469 = vpow2.f32 %v5038_v34  ;;  %v3961_v56 = vmul.f32 %v6458_v27, %v8869_v21  ;;  %v6085_v34 = vpack.c.bf16 %v5090_v26, %v5089_v10 }
 0x688   :  { %v3960_v49 = vmul.f32 %v6460_v15, %v8873_v37  ;;  %6471 = vpow2.f32 %v5037_v59 }
 0x689   :  { %v6462_v54 = vpop.eup %6461  ;;  %6086 = vmatprep.subr.bf16.mxu1 %v6085_v34 }
 0x68a   :  { %v6464_v3 = vpop.eup %6463  ;;  %v3863_v29 = vadd.f32 1.0, %v6462_v54  ;;  %v5864_v61 = vpop.f32.mrb[98].mxu1  ;;  %5917 = vmatprep.mubr.msk.f32.mxu0 %vm2055_vm5, %v3960_v49  ;;  %6088 = vmatpush3.bf16.msra.mxu1 %v6085_v34 }
 0x68b   :  { %v3862_v35 = vadd.f32 1.0, %v6464_v3  ;;  %v8917_v18 = vadd.f32 %v5864_v61, %v8765_v33  ;;  %v3707_v9 = vpop.f32.mrb[99].mxu1  ;;  %5918 = vmatmul.mubr.msk.f32.gmra.mrb[124].mxu0 %vm2055_vm5, %v3961_v56 }
 0x68c   :  { %6473 = vrcp.f32 %v3863_v29  ;;  %v8921_v0 = vadd.f32 %v3707_v9, %v8765_v33 }
 0x68d   :  { %6475 = vrcp.f32 %v3862_v35  ;;  %v5040_v37 = vmul.f32 -1.442695, %v8917_v18 }
 0x68e   :  { %v6466_v21 = vpop.eup %6465  ;;  %v5039_v44 = vmul.f32 -1.442695, %v8921_v0 }
 0x68f   :  { %v6468_v60 = vpop.eup %6467  ;;  %6477 = vpow2.f32 %v5040_v37  ;;  %v3963_v59 = vmul.f32 %v6466_v21, %v8881_v11 }
 0x690   :  { %v3962_v16 = vmul.f32 %v6468_v60, %v8885_v40  ;;  %6479 = vpow2.f32 %v5039_v44 }
 0x691   :  { %v6470_v27 = vpop.eup %6469 }
 0x692   :  { %v6472_v15 = vpop.eup %6471  ;;  %v3865_v49 = vadd.f32 1.0, %v6470_v27  ;;  %v5867_v54 = vpop.f32.mrb[100].mxu1  ;;  %5920 = vmatprep.mubr.msk.f32.mxu0 %vm2055_vm5, %v3962_v16 }
 0x693   :  { %v3864_v56 = vadd.f32 1.0, %v6472_v15  ;;  %v3723_v3 = vadd.f32 %v5867_v54, %v8765_v33  ;;  %v3717_v29 = vpop.f32.mrb[101].mxu1  ;;  %5921 = vmatmul.mubr.msk.f32.gmra.mrb[126].mxu0 %vm2055_vm5, %v3963_v59 }
 0x694   :  { %6481 = vrcp.f32 %v3865_v49  ;;  %v3718_v40 = vadd.f32 %v3717_v29, %v8765_v33 }
 0x695   :  { %6483 = vrcp.f32 %v3864_v56  ;;  %v5042_v61 = vmul.f32 -1.442695, %v3723_v3 }
 0x696   :  { %v6474_v35 = vpop.eup %6473  ;;  %v5041_v11 = vmul.f32 -1.442695, %v3718_v40 }
 0x697   :  { %v6476_v9 = vpop.eup %6475  ;;  %6485 = vpow2.f32 %v5042_v61  ;;  %v3965_v44 = vmul.f32 %v6474_v35, %v8893_v45 }
 0x698   :  { %v3964_v37 = vmul.f32 %v6476_v9, %v8897_v53  ;;  %6487 = vpow2.f32 %v5041_v11 }
 0x699   :  { %v6478_v21 = vpop.eup %6477 }
 0x69a   :  { %v6480_v60 = vpop.eup %6479  ;;  %v3867_v10 = vadd.f32 1.0, %v6478_v21  ;;  %v5870_v26 = vpop.f32.mrb[102].mxu1  ;;  %5923 = vmatprep.mubr.msk.f32.mxu0 %vm2055_vm5, %v3964_v37 }
 0x69b   :  { %v3866_v16 = vadd.f32 1.0, %v6480_v60  ;;  %v3733_v34 = vadd.f32 %v5870_v26, %v8765_v33  ;;  %v3727_v27 = vpop.f32.mrb[103].mxu1  ;;  %5924 = vmatmul.mubr.msk.f32.gmra.mrb[128].mxu0 %vm2055_vm5, %v3965_v44 }
 0x69c   :  { %6489 = vrcp.f32 %v3867_v10  ;;  %v3728_v59 = vadd.f32 %v3727_v27, %v8765_v33 }
 0x69d   :  { %6491 = vrcp.f32 %v3866_v16  ;;  %v5044_v53 = vmul.f32 -1.442695, %v3733_v34 }
 0x69e   :  { %v6482_v15 = vpop.eup %6481  ;;  %v5043_v49 = vmul.f32 -1.442695, %v3728_v59 }
 0x69f   :  { %v6484_v54 = vpop.eup %6483  ;;  %6493 = vpow2.f32 %v5044_v53  ;;  %v3967_v29 = vmul.f32 %v6482_v15, %v8905_v42 }
 0x6a0   :  { %v3966_v45 = vmul.f32 %v6484_v54, %v8909_v17  ;;  %6495 = vpow2.f32 %v5043_v49  ;;  %v9226_v49 = vsub.s32 3, %v7379_v14 }
 0x6a1   :  { %v6486_v56 = vpop.eup %6485 }
 0x6a2   :  { %v6488_v61 = vpop.eup %6487  ;;  %v3869_v35 = vadd.f32 1.0, %v6486_v56  ;;  %5926 = vmatprep.mubr.msk.f32.mxu0 %vm2055_vm5, %v3966_v45  ;;  %v8958_v54 = vrot.slane %v8760_v52, %v9226_v49 }
 0x6a3   :  { %v3868_v11 = vadd.f32 1.0, %v6488_v61  ;;  %5927 = vmatmul.mubr.msk.f32.gmra.mrb[130].mxu0 %vm2055_vm5, %v3967_v29 }
 0x6a4   :  { %6497 = vrcp.f32 %v3869_v35 }
 0x6a5   :  { %6499 = vrcp.f32 %v3868_v11 }
 0x6a6   :  { %v6490_v33 = vpop.eup %6489 }
 0x6a7   :  { %v6492_v9 = vpop.eup %6491  ;;  %v3969_v17 = vmul.f32 %v6490_v33, %v8917_v18 }
 0x6a8   :  { %v3968_v37 = vmul.f32 %v6492_v9, %v8921_v0 }
 0x6a9   :  { %v6494_v21 = vpop.eup %6493 }
 0x6aa   :  { %v6496_v44 = vpop.eup %6495  ;;  %v3871_v60 = vadd.f32 1.0, %v6494_v21  ;;  %5929 = vmatprep.mubr.msk.f32.mxu0 %vm2055_vm5, %v3968_v37 }
 0x6ab   :  { %v3870_v42 = vadd.f32 1.0, %v6496_v44  ;;  %5930 = vmatmul.mubr.msk.f32.gmra.mrb[132].mxu0 %vm2055_vm5, %v3969_v17 }
 0x6ac   :  { %6501 = vrcp.f32 %v3871_v60 }
 0x6ad   :  { %6503 = vrcp.f32 %v3870_v42 }
 0x6ae   :  { %v6498_v10 = vpop.eup %6497 }
 0x6af   :  { %v6500_v26 = vpop.eup %6499  ;;  %v3971_v27 = vmul.f32 %v6498_v10, %v3723_v3 }
 0x6b0   :  { %v3970_v16 = vmul.f32 %v6500_v26, %v3718_v40 }
 0x6b2   :  { %5932 = vmatprep.mubr.msk.f32.mxu0 %vm2055_vm5, %v3970_v16 }
 0x6b3   :  { %5933 = vmatmul.mubr.msk.f32.gmra.mrb[134].mxu0 %vm2055_vm5, %v3971_v27 }
 0x6b6   :  { %v6502_v0 = vpop.eup %6501 }
 0x6b7   :  { %v6504_v53 = vpop.eup %6503  ;;  %v3973_v15 = vmul.f32 %v6502_v0, %v3733_v34 }
 0x6b8   :  { %v3972_v18 = vmul.f32 %v6504_v53, %v3728_v59 }
 0x6ba   :  { %5935 = vmatprep.mubr.msk.f32.mxu0 %vm2055_vm5, %v3972_v18 }
 0x6bb   :  { %5936 = vmatmul.mubr.msk.f32.gmra.mrb[136].mxu0 %vm2055_vm5, %v3973_v15 }
 0x70e   :  { %v5889_v45 = vpop.f32.mrb[104].mxu0 }
 0x70f   :  { %v4161_v3 = vadd.f32 %v5889_v45, %v8958_v54  ;;  %v4155_v40 = vpop.f32.mrb[105].mxu0 }
 0x710   :  { %v4156_v56 = vadd.f32 %v4155_v40, %v8958_v54 }
 0x711   :  { %v4325_v59 = vadd.f32 %v4161_v3, %v7907_v38 }
 0x712   :  { %v4324_v29 = vadd.f32 %v4156_v56, %v7910_v23 }
 0x714   :  { %5946 = vmatprep.mubr.msk.f32.mxu1 %vm420_vm3, %v4324_v29 }
 0x715   :  { %5947 = vmatmul.mubr.msk.f32.vlgmr.msra.gmra.mrb[104].mxu1 %vm420_vm3, %v4325_v59 }
 0x716   :  { %v5892_v34 = vpop.f32.mrb[106].mxu0 }
 0x717   :  { %v4171_v14 = vadd.f32 %v5892_v34, %v8958_v54  ;;  %v4165_v61 = vpop.f32.mrb[107].mxu0 }
 0x718   :  { %v4166_v52 = vadd.f32 %v4165_v61, %v8958_v54 }
 0x719   :  { %v4327_v11 = vadd.f32 %v4171_v14, %v7928_v24 }
 0x71a   :  { %v4326_v35 = vadd.f32 %v4166_v52, %v7932_v55 }
 0x71c   :  { %5949 = vmatprep.mubr.msk.f32.mxu1 %vm420_vm3, %v4326_v35 }
 0x71d   :  { %5950 = vmatmul.mubr.msk.f32.gmra.mrb[106].mxu1 %vm420_vm3, %v4327_v11 }
 0x71e   :  { %v5895_v23 = vpop.f32.mrb[108].mxu0 }
 0x71f   :  { %v4181_v38 = vadd.f32 %v5895_v23, %v8958_v54  ;;  %v4175_v33 = vpop.f32.mrb[109].mxu0 }
 0x720   :  { %v4176_v9 = vadd.f32 %v4175_v33, %v8958_v54 }
 0x721   :  { %v4329_v21 = vadd.f32 %v4181_v38, %v7950_v13 }
 0x722   :  { %v4328_v37 = vadd.f32 %v4176_v9, %v7954_v2 }
 0x724   :  { %5952 = vmatprep.mubr.msk.f32.mxu1 %vm420_vm3, %v4328_v37 }
 0x725   :  { %5953 = vmatmul.mubr.msk.f32.gmra.mrb[108].mxu1 %vm420_vm3, %v4329_v21 }
 0x726   :  { %v5898_v55 = vpop.f32.mrb[110].mxu0 }
 0x727   :  { %v4191_v24 = vadd.f32 %v5898_v55, %v8958_v54  ;;  %v4185_v17 = vpop.f32.mrb[111].mxu0 }
 0x728   :  { %v4186_v44 = vadd.f32 %v4185_v17, %v8958_v54 }
 0x729   :  { %v4331_v42 = vadd.f32 %v4191_v24, %v7972_v48 }
 0x72a   :  { %v4330_v60 = vadd.f32 %v4186_v44, %v7976_v57 }
 0x72c   :  { %5955 = vmatprep.mubr.msk.f32.mxu1 %vm420_vm3, %v4330_v60 }
 0x72d   :  { %5956 = vmatmul.mubr.msk.f32.gmra.mrb[110].mxu1 %vm420_vm3, %v4331_v42 }
 0x72e   :  { %v5901_v2 = vpop.f32.mrb[112].mxu0 }
 0x72f   :  { %v4201_v13 = vadd.f32 %v5901_v2, %v8958_v54  ;;  %v4195_v10 = vpop.f32.mrb[113].mxu0 }
 0x730   :  { %v4196_v26 = vadd.f32 %v4195_v10, %v8958_v54 }
 0x731   :  { %v4333_v27 = vadd.f32 %v4201_v13, %v7994_v28 }
 0x732   :  { %v4332_v16 = vadd.f32 %v4196_v26, %v7998_v4 }
 0x734   :  { %5958 = vmatprep.mubr.msk.f32.mxu1 %vm420_vm3, %v4332_v16 }
 0x735   :  { %5959 = vmatmul.mubr.msk.f32.gmra.mrb[112].mxu1 %vm420_vm3, %v4333_v27 }
 0x736   :  { %v5904_v57 = vpop.f32.mrb[114].mxu0 }
 0x737   :  { %v4211_v48 = vadd.f32 %v5904_v57, %v8958_v54  ;;  %v4205_v0 = vpop.f32.mrb[115].mxu0 }
 0x738   :  { %v4206_v53 = vadd.f32 %v4205_v0, %v8958_v54 }
 0x739   :  { %v4335_v15 = vadd.f32 %v4211_v48, %v8022_v7 }
 0x73a   :  { %v4334_v18 = vadd.f32 %v4206_v53, %v8026_v20 }
 0x73c   :  { %5961 = vmatprep.mubr.msk.f32.mxu1 %vm420_vm3, %v4334_v18 }
 0x73d   :  { %5962 = vmatmul.mubr.msk.f32.gmra.mrb[114].mxu1 %vm420_vm3, %v4335_v15 }
 0x73e   :  { %v5907_v4 = vpop.f32.mrb[116].mxu0 }
 0x73f   :  { %v4221_v28 = vadd.f32 %v5907_v4, %v8958_v54  ;;  %v4215_v49 = vpop.f32.mrb[117].mxu0 }
 0x740   :  { %v4216_v45 = vadd.f32 %v4215_v49, %v8958_v54 }
 0x741   :  { %v4337_v40 = vadd.f32 %v4221_v28, %v8050_v62 }
 0x742   :  { %v4336_v3 = vadd.f32 %v4216_v45, %v8054_v41 }
 0x744   :  { %5964 = vmatprep.mubr.msk.f32.mxu1 %vm420_vm3, %v4336_v3 }
 0x745   :  { %5965 = vmatmul.mubr.msk.f32.gmra.mrb[116].mxu1 %vm420_vm3, %v4337_v40 }
 0x746   :  { %v5910_v20 = vpop.f32.mrb[118].mxu0 }
 0x747   :  { %v4231_v7 = vadd.f32 %v5910_v20, %v8958_v54  ;;  %v4225_v56 = vpop.f32.mrb[119].mxu0 }
 0x748   :  { %v4226_v29 = vadd.f32 %v4225_v56, %v8958_v54 }
 0x749   :  { %v4339_v34 = vadd.f32 %v4231_v7, %v8072_v22 }
 0x74a   :  { %v4338_v59 = vadd.f32 %v4226_v29, %v8076_v19 }
 0x74c   :  { %5967 = vmatprep.mubr.msk.f32.mxu1 %vm420_vm3, %v4338_v59 }
 0x74d   :  { %5968 = vmatmul.mubr.msk.f32.gmra.mrb[118].mxu1 %vm420_vm3, %v4339_v34 }
 0x74e   :  { %v5913_v41 = vpop.f32.mrb[120].mxu0 }
 0x74f   :  { %v4241_v62 = vadd.f32 %v5913_v41, %v8958_v54  ;;  %v4235_v14 = vpop.f32.mrb[121].mxu0 }
 0x750   :  { %v4236_v61 = vadd.f32 %v4235_v14, %v8958_v54 }
 0x751   :  { %v4341_v35 = vadd.f32 %v4241_v62, %v8094_v6 }
 0x752   :  { %v4340_v52 = vadd.f32 %v4236_v61, %v8098_v25 }
 0x754   :  { %5970 = vmatprep.mubr.msk.f32.mxu1 %vm420_vm3, %v4340_v52 }
 0x755   :  { %5971 = vmatmul.mubr.msk.f32.gmra.mrb[120].mxu1 %vm420_vm3, %v4341_v35 }
 0x756   :  { %v5916_v19 = vpop.f32.mrb[122].mxu0 }
 0x757   :  { %v4251_v22 = vadd.f32 %v5916_v19, %v8958_v54  ;;  %v4245_v11 = vpop.f32.mrb[123].mxu0 }
 0x758   :  { %v4246_v23 = vadd.f32 %v4245_v11, %v8958_v54 }
 0x759   :  { %v4343_v33 = vadd.f32 %v4251_v22, %v8116_v5 }
 0x75a   :  { %v4342_v38 = vadd.f32 %v4246_v23, %v8120_v31 }
 0x75c   :  { %5973 = vmatprep.mubr.msk.f32.mxu1 %vm420_vm3, %v4342_v38 }
 0x75d   :  { %5974 = vmatmul.mubr.msk.f32.gmra.mrb[122].mxu1 %vm420_vm3, %v4343_v33 }
 0x75e   :  { %v5919_v25 = vpop.f32.mrb[124].mxu0 }
 0x75f   :  { %v4261_v6 = vadd.f32 %v5919_v25, %v8958_v54  ;;  %v4255_v9 = vpop.f32.mrb[125].mxu0 }
 0x760   :  { %v4256_v37 = vadd.f32 %v4255_v9, %v8958_v54 }
 0x761   :  { %v4345_v55 = vadd.f32 %v4261_v6, %v8138_v46 }
 0x762   :  { %v4344_v21 = vadd.f32 %v4256_v37, %v8142_v47 }
 0x764   :  { %5976 = vmatprep.mubr.msk.f32.mxu1 %vm420_vm3, %v4344_v21 }
 0x765   :  { %5977 = vmatmul.mubr.msk.f32.gmra.mrb[124].mxu1 %vm420_vm3, %v4345_v55 }
 0x766   :  { %v5922_v31 = vpop.f32.mrb[126].mxu0 }
 0x767   :  { %v4271_v5 = vadd.f32 %v5922_v31, %v8958_v54  ;;  %v4265_v24 = vpop.f32.mrb[127].mxu0 }
 0x768   :  { %v4266_v17 = vadd.f32 %v4265_v24, %v8958_v54 }
 0x769   :  { %v4347_v60 = vadd.f32 %v4271_v5, %v8160_v30 }
 0x76a   :  { %v4346_v44 = vadd.f32 %v4266_v17, %v8164_v32 }
 0x76c   :  { %5979 = vmatprep.mubr.msk.f32.mxu1 %vm420_vm3, %v4346_v44 }
 0x76d   :  { %5980 = vmatmul.mubr.msk.f32.gmra.mrb[126].mxu1 %vm420_vm3, %v4347_v60 }
 0x76e   :  { %v5925_v47 = vpop.f32.mrb[128].mxu0 }
 0x76f   :  { %v4281_v46 = vadd.f32 %v5925_v47, %v8958_v54  ;;  %v4275_v42 = vpop.f32.mrb[129].mxu0 }
 0x770   :  { %v4276_v2 = vadd.f32 %v4275_v42, %v8958_v54 }
 0x771   :  { %v4349_v10 = vadd.f32 %v4281_v46, %v8182_v39 }
 0x772   :  { %v4348_v13 = vadd.f32 %v4276_v2, %v8186_v58 }
 0x774   :  { %5982 = vmatprep.mubr.msk.f32.mxu1 %vm420_vm3, %v4348_v13 }
 0x775   :  { %5983 = vmatmul.mubr.msk.f32.gmra.mrb[128].mxu1 %vm420_vm3, %v4349_v10 }
 0x776   :  { %v5928_v32 = vpop.f32.mrb[130].mxu0 }
 0x777   :  { %v4291_v30 = vadd.f32 %v5928_v32, %v8958_v54  ;;  %v4285_v26 = vpop.f32.mrb[131].mxu0 }
 0x778   :  { %v4286_v16 = vadd.f32 %v4285_v26, %v8958_v54 }
 0x779   :  { %v4351_v57 = vadd.f32 %v4291_v30, %v8204_v51 }
 0x77a   :  { %v4350_v27 = vadd.f32 %v4286_v16, %v8208_v1 }
 0x77c   :  { %5985 = vmatprep.mubr.msk.f32.mxu1 %vm420_vm3, %v4350_v27 }
 0x77d   :  { %5986 = vmatmul.mubr.msk.f32.gmra.mrb[130].mxu1 %vm420_vm3, %v4351_v57 }
 0x77e   :  { %v5931_v58 = vpop.f32.mrb[132].mxu0 }
 0x77f   :  { %v4301_v39 = vadd.f32 %v5931_v58, %v8958_v54  ;;  %v4295_v48 = vpop.f32.mrb[133].mxu0 }
 0x780   :  { %v4296_v0 = vadd.f32 %v4295_v48, %v8958_v54 }
 0x781   :  { %v4353_v18 = vadd.f32 %v4301_v39, %v8226_v63 }
 0x782   :  { %v4352_v53 = vadd.f32 %v4296_v0, %v8230_v8 }
 0x784   :  { %5988 = vmatprep.mubr.msk.f32.mxu1 %vm420_vm3, %v4352_v53 }
 0x785   :  { %5989 = vmatmul.mubr.msk.f32.gmra.mrb[132].mxu1 %vm420_vm3, %v4353_v18 }
 0x786   :  { %v5934_v1 = vpop.f32.mrb[134].mxu0 }
 0x787   :  { %v4311_v51 = vadd.f32 %v5934_v1, %v8958_v54  ;;  %v4305_v15 = vpop.f32.mrb[135].mxu0 }
 0x788   :  { %v4306_v4 = vadd.f32 %v4305_v15, %v8958_v54 }
 0x789   :  { %v4355_v49 = vadd.f32 %v4311_v51, %v8248_v36 }
 0x78a   :  { %v4354_v28 = vadd.f32 %v4306_v4, %v8252_v12 }
 0x78c   :  { %5991 = vmatprep.mubr.msk.f32.mxu1 %vm420_vm3, %v4354_v28 }
 0x78d   :  { %5992 = vmatmul.mubr.msk.f32.gmra.mrb[134].mxu1 %vm420_vm3, %v4355_v49 }
 0x78e   :  { %v5937_v8 = vpop.f32.mrb[136].mxu0 }
 0x78f   :  { %v4321_v63 = vadd.f32 %v5937_v8, %v8958_v54  ;;  %v4315_v45 = vpop.f32.mrb[137].mxu0 }
 0x790   :  { %v4316_v3 = vadd.f32 %v4315_v45, %v8958_v54 }
 0x791   :  { %v4357_v20 = vadd.f32 %v4321_v63, %v8270_v43 }
 0x792   :  { %v4356_v40 = vadd.f32 %v4316_v3, %v8274_v50 }
 0x794   :  { %5994 = vmatprep.mubr.msk.f32.mxu1 %vm420_vm3, %v4356_v40 }
 0x795   :  { %5995 = vmatmul.mubr.msk.f32.gmra.mrb[136].mxu1 %vm420_vm3, %v4357_v20 }
 0x7e8   :  { %v5948_v12 = vpop.f32.mrb[104].mxu1 }
 0x7e9   :  { %5126 = vst.msk [vmem:[%s9220_s10 + $0x118] sm:$0xff] %vm420_vm3, %v5948_v12  ;;  %v4531_v36 = vpop.f32.mrb[105].mxu1 }
 0x7ea   :  { %5125 = vst.msk [vmem:[%s9220_s10 + $0x110] sm:$0xff] %vm420_vm3, %v4531_v36 }
 0x7eb   :  { %6518 = shalt.err (!%p6515_p4)
}
 0x7ec   :  { %s6519_s26 = scalar_lea.hbm %s9222_s12, 32 }
 0x7ed   :  { %p6520_p5 = scmp.ne.s32.totalorder %s9222_s12, %s6519_s26  ;;  %p6523_p6 = scmp.lt.u32.totalorder %s6519_s26, %s9222_s12 }
 0x7ef   :  { %p6525_p7 = pnand %p6523_p6, %p6520_p5 }
 0x7f1   :  { %6528 = shalt.err (!%p6525_p7)
}
 0x7f2   :  { %4748 = dma.vmem_to_hbm [thread:$0]  %s4746_s3, 32, %s9222_s12, [#allocation3]   ;;  %v5951_v43 = vpop.f32.mrb[106].mxu1 }
 0x7f3   :  { %5128 = vst.msk [vmem:[%s9220_s10 + $0x128] sm:$0xff] %vm420_vm3, %v5951_v43  ;;  %v4541_v50 = vpop.f32.mrb[107].mxu1 }
 0x7f4   :  { %5127 = vst.msk [vmem:[%s9220_s10 + $0x120] sm:$0xff] %vm420_vm3, %v4541_v50 }
 0x7f8   :  { %v5954_v54 = vpop.f32.mrb[108].mxu1 }
 0x7f9   :  { %5130 = vst.msk [vmem:[%s9220_s10 + $0x138] sm:$0xff] %vm420_vm3, %v5954_v54  ;;  %v4551_v7 = vpop.f32.mrb[109].mxu1 }
 0x7fa   :  { %5129 = vst.msk [vmem:[%s9220_s10 + $0x130] sm:$0xff] %vm420_vm3, %v4551_v7 }
 0x800   :  { %v5957_v56 = vpop.f32.mrb[110].mxu1 }
 0x801   :  { %5132 = vst.msk [vmem:[%s9220_s10 + $0x148] sm:$0xff] %vm420_vm3, %v5957_v56  ;;  %v4561_v29 = vpop.f32.mrb[111].mxu1 }
 0x802   :  { %5131 = vst.msk [vmem:[%s9220_s10 + $0x140] sm:$0xff] %vm420_vm3, %v4561_v29 }
 0x808   :  { %v5960_v59 = vpop.f32.mrb[112].mxu1 }
 0x809   :  { %5134 = vst.msk [vmem:[%s9220_s10 + $0x158] sm:$0xff] %vm420_vm3, %v5960_v59  ;;  %v4571_v34 = vpop.f32.mrb[113].mxu1 }
 0x80a   :  { %5133 = vst.msk [vmem:[%s9220_s10 + $0x150] sm:$0xff] %vm420_vm3, %v4571_v34 }
 0x810   :  { %v5963_v41 = vpop.f32.mrb[114].mxu1 }
 0x811   :  { %5136 = vst.msk [vmem:[%s9220_s10 + $0x168] sm:$0xff] %vm420_vm3, %v5963_v41  ;;  %v4581_v62 = vpop.f32.mrb[115].mxu1 }
 0x812   :  { %5135 = vst.msk [vmem:[%s9220_s10 + $0x160] sm:$0xff] %vm420_vm3, %v4581_v62 }
 0x818   :  { %v5966_v14 = vpop.f32.mrb[116].mxu1 }
 0x819   :  { %5138 = vst.msk [vmem:[%s9220_s10 + $0x178] sm:$0xff] %vm420_vm3, %v5966_v14  ;;  %v4591_v61 = vpop.f32.mrb[117].mxu1 }
 0x81a   :  { %5137 = vst.msk [vmem:[%s9220_s10 + $0x170] sm:$0xff] %vm420_vm3, %v4591_v61 }
 0x820   :  { %v5969_v52 = vpop.f32.mrb[118].mxu1 }
 0x821   :  { %5140 = vst.msk [vmem:[%s9220_s10 + $0x188] sm:$0xff] %vm420_vm3, %v5969_v52  ;;  %v4601_v35 = vpop.f32.mrb[119].mxu1 }
 0x822   :  { %5139 = vst.msk [vmem:[%s9220_s10 + $0x180] sm:$0xff] %vm420_vm3, %v4601_v35 }
 0x828   :  { %v5972_v19 = vpop.f32.mrb[120].mxu1 }
 0x829   :  { %5142 = vst.msk [vmem:[%s9220_s10 + $0x198] sm:$0xff] %vm420_vm3, %v5972_v19  ;;  %v4611_v22 = vpop.f32.mrb[121].mxu1 }
 0x82a   :  { %5141 = vst.msk [vmem:[%s9220_s10 + $0x190] sm:$0xff] %vm420_vm3, %v4611_v22 }
 0x830   :  { %v5975_v11 = vpop.f32.mrb[122].mxu1 }
 0x831   :  { %5144 = vst.msk [vmem:[%s9220_s10 + $0x1a8] sm:$0xff] %vm420_vm3, %v5975_v11  ;;  %v4621_v23 = vpop.f32.mrb[123].mxu1 }
 0x832   :  { %5143 = vst.msk [vmem:[%s9220_s10 + $0x1a0] sm:$0xff] %vm420_vm3, %v4621_v23 }
 0x838   :  { %v5978_v38 = vpop.f32.mrb[124].mxu1 }
 0x839   :  { %5146 = vst.msk [vmem:[%s9220_s10 + $0x1b8] sm:$0xff] %vm420_vm3, %v5978_v38  ;;  %v4631_v33 = vpop.f32.mrb[125].mxu1 }
 0x83a   :  { %5145 = vst.msk [vmem:[%s9220_s10 + $0x1b0] sm:$0xff] %vm420_vm3, %v4631_v33 }
 0x840   :  { %v5981_v25 = vpop.f32.mrb[126].mxu1 }
 0x841   :  { %5148 = vst.msk [vmem:[%s9220_s10 + $0x1c8] sm:$0xff] %vm420_vm3, %v5981_v25  ;;  %v4641_v6 = vpop.f32.mrb[127].mxu1 }
 0x842   :  { %5147 = vst.msk [vmem:[%s9220_s10 + $0x1c0] sm:$0xff] %vm420_vm3, %v4641_v6 }
 0x848   :  { %v5984_v9 = vpop.f32.mrb[128].mxu1 }
 0x849   :  { %5150 = vst.msk [vmem:[%s9220_s10 + $0x1d8] sm:$0xff] %vm420_vm3, %v5984_v9  ;;  %v4651_v37 = vpop.f32.mrb[129].mxu1 }
 0x84a   :  { %5149 = vst.msk [vmem:[%s9220_s10 + $0x1d0] sm:$0xff] %vm420_vm3, %v4651_v37 }
 0x850   :  { %v5987_v21 = vpop.f32.mrb[130].mxu1 }
 0x851   :  { %5152 = vst.msk [vmem:[%s9220_s10 + $0x1e8] sm:$0xff] %vm420_vm3, %v5987_v21  ;;  %v4661_v55 = vpop.f32.mrb[131].mxu1 }
 0x852   :  { %5151 = vst.msk [vmem:[%s9220_s10 + $0x1e0] sm:$0xff] %vm420_vm3, %v4661_v55 }
 0x858   :  { %v5990_v31 = vpop.f32.mrb[132].mxu1 }
 0x859   :  { %5154 = vst.msk [vmem:[%s9220_s10 + $0x1f8] sm:$0xff] %vm420_vm3, %v5990_v31  ;;  %v4671_v5 = vpop.f32.mrb[133].mxu1 }
 0x85a   :  { %5153 = vst.msk [vmem:[%s9220_s10 + $0x1f0] sm:$0xff] %vm420_vm3, %v4671_v5 }
 0x860   :  { %v5993_v24 = vpop.f32.mrb[134].mxu1 }
 0x861   :  { %5156 = vst.msk [vmem:[%s9220_s10 + $0x208] sm:$0xff] %vm420_vm3, %v5993_v24  ;;  %v4681_v17 = vpop.f32.mrb[135].mxu1 }
 0x862   :  { %5155 = vst.msk [vmem:[%s9220_s10 + $0x200] sm:$0xff] %vm420_vm3, %v4681_v17 }
 0x868   :  { %v5996_v44 = vpop.f32.mrb[136].mxu1 }
 0x869   :  { %5158 = vst.msk [vmem:[%s9220_s10 + $0x218] sm:$0xff] %vm420_vm3, %v5996_v44  ;;  %v4691_v60 = vpop.f32.mrb[137].mxu1 }
 0x86a   :  { %5157 = vst.msk [vmem:[%s9220_s10 + $0x210] sm:$0xff] %vm420_vm3, %v4691_v60 }
 0x86b   :  { %6529 = dma.done.wait [#allocation3], 32  }
 0x86c   :  { %6530 = vsyncadd [#allocation3], 4294967264 }
 0x86d   :  { %4756 = vsyncpa [#allocation3], 1 }

</bundles_post_ra>
